<compile_context>
chip_gen: v6e
topology: v6e:2x2x1
jax: 0.10.0
libtpu: 0.0.40
codegen_flags: <defaults>
</compile_context>

<pallas_src>
import functools

import jax
import jax.numpy as jnp
from jax import lax
from jax.experimental import pallas as pl
from jax.experimental.pallas import tpu as pltpu

LEAKY_SLOPE = 0.2
BN_EPS = 1e-5
VMEM_LIMIT = 32 * 1024 * 1024  # generous headroom; tiles use ~2 MiB


def _round_up(x, m):
    return (x + m - 1) // m * m


# ----------------------------- Pallas kernels ------------------------------ #

def _matmul_act_kernel(x_ref, w_ref, o_ref, acc_ref, *, act):
    """Tiled o = act(x @ w); K is the last (reduction) grid axis."""
    k = pl.program_id(2)

    @pl.when(k == 0)
    def _():
        acc_ref[...] = jnp.zeros_like(acc_ref)

    acc_ref[...] += jnp.dot(x_ref[...], w_ref[...],
                            preferred_element_type=jnp.float32)

    @pl.when(k == pl.num_programs(2) - 1)
    def _():
        y = acc_ref[...]
        if act == "leaky":
            y = jnp.where(y > 0, y, LEAKY_SLOPE * y)
        elif act == "sigmoid":
            y = pl.reciprocal(1.0 + jnp.exp(-y), approx=True)
        o_ref[...] = y.astype(o_ref.dtype)


def _matmul_stats_kernel(x_ref, w_ref, o_ref, stats_ref, acc_ref):
    """Conv matmul that also emits per-channel sum / sum-of-squares partials
    (rows 0 and 1 of an (8, TN) block per M-tile) for fused BatchNorm stats."""
    k = pl.program_id(2)

    @pl.when(k == 0)
    def _():
        acc_ref[...] = jnp.zeros_like(acc_ref)

    acc_ref[...] += jnp.dot(x_ref[...], w_ref[...],
                            preferred_element_type=jnp.float32)

    @pl.when(k == pl.num_programs(2) - 1)
    def _():
        y = acc_ref[...]
        o_ref[...] = y
        tn = y.shape[1]
        s = jnp.sum(y, axis=0, keepdims=True)           # (1, TN)
        ss = jnp.sum(y * y, axis=0, keepdims=True)      # (1, TN)
        row = lax.broadcasted_iota(jnp.int32, (8, tn), 0)
        stats_ref[...] = jnp.where(
            row == 0, jnp.broadcast_to(s, (8, tn)),
            jnp.where(row == 1, jnp.broadcast_to(ss, (8, tn)), 0.0))


def _affine_leaky_kernel(x_ref, s_ref, b_ref, o_ref):
    """o = leaky_relu(x * s + b)   (BatchNorm apply + activation), f32 math."""
    y = x_ref[...] * s_ref[...] + b_ref[...]
    o_ref[...] = jnp.where(y > 0, y, LEAKY_SLOPE * y).astype(o_ref.dtype)


# ----------------------------- kernel wrappers ----------------------------- #

def _tile_sizes(M, K, N):
    """Pick TPU-friendly tile sizes and padded extents."""
    if M >= 512:
        TM, Mp = 512, _round_up(M, 512)
    else:
        TM = Mp = _round_up(M, 8)
    Kp = _round_up(K, 128)
    if Kp > 512:
        Kp = _round_up(Kp, 512)
        TK = 512
    else:
        TK = Kp
    Np = _round_up(N, 128)
    TN = 128
    return TM, TK, TN, Mp, Kp, Np


def fused_matmul(x, w, *, act=None, with_stats=False, out_dtype=jnp.float32):
    """x:(M,K) @ w:(K,N) as a gridded Pallas matmul (bf16 operands, f32 acc).

    Returns padded output (Mp, Np) [and (nm*8, Np) BN-stat partials]."""
    M, K = x.shape
    N = w.shape[1]
    TM, TK, TN, Mp, Kp, Np = _tile_sizes(M, K, N)
    nm, nn, nk = Mp // TM, Np // TN, Kp // TK

    xp = jnp.zeros((Mp, Kp), jnp.bfloat16).at[:M, :K].set(x.astype(jnp.bfloat16))
    wp = jnp.zeros((Kp, Np), jnp.bfloat16).at[:K, :N].set(w.astype(jnp.bfloat16))

    x_spec = pl.BlockSpec((TM, TK), lambda i, j, k: (i, k))
    w_spec = pl.BlockSpec((TK, TN), lambda i, j, k: (k, j))
    o_spec = pl.BlockSpec((TM, TN), lambda i, j, k: (i, j))
    scratch = [pltpu.VMEM((TM, TN), jnp.float32)]
    cparams = pltpu.CompilerParams(
        dimension_semantics=("parallel", "parallel", "arbitrary"),
        vmem_limit_bytes=VMEM_LIMIT)

    if with_stats:
        stats_spec = pl.BlockSpec((8, TN), lambda i, j, k: (i, j))
        conv, stats = pl.pallas_call(
            _matmul_stats_kernel,
            out_shape=(jax.ShapeDtypeStruct((Mp, Np), jnp.float32),
                       jax.ShapeDtypeStruct((nm * 8, Np), jnp.float32)),
            grid_spec=pltpu.PrefetchScalarGridSpec(
                num_scalar_prefetch=0, grid=(nm, nn, nk),
                in_specs=[x_spec, w_spec],
                out_specs=(o_spec, stats_spec),
                scratch_shapes=scratch),
            compiler_params=cparams,
        )(xp, wp)
        return conv, stats

    out = pl.pallas_call(
        functools.partial(_matmul_act_kernel, act=act),
        out_shape=jax.ShapeDtypeStruct((Mp, Np), out_dtype),
        grid_spec=pltpu.PrefetchScalarGridSpec(
            num_scalar_prefetch=0, grid=(nm, nn, nk),
            in_specs=[x_spec, w_spec],
            out_specs=o_spec,
            scratch_shapes=scratch),
        compiler_params=cparams,
    )(xp, wp)
    return out


def affine_leaky(conv_p, scale, bias, n_real):
    """Apply per-channel BN scale/bias + LeakyReLU on the padded conv output."""
    Mp, Np = conv_p.shape
    sp = jnp.zeros((1, Np), jnp.float32).at[0, :n_real].set(scale)
    bp = jnp.zeros((1, Np), jnp.float32).at[0, :n_real].set(bias)
    TM = 512 if Mp >= 512 else Mp
    TN = 128
    grid = (Mp // TM, Np // TN)
    return pl.pallas_call(
        _affine_leaky_kernel,
        out_shape=jax.ShapeDtypeStruct((Mp, Np), jnp.bfloat16),
        grid_spec=pltpu.PrefetchScalarGridSpec(
            num_scalar_prefetch=0, grid=grid,
            in_specs=[pl.BlockSpec((TM, TN), lambda i, j: (i, j)),
                      pl.BlockSpec((1, TN), lambda i, j: (0, j)),
                      pl.BlockSpec((1, TN), lambda i, j: (0, j))],
            out_specs=pl.BlockSpec((TM, TN), lambda i, j: (i, j))),
        compiler_params=pltpu.CompilerParams(
            dimension_semantics=("parallel", "parallel"),
            vmem_limit_bytes=VMEM_LIMIT),
    )(conv_p, sp, bp)


# ------------------------------- JAX glue ---------------------------------- #

def im2col(x_nhwc, k, stride, pad):
    """Extract kxk patches -> (N*Ho*Wo, k*k*C), ordering (kh, kw, cin)."""
    N, H, W, C = x_nhwc.shape
    Ho = (H + 2 * pad - k) // stride + 1
    Wo = (W + 2 * pad - k) // stride + 1
    xp = jnp.pad(x_nhwc, ((0, 0), (pad, pad), (pad, pad), (0, 0)))
    cols = []
    for di in range(k):
        for dj in range(k):
            cols.append(
                xp[:, di:di + (Ho - 1) * stride + 1:stride,
                      dj:dj + (Wo - 1) * stride + 1:stride, :])
    patches = jnp.stack(cols, axis=3)            # (N, Ho, Wo, k*k, C)
    return patches.reshape(N * Ho * Wo, k * k * C), N, Ho, Wo


def _w_to_mat(w_pt):
    """PyTorch conv weight (Cout,Cin,kh,kw) -> (kh*kw*Cin, Cout)."""
    cout = w_pt.shape[0]
    return jnp.transpose(w_pt, (2, 3, 1, 0)).reshape(-1, cout)


def conv_leaky(x_nhwc, w_pt, stride, pad):
    cout = w_pt.shape[0]
    X, n, ho, wo = im2col(x_nhwc, w_pt.shape[2], stride, pad)
    M = X.shape[0]
    y = fused_matmul(X, _w_to_mat(w_pt), act="leaky", out_dtype=jnp.bfloat16)
    return y[:M, :cout].reshape(n, ho, wo, cout)


def conv_bn_leaky(x_nhwc, w_pt, gamma, beta, stride, pad):
    cout = w_pt.shape[0]
    X, n, ho, wo = im2col(x_nhwc, w_pt.shape[2], stride, pad)
    M = X.shape[0]
    conv_p, stats = fused_matmul(X, _w_to_mat(w_pt), with_stats=True)
    # BatchNorm2d training-mode batch statistics (biased variance, eps=1e-5).
    sums = jnp.sum(stats[0::8, :cout], axis=0)
    sumsq = jnp.sum(stats[1::8, :cout], axis=0)
    mean = sums / M
    var = jnp.maximum(sumsq / M - mean * mean, 0.0)
    scale = gamma / jnp.sqrt(var + BN_EPS)
    bias = beta - mean * scale
    y = affine_leaky(conv_p, scale, bias, cout)
    return y[:M, :cout].reshape(n, ho, wo, cout)


def conv_sigmoid(x_nhwc, w_pt, stride, pad):
    cout = w_pt.shape[0]
    X, n, ho, wo = im2col(x_nhwc, w_pt.shape[2], stride, pad)
    M = X.shape[0]
    y = fused_matmul(X, _w_to_mat(w_pt), act="sigmoid", out_dtype=jnp.float32)
    return y[:M, :cout].reshape(n, ho, wo, cout)


def discriminator_forward(x_nchw, params):
    # NCHW -> NHWC, bf16 activations between layers (matmul operands are bf16).
    x = jnp.transpose(x_nchw, (0, 2, 3, 1)).astype(jnp.bfloat16)
    x = conv_leaky(x, params["w1"], 2, 1)
    x = conv_bn_leaky(x, params["w2"], params["g2"], params["b2"], 2, 1)
    x = conv_bn_leaky(x, params["w3"], params["g3"], params["b3"], 2, 1)
    x = conv_bn_leaky(x, params["w4"], params["g4"], params["b4"], 2, 1)
    x = conv_sigmoid(x, params["w5"], 1, 0)
    return jnp.transpose(x, (0, 3, 1, 2)).astype(jnp.float32)         # -> NCHW


def init_params(key, nc, ndf):
    ks = jax.random.split(key, 8)

    def conv_w(k, cout, cin):
        return (0.02 * jax.random.normal(k, (cout, cin, 4, 4))).astype(jnp.float32)

    return {
        "w1": conv_w(ks[0], ndf, nc),
        "w2": conv_w(ks[1], ndf * 2, ndf),
        "g2": (1.0 + 0.02 * jax.random.normal(ks[2], (ndf * 2,))).astype(jnp.float32),
        "b2": jnp.zeros((ndf * 2,), jnp.float32),
        "w3": conv_w(ks[3], ndf * 4, ndf * 2),
        "g3": (1.0 + 0.02 * jax.random.normal(ks[4], (ndf * 4,))).astype(jnp.float32),
        "b3": jnp.zeros((ndf * 4,), jnp.float32),
        "w4": conv_w(ks[5], ndf * 8, ndf * 4),
        "g4": (1.0 + 0.02 * jax.random.normal(ks[6], (ndf * 8,))).astype(jnp.float32),
        "b4": jnp.zeros((ndf * 8,), jnp.float32),
        "w5": conv_w(ks[7], 1, ndf * 8),
    }


if __name__ == "__main__":
    # DCGAN discriminator expects 64x64 inputs (spatial 64->32->16->8->4->1).
    nc, ndf, batch = 3, 8, 2
    key = jax.random.PRNGKey(0)
    k_param, k_x = jax.random.split(key)
    params = init_params(k_param, nc, ndf)
    x = jax.random.normal(k_x, (batch, nc, 64, 64), dtype=jnp.float32)

    out = jax.jit(discriminator_forward)(x, params)
    out = jax.block_until_ready(out)
    assert out.shape == (batch, 1, 1, 1), out.shape
    assert bool(jnp.all(jnp.isfinite(out)))
    assert bool(jnp.all((out >= 0.0) & (out <= 1.0)))
    print("KERNEL_OK")
</pallas_src>

<mosaic_0001>
module attributes {stable_mosaic.version = 11 : i64} {
  func.func @_matmul_act_kernel(%arg0: i32, %arg1: i32, %arg2: i32, %arg3: memref<512x128xbf16, #tpu.memory_space<vmem>>, %arg4: memref<128x128xbf16, #tpu.memory_space<vmem>>, %arg5: memref<512x128xbf16, #tpu.memory_space<vmem>>, %arg6: memref<512x128xf32, #tpu.memory_space<vmem>>) attributes {dimension_semantics = [#tpu.dimension_semantics<parallel>, #tpu.dimension_semantics<parallel>, #tpu.dimension_semantics<arbitrary>], iteration_bounds = array<i64: 4, 1, 1>, scalar_prefetch = 0 : i64, scratch_operands = 1 : i64, tpu.core_type = #tpu.core_type<tc>, window_params = [{transform_indices = @transform_0, window_bounds = array<i64: 512, 128>}, {transform_indices = @transform_1, window_bounds = array<i64: 128, 128>}, {transform_indices = @transform_2, window_bounds = array<i64: 512, 128>}]} {
    %c0_i32 = arith.constant 0 : i32
    %0 = arith.cmpi eq, %arg2, %c0_i32 : i32
    %1 = arith.extui %0 : i1 to i32
    %c0_i32_0 = arith.constant 0 : i32
    %2 = arith.cmpi ne, %1, %c0_i32_0 : i32
    scf.if %2 {
      %cst_10 = arith.constant 0.000000e+00 : f32
      %12 = vector.broadcast %cst_10 : f32 to vector<512x128xf32>
      %c0_11 = arith.constant 0 : index
      %c0_12 = arith.constant 0 : index
      %13 = vector.load %arg6[%c0_11, %c0_12] : memref<512x128xf32, #tpu.memory_space<vmem>>, vector<512x128xf32>
      tpu.vector_store %arg6[%c0_11, %c0_12], %12 {strides = array<i32>} : memref<512x128xf32, #tpu.memory_space<vmem>>, vector<512x128xf32>,
    } else {
    }
    %c0 = arith.constant 0 : index
    %c0_1 = arith.constant 0 : index
    %3 = vector.load %arg6[%c0, %c0_1] : memref<512x128xf32, #tpu.memory_space<vmem>>, vector<512x128xf32>
    %c0_2 = arith.constant 0 : index
    %c0_3 = arith.constant 0 : index
    %4 = vector.load %arg3[%c0_2, %c0_3] : memref<512x128xbf16, #tpu.memory_space<vmem>>, vector<512x128xbf16>
    %c0_4 = arith.constant 0 : index
    %c0_5 = arith.constant 0 : index
    %5 = vector.load %arg4[%c0_4, %c0_5] : memref<128x128xbf16, #tpu.memory_space<vmem>>, vector<128x128xbf16>
    %cst = arith.constant dense<0.000000e+00> : vector<512x128xf32>
    %6 = tpu.matmul %4, %5, %cst {dimension_numbers = #tpu.dot_dimension_numbers<[1], [0], [0], [1], [0, 0, 1, 1], [], []>} : vector<512x128xbf16>, vector<128x128xbf16>, vector<512x128xf32> -> vector<512x128xf32>
    %7 = arith.addf %3, %6 : vector<512x128xf32>
    %c0_6 = arith.constant 0 : index
    %c0_7 = arith.constant 0 : index
    %8 = vector.load %arg6[%c0_6, %c0_7] : memref<512x128xf32, #tpu.memory_space<vmem>>, vector<512x128xf32>
    tpu.vector_store %arg6[%c0_6, %c0_7], %7 {strides = array<i32>} : memref<512x128xf32, #tpu.memory_space<vmem>>, vector<512x128xf32>,
    %c0_i32_8 = arith.constant 0 : i32
    %9 = arith.cmpi eq, %arg2, %c0_i32_8 : i32
    %10 = arith.extui %9 : i1 to i32
    %c0_i32_9 = arith.constant 0 : i32
    %11 = arith.cmpi ne, %10, %c0_i32_9 : i32
    scf.if %11 {
      %c0_10 = arith.constant 0 : index
      %c0_11 = arith.constant 0 : index
      %12 = vector.load %arg6[%c0_10, %c0_11] : memref<512x128xf32, #tpu.memory_space<vmem>>, vector<512x128xf32>
      %cst_12 = arith.constant 0.000000e+00 : f32
      %13 = vector.broadcast %cst_12 : f32 to vector<512x128xf32>
      %14 = arith.cmpf ogt, %12, %13 : vector<512x128xf32>
      %cst_13 = arith.constant 2.000000e-01 : f32
      %15 = vector.broadcast %cst_13 : f32 to vector<512x128xf32>
      %16 = arith.mulf %15, %12 : vector<512x128xf32>
      %17 = arith.select %14, %12, %16 : vector<512x128xi1>, vector<512x128xf32>
      %18 = arith.truncf %17 : vector<512x128xf32> to vector<512x128xbf16>
      %c0_14 = arith.constant 0 : index
      %c0_15 = arith.constant 0 : index
      %19 = vector.load %arg5[%c0_14, %c0_15] : memref<512x128xbf16, #tpu.memory_space<vmem>>, vector<512x128xbf16>
      tpu.vector_store %arg5[%c0_14, %c0_15], %18 {strides = array<i32>} : memref<512x128xbf16, #tpu.memory_space<vmem>>, vector<512x128xbf16>,
    } else {
    }
    return
  }
  func.func @transform_0(%arg0: i32, %arg1: i32, %arg2: i32) -> (i32, i32) {
    %c0_i32 = arith.constant 0 : i32
    return %arg0, %arg2 : i32, i32
  }
  func.func @transform_1(%arg0: i32, %arg1: i32, %arg2: i32) -> (i32, i32) {
    %c0_i32 = arith.constant 0 : i32
    return %arg2, %arg1 : i32, i32
  }
  func.func @transform_2(%arg0: i32, %arg1: i32, %arg2: i32) -> (i32, i32) {
    %c0_i32 = arith.constant 0 : i32
    return %arg0, %arg1 : i32, i32
  }
}

module attributes {stable_mosaic.version = 11 : i64} {
  func.func @_matmul_stats_kernel(%arg0: i32, %arg1: i32, %arg2: i32, %arg3: memref<512x128xbf16, #tpu.memory_space<vmem>>, %arg4: memref<128x128xbf16, #tpu.memory_space<vmem>>, %arg5: memref<512x128xf32, #tpu.memory_space<vmem>>, %arg6: memref<8x128xf32, #tpu.memory_space<vmem>>, %arg7: memref<512x128xf32, #tpu.memory_space<vmem>>) attributes {dimension_semantics = [#tpu.dimension_semantics<parallel>, #tpu.dimension_semantics<parallel>, #tpu.dimension_semantics<arbitrary>], iteration_bounds = array<i64: 1, 1, 1>, scalar_prefetch = 0 : i64, scratch_operands = 1 : i64, tpu.core_type = #tpu.core_type<tc>, window_params = [{transform_indices = @transform_0, window_bounds = array<i64: 512, 128>}, {transform_indices = @transform_1, window_bounds = array<i64: 128, 128>}, {transform_indices = @transform_2, window_bounds = array<i64: 512, 128>}, {transform_indices = @transform_3, window_bounds = array<i64: 8, 128>}]} {
    %c0_i32 = arith.constant 0 : i32
    %0 = arith.cmpi eq, %arg2, %c0_i32 : i32
    %1 = arith.extui %0 : i1 to i32
    %c0_i32_0 = arith.constant 0 : i32
    %2 = arith.cmpi ne, %1, %c0_i32_0 : i32
    scf.if %2 {
      %cst_10 = arith.constant 0.000000e+00 : f32
      %12 = vector.broadcast %cst_10 : f32 to vector<512x128xf32>
      %c0_11 = arith.constant 0 : index
      %c0_12 = arith.constant 0 : index
      %13 = vector.load %arg7[%c0_11, %c0_12] : memref<512x128xf32, #tpu.memory_space<vmem>>, vector<512x128xf32>
      tpu.vector_store %arg7[%c0_11, %c0_12], %12 {strides = array<i32>} : memref<512x128xf32, #tpu.memory_space<vmem>>, vector<512x128xf32>,
    } else {
    }
    %c0 = arith.constant 0 : index
    %c0_1 = arith.constant 0 : index
    %3 = vector.load %arg7[%c0, %c0_1] : memref<512x128xf32, #tpu.memory_space<vmem>>, vector<512x128xf32>
    %c0_2 = arith.constant 0 : index
    %c0_3 = arith.constant 0 : index
    %4 = vector.load %arg3[%c0_2, %c0_3] : memref<512x128xbf16, #tpu.memory_space<vmem>>, vector<512x128xbf16>
    %c0_4 = arith.constant 0 : index
    %c0_5 = arith.constant 0 : index
    %5 = vector.load %arg4[%c0_4, %c0_5] : memref<128x128xbf16, #tpu.memory_space<vmem>>, vector<128x128xbf16>
    %cst = arith.constant dense<0.000000e+00> : vector<512x128xf32>
    %6 = tpu.matmul %4, %5, %cst {dimension_numbers = #tpu.dot_dimension_numbers<[1], [0], [0], [1], [0, 0, 1, 1], [], []>} : vector<512x128xbf16>, vector<128x128xbf16>, vector<512x128xf32> -> vector<512x128xf32>
    %7 = arith.addf %3, %6 : vector<512x128xf32>
    %c0_6 = arith.constant 0 : index
    %c0_7 = arith.constant 0 : index
    %8 = vector.load %arg7[%c0_6, %c0_7] : memref<512x128xf32, #tpu.memory_space<vmem>>, vector<512x128xf32>
    tpu.vector_store %arg7[%c0_6, %c0_7], %7 {strides = array<i32>} : memref<512x128xf32, #tpu.memory_space<vmem>>, vector<512x128xf32>,
    %c0_i32_8 = arith.constant 0 : i32
    %9 = arith.cmpi eq, %arg2, %c0_i32_8 : i32
    %10 = arith.extui %9 : i1 to i32
    %c0_i32_9 = arith.constant 0 : i32
    %11 = arith.cmpi ne, %10, %c0_i32_9 : i32
    scf.if %11 {
      %c0_10 = arith.constant 0 : index
      %c0_11 = arith.constant 0 : index
      %12 = vector.load %arg7[%c0_10, %c0_11] : memref<512x128xf32, #tpu.memory_space<vmem>>, vector<512x128xf32>
      %c0_12 = arith.constant 0 : index
      %c0_13 = arith.constant 0 : index
      %13 = vector.load %arg5[%c0_12, %c0_13] : memref<512x128xf32, #tpu.memory_space<vmem>>, vector<512x128xf32>
      tpu.vector_store %arg5[%c0_12, %c0_13], %12 {strides = array<i32>} : memref<512x128xf32, #tpu.memory_space<vmem>>, vector<512x128xf32>,
      %cst_14 = arith.constant dense<0.000000e+00> : vector<128xf32>
      %14 = vector.multi_reduction <add>, %12, %cst_14 [0] : vector<512x128xf32> to vector<128xf32>
      %15 = vector.shape_cast %14 : vector<128xf32> to vector<1x128xf32>
      %16 = arith.mulf %12, %12 : vector<512x128xf32>
      %cst_15 = arith.constant dense<0.000000e+00> : vector<128xf32>
      %17 = vector.multi_reduction <add>, %16, %cst_15 [0] : vector<512x128xf32> to vector<128xf32>
      %18 = vector.shape_cast %17 : vector<128xf32> to vector<1x128xf32>
      %19 = tpu.iota {dimensions = array<i32: 0>} : vector<8x128xi32>
      %c0_i32_16 = arith.constant 0 : i32
      %20 = vector.broadcast %c0_i32_16 : i32 to vector<8x128xi32>
      %21 = arith.cmpi eq, %19, %20 : vector<8x128xi32>
      %22 = vector.shape_cast %15 : vector<1x128xf32> to vector<1x128xf32>
      %23 = vector.broadcast %22 : vector<1x128xf32> to vector<8x128xf32>
      %c1_i32 = arith.constant 1 : i32
      %24 = vector.broadcast %c1_i32 : i32 to vector<8x128xi32>
      %25 = arith.cmpi eq, %19, %24 : vector<8x128xi32>
      %26 = vector.shape_cast %18 : vector<1x128xf32> to vector<1x128xf32>
      %27 = vector.broadcast %26 : vector<1x128xf32> to vector<8x128xf32>
      %cst_17 = arith.constant 0.000000e+00 : f32
      %28 = vector.broadcast %cst_17 : f32 to vector<8x128xf32>
      %29 = arith.select %25, %27, %28 : vector<8x128xi1>, vector<8x128xf32>
      %30 = arith.select %21, %23, %29 : vector<8x128xi1>, vector<8x128xf32>
      %c0_18 = arith.constant 0 : index
      %c0_19 = arith.constant 0 : index
      %31 = vector.load %arg6[%c0_18, %c0_19] : memref<8x128xf32, #tpu.memory_space<vmem>>, vector<8x128xf32>
      tpu.vector_store %arg6[%c0_18, %c0_19], %30 {strides = array<i32>} : memref<8x128xf32, #tpu.memory_space<vmem>>, vector<8x128xf32>,
    } else {
    }
    return
  }
  func.func @transform_0(%arg0: i32, %arg1: i32, %arg2: i32) -> (i32, i32) {
    %c0_i32 = arith.constant 0 : i32
    return %arg0, %arg2 : i32, i32
  }
  func.func @transform_1(%arg0: i32, %arg1: i32, %arg2: i32) -> (i32, i32) {
    %c0_i32 = arith.constant 0 : i32
    return %arg2, %arg1 : i32, i32
  }
  func.func @transform_2(%arg0: i32, %arg1: i32, %arg2: i32) -> (i32, i32) {
    %c0_i32 = arith.constant 0 : i32
    return %arg0, %arg1 : i32, i32
  }
  func.func @transform_3(%arg0: i32, %arg1: i32, %arg2: i32) -> (i32, i32) {
    %c0_i32 = arith.constant 0 : i32
    return %arg0, %arg1 : i32, i32
  }
}

module attributes {stable_mosaic.version = 11 : i64} {
  func.func @_affine_leaky_kernel(%arg0: i32, %arg1: i32, %arg2: memref<512x128xf32, #tpu.memory_space<vmem>>, %arg3: memref<1x128xf32, #tpu.memory_space<vmem>>, %arg4: memref<1x128xf32, #tpu.memory_space<vmem>>, %arg5: memref<512x128xbf16, #tpu.memory_space<vmem>>) attributes {dimension_semantics = [#tpu.dimension_semantics<parallel>, #tpu.dimension_semantics<parallel>], iteration_bounds = array<i64: 1, 1>, scalar_prefetch = 0 : i64, scratch_operands = 0 : i64, tpu.core_type = #tpu.core_type<tc>, window_params = [{transform_indices = @transform_0, window_bounds = array<i64: 512, 128>}, {transform_indices = @transform_1, window_bounds = array<i64: 1, 128>}, {transform_indices = @transform_2, window_bounds = array<i64: 1, 128>}, {transform_indices = @transform_3, window_bounds = array<i64: 512, 128>}]} {
    %c0 = arith.constant 0 : index
    %c0_0 = arith.constant 0 : index
    %0 = vector.load %arg2[%c0, %c0_0] : memref<512x128xf32, #tpu.memory_space<vmem>>, vector<512x128xf32>
    %c0_1 = arith.constant 0 : index
    %c0_2 = arith.constant 0 : index
    %1 = vector.load %arg3[%c0_1, %c0_2] : memref<1x128xf32, #tpu.memory_space<vmem>>, vector<1x128xf32>
    %2 = vector.broadcast %1 : vector<1x128xf32> to vector<512x128xf32>
    %3 = arith.mulf %0, %2 : vector<512x128xf32>
    %c0_3 = arith.constant 0 : index
    %c0_4 = arith.constant 0 : index
    %4 = vector.load %arg4[%c0_3, %c0_4] : memref<1x128xf32, #tpu.memory_space<vmem>>, vector<1x128xf32>
    %5 = vector.broadcast %4 : vector<1x128xf32> to vector<512x128xf32>
    %6 = arith.addf %3, %5 : vector<512x128xf32>
    %cst = arith.constant 0.000000e+00 : f32
    %7 = vector.broadcast %cst : f32 to vector<512x128xf32>
    %8 = arith.cmpf ogt, %6, %7 : vector<512x128xf32>
    %cst_5 = arith.constant 2.000000e-01 : f32
    %9 = vector.broadcast %cst_5 : f32 to vector<512x128xf32>
    %10 = arith.mulf %9, %6 : vector<512x128xf32>
    %11 = arith.select %8, %6, %10 : vector<512x128xi1>, vector<512x128xf32>
    %12 = arith.truncf %11 : vector<512x128xf32> to vector<512x128xbf16>
    %c0_6 = arith.constant 0 : index
    %c0_7 = arith.constant 0 : index
    %13 = vector.load %arg5[%c0_6, %c0_7] : memref<512x128xbf16, #tpu.memory_space<vmem>>, vector<512x128xbf16>
    tpu.vector_store %arg5[%c0_6, %c0_7], %12 {strides = array<i32>} : memref<512x128xbf16, #tpu.memory_space<vmem>>, vector<512x128xbf16>,
    return
  }
  func.func @transform_0(%arg0: i32, %arg1: i32) -> (i32, i32) {
    %c0_i32 = arith.constant 0 : i32
    return %arg0, %arg1 : i32, i32
  }
  func.func @transform_1(%arg0: i32, %arg1: i32) -> (i32, i32) {
    %c0_i32 = arith.constant 0 : i32
    %c0_i32_0 = arith.constant 0 : i32
    return %c0_i32, %arg1 : i32, i32
  }
  func.func @transform_2(%arg0: i32, %arg1: i32) -> (i32, i32) {
    %c0_i32 = arith.constant 0 : i32
    %c0_i32_0 = arith.constant 0 : i32
    return %c0_i32, %arg1 : i32, i32
  }
  func.func @transform_3(%arg0: i32, %arg1: i32) -> (i32, i32) {
    %c0_i32 = arith.constant 0 : i32
    return %arg0, %arg1 : i32, i32
  }
}

module attributes {stable_mosaic.version = 11 : i64} {
  func.func @_matmul_stats_kernel(%arg0: i32, %arg1: i32, %arg2: i32, %arg3: memref<128x256xbf16, #tpu.memory_space<vmem>>, %arg4: memref<256x128xbf16, #tpu.memory_space<vmem>>, %arg5: memref<128x128xf32, #tpu.memory_space<vmem>>, %arg6: memref<8x128xf32, #tpu.memory_space<vmem>>, %arg7: memref<128x128xf32, #tpu.memory_space<vmem>>) attributes {dimension_semantics = [#tpu.dimension_semantics<parallel>, #tpu.dimension_semantics<parallel>, #tpu.dimension_semantics<arbitrary>], iteration_bounds = array<i64: 1, 1, 1>, scalar_prefetch = 0 : i64, scratch_operands = 1 : i64, tpu.core_type = #tpu.core_type<tc>, window_params = [{transform_indices = @transform_0, window_bounds = array<i64: 128, 256>}, {transform_indices = @transform_1, window_bounds = array<i64: 256, 128>}, {transform_indices = @transform_2, window_bounds = array<i64: 128, 128>}, {transform_indices = @transform_3, window_bounds = array<i64: 8, 128>}]} {
    %c0_i32 = arith.constant 0 : i32
    %0 = arith.cmpi eq, %arg2, %c0_i32 : i32
    %1 = arith.extui %0 : i1 to i32
    %c0_i32_0 = arith.constant 0 : i32
    %2 = arith.cmpi ne, %1, %c0_i32_0 : i32
    scf.if %2 {
      %cst_10 = arith.constant 0.000000e+00 : f32
      %12 = vector.broadcast %cst_10 : f32 to vector<128x128xf32>
      %c0_11 = arith.constant 0 : index
      %c0_12 = arith.constant 0 : index
      %13 = vector.load %arg7[%c0_11, %c0_12] : memref<128x128xf32, #tpu.memory_space<vmem>>, vector<128x128xf32>
      tpu.vector_store %arg7[%c0_11, %c0_12], %12 {strides = array<i32>} : memref<128x128xf32, #tpu.memory_space<vmem>>, vector<128x128xf32>,
    } else {
    }
    %c0 = arith.constant 0 : index
    %c0_1 = arith.constant 0 : index
    %3 = vector.load %arg7[%c0, %c0_1] : memref<128x128xf32, #tpu.memory_space<vmem>>, vector<128x128xf32>
    %c0_2 = arith.constant 0 : index
    %c0_3 = arith.constant 0 : index
    %4 = vector.load %arg3[%c0_2, %c0_3] : memref<128x256xbf16, #tpu.memory_space<vmem>>, vector<128x256xbf16>
    %c0_4 = arith.constant 0 : index
    %c0_5 = arith.constant 0 : index
    %5 = vector.load %arg4[%c0_4, %c0_5] : memref<256x128xbf16, #tpu.memory_space<vmem>>, vector<256x128xbf16>
    %cst = arith.constant dense<0.000000e+00> : vector<128x128xf32>
    %6 = tpu.matmul %4, %5, %cst {dimension_numbers = #tpu.dot_dimension_numbers<[1], [0], [0], [1], [0, 0, 1, 1], [], []>} : vector<128x256xbf16>, vector<256x128xbf16>, vector<128x128xf32> -> vector<128x128xf32>
    %7 = arith.addf %3, %6 : vector<128x128xf32>
    %c0_6 = arith.constant 0 : index
    %c0_7 = arith.constant 0 : index
    %8 = vector.load %arg7[%c0_6, %c0_7] : memref<128x128xf32, #tpu.memory_space<vmem>>, vector<128x128xf32>
    tpu.vector_store %arg7[%c0_6, %c0_7], %7 {strides = array<i32>} : memref<128x128xf32, #tpu.memory_space<vmem>>, vector<128x128xf32>,
    %c0_i32_8 = arith.constant 0 : i32
    %9 = arith.cmpi eq, %arg2, %c0_i32_8 : i32
    %10 = arith.extui %9 : i1 to i32
    %c0_i32_9 = arith.constant 0 : i32
    %11 = arith.cmpi ne, %10, %c0_i32_9 : i32
    scf.if %11 {
      %c0_10 = arith.constant 0 : index
      %c0_11 = arith.constant 0 : index
      %12 = vector.load %arg7[%c0_10, %c0_11] : memref<128x128xf32, #tpu.memory_space<vmem>>, vector<128x128xf32>
      %c0_12 = arith.constant 0 : index
      %c0_13 = arith.constant 0 : index
      %13 = vector.load %arg5[%c0_12, %c0_13] : memref<128x128xf32, #tpu.memory_space<vmem>>, vector<128x128xf32>
      tpu.vector_store %arg5[%c0_12, %c0_13], %12 {strides = array<i32>} : memref<128x128xf32, #tpu.memory_space<vmem>>, vector<128x128xf32>,
      %cst_14 = arith.constant dense<0.000000e+00> : vector<128xf32>
      %14 = vector.multi_reduction <add>, %12, %cst_14 [0] : vector<128x128xf32> to vector<128xf32>
      %15 = vector.shape_cast %14 : vector<128xf32> to vector<1x128xf32>
      %16 = arith.mulf %12, %12 : vector<128x128xf32>
      %cst_15 = arith.constant dense<0.000000e+00> : vector<128xf32>
      %17 = vector.multi_reduction <add>, %16, %cst_15 [0] : vector<128x128xf32> to vector<128xf32>
      %18 = vector.shape_cast %17 : vector<128xf32> to vector<1x128xf32>
      %19 = tpu.iota {dimensions = array<i32: 0>} : vector<8x128xi32>
      %c0_i32_16 = arith.constant 0 : i32
      %20 = vector.broadcast %c0_i32_16 : i32 to vector<8x128xi32>
      %21 = arith.cmpi eq, %19, %20 : vector<8x128xi32>
      %22 = vector.shape_cast %15 : vector<1x128xf32> to vector<1x128xf32>
      %23 = vector.broadcast %22 : vector<1x128xf32> to vector<8x128xf32>
      %c1_i32 = arith.constant 1 : i32
      %24 = vector.broadcast %c1_i32 : i32 to vector<8x128xi32>
      %25 = arith.cmpi eq, %19, %24 : vector<8x128xi32>
      %26 = vector.shape_cast %18 : vector<1x128xf32> to vector<1x128xf32>
      %27 = vector.broadcast %26 : vector<1x128xf32> to vector<8x128xf32>
      %cst_17 = arith.constant 0.000000e+00 : f32
      %28 = vector.broadcast %cst_17 : f32 to vector<8x128xf32>
      %29 = arith.select %25, %27, %28 : vector<8x128xi1>, vector<8x128xf32>
      %30 = arith.select %21, %23, %29 : vector<8x128xi1>, vector<8x128xf32>
      %c0_18 = arith.constant 0 : index
      %c0_19 = arith.constant 0 : index
      %31 = vector.load %arg6[%c0_18, %c0_19] : memref<8x128xf32, #tpu.memory_space<vmem>>, vector<8x128xf32>
      tpu.vector_store %arg6[%c0_18, %c0_19], %30 {strides = array<i32>} : memref<8x128xf32, #tpu.memory_space<vmem>>, vector<8x128xf32>,
    } else {
    }
    return
  }
  func.func @transform_0(%arg0: i32, %arg1: i32, %arg2: i32) -> (i32, i32) {
    %c0_i32 = arith.constant 0 : i32
    return %arg0, %arg2 : i32, i32
  }
  func.func @transform_1(%arg0: i32, %arg1: i32, %arg2: i32) -> (i32, i32) {
    %c0_i32 = arith.constant 0 : i32
    return %arg2, %arg1 : i32, i32
  }
  func.func @transform_2(%arg0: i32, %arg1: i32, %arg2: i32) -> (i32, i32) {
    %c0_i32 = arith.constant 0 : i32
    return %arg0, %arg1 : i32, i32
  }
  func.func @transform_3(%arg0: i32, %arg1: i32, %arg2: i32) -> (i32, i32) {
    %c0_i32 = arith.constant 0 : i32
    return %arg0, %arg1 : i32, i32
  }
}

module attributes {stable_mosaic.version = 11 : i64} {
  func.func @_affine_leaky_kernel(%arg0: i32, %arg1: i32, %arg2: memref<128x128xf32, #tpu.memory_space<vmem>>, %arg3: memref<1x128xf32, #tpu.memory_space<vmem>>, %arg4: memref<1x128xf32, #tpu.memory_space<vmem>>, %arg5: memref<128x128xbf16, #tpu.memory_space<vmem>>) attributes {dimension_semantics = [#tpu.dimension_semantics<parallel>, #tpu.dimension_semantics<parallel>], iteration_bounds = array<i64: 1, 1>, scalar_prefetch = 0 : i64, scratch_operands = 0 : i64, tpu.core_type = #tpu.core_type<tc>, window_params = [{transform_indices = @transform_0, window_bounds = array<i64: 128, 128>}, {transform_indices = @transform_1, window_bounds = array<i64: 1, 128>}, {transform_indices = @transform_2, window_bounds = array<i64: 1, 128>}, {transform_indices = @transform_3, window_bounds = array<i64: 128, 128>}]} {
    %c0 = arith.constant 0 : index
    %c0_0 = arith.constant 0 : index
    %0 = vector.load %arg2[%c0, %c0_0] : memref<128x128xf32, #tpu.memory_space<vmem>>, vector<128x128xf32>
    %c0_1 = arith.constant 0 : index
    %c0_2 = arith.constant 0 : index
    %1 = vector.load %arg3[%c0_1, %c0_2] : memref<1x128xf32, #tpu.memory_space<vmem>>, vector<1x128xf32>
    %2 = vector.broadcast %1 : vector<1x128xf32> to vector<128x128xf32>
    %3 = arith.mulf %0, %2 : vector<128x128xf32>
    %c0_3 = arith.constant 0 : index
    %c0_4 = arith.constant 0 : index
    %4 = vector.load %arg4[%c0_3, %c0_4] : memref<1x128xf32, #tpu.memory_space<vmem>>, vector<1x128xf32>
    %5 = vector.broadcast %4 : vector<1x128xf32> to vector<128x128xf32>
    %6 = arith.addf %3, %5 : vector<128x128xf32>
    %cst = arith.constant 0.000000e+00 : f32
    %7 = vector.broadcast %cst : f32 to vector<128x128xf32>
    %8 = arith.cmpf ogt, %6, %7 : vector<128x128xf32>
    %cst_5 = arith.constant 2.000000e-01 : f32
    %9 = vector.broadcast %cst_5 : f32 to vector<128x128xf32>
    %10 = arith.mulf %9, %6 : vector<128x128xf32>
    %11 = arith.select %8, %6, %10 : vector<128x128xi1>, vector<128x128xf32>
    %12 = arith.truncf %11 : vector<128x128xf32> to vector<128x128xbf16>
    %c0_6 = arith.constant 0 : index
    %c0_7 = arith.constant 0 : index
    %13 = vector.load %arg5[%c0_6, %c0_7] : memref<128x128xbf16, #tpu.memory_space<vmem>>, vector<128x128xbf16>
    tpu.vector_store %arg5[%c0_6, %c0_7], %12 {strides = array<i32>} : memref<128x128xbf16, #tpu.memory_space<vmem>>, vector<128x128xbf16>,
    return
  }
  func.func @transform_0(%arg0: i32, %arg1: i32) -> (i32, i32) {
    %c0_i32 = arith.constant 0 : i32
    return %arg0, %arg1 : i32, i32
  }
  func.func @transform_1(%arg0: i32, %arg1: i32) -> (i32, i32) {
    %c0_i32 = arith.constant 0 : i32
    %c0_i32_0 = arith.constant 0 : i32
    return %c0_i32, %arg1 : i32, i32
  }
  func.func @transform_2(%arg0: i32, %arg1: i32) -> (i32, i32) {
    %c0_i32 = arith.constant 0 : i32
    %c0_i32_0 = arith.constant 0 : i32
    return %c0_i32, %arg1 : i32, i32
  }
  func.func @transform_3(%arg0: i32, %arg1: i32) -> (i32, i32) {
    %c0_i32 = arith.constant 0 : i32
    return %arg0, %arg1 : i32, i32
  }
}

module attributes {stable_mosaic.version = 11 : i64} {
  func.func @_matmul_stats_kernel(%arg0: i32, %arg1: i32, %arg2: i32, %arg3: memref<32x512xbf16, #tpu.memory_space<vmem>>, %arg4: memref<512x128xbf16, #tpu.memory_space<vmem>>, %arg5: memref<32x128xf32, #tpu.memory_space<vmem>>, %arg6: memref<8x128xf32, #tpu.memory_space<vmem>>, %arg7: memref<32x128xf32, #tpu.memory_space<vmem>>) attributes {dimension_semantics = [#tpu.dimension_semantics<parallel>, #tpu.dimension_semantics<parallel>, #tpu.dimension_semantics<arbitrary>], iteration_bounds = array<i64: 1, 1, 1>, scalar_prefetch = 0 : i64, scratch_operands = 1 : i64, tpu.core_type = #tpu.core_type<tc>, window_params = [{transform_indices = @transform_0, window_bounds = array<i64: 32, 512>}, {transform_indices = @transform_1, window_bounds = array<i64: 512, 128>}, {transform_indices = @transform_2, window_bounds = array<i64: 32, 128>}, {transform_indices = @transform_3, window_bounds = array<i64: 8, 128>}]} {
    %c0_i32 = arith.constant 0 : i32
    %0 = arith.cmpi eq, %arg2, %c0_i32 : i32
    %1 = arith.extui %0 : i1 to i32
    %c0_i32_0 = arith.constant 0 : i32
    %2 = arith.cmpi ne, %1, %c0_i32_0 : i32
    scf.if %2 {
      %cst_10 = arith.constant 0.000000e+00 : f32
      %12 = vector.broadcast %cst_10 : f32 to vector<32x128xf32>
      %c0_11 = arith.constant 0 : index
      %c0_12 = arith.constant 0 : index
      %13 = vector.load %arg7[%c0_11, %c0_12] : memref<32x128xf32, #tpu.memory_space<vmem>>, vector<32x128xf32>
      tpu.vector_store %arg7[%c0_11, %c0_12], %12 {strides = array<i32>} : memref<32x128xf32, #tpu.memory_space<vmem>>, vector<32x128xf32>,
    } else {
    }
    %c0 = arith.constant 0 : index
    %c0_1 = arith.constant 0 : index
    %3 = vector.load %arg7[%c0, %c0_1] : memref<32x128xf32, #tpu.memory_space<vmem>>, vector<32x128xf32>
    %c0_2 = arith.constant 0 : index
    %c0_3 = arith.constant 0 : index
    %4 = vector.load %arg3[%c0_2, %c0_3] : memref<32x512xbf16, #tpu.memory_space<vmem>>, vector<32x512xbf16>
    %c0_4 = arith.constant 0 : index
    %c0_5 = arith.constant 0 : index
    %5 = vector.load %arg4[%c0_4, %c0_5] : memref<512x128xbf16, #tpu.memory_space<vmem>>, vector<512x128xbf16>
    %cst = arith.constant dense<0.000000e+00> : vector<32x128xf32>
    %6 = tpu.matmul %4, %5, %cst {dimension_numbers = #tpu.dot_dimension_numbers<[1], [0], [0], [1], [0, 0, 1, 1], [], []>} : vector<32x512xbf16>, vector<512x128xbf16>, vector<32x128xf32> -> vector<32x128xf32>
    %7 = arith.addf %3, %6 : vector<32x128xf32>
    %c0_6 = arith.constant 0 : index
    %c0_7 = arith.constant 0 : index
    %8 = vector.load %arg7[%c0_6, %c0_7] : memref<32x128xf32, #tpu.memory_space<vmem>>, vector<32x128xf32>
    tpu.vector_store %arg7[%c0_6, %c0_7], %7 {strides = array<i32>} : memref<32x128xf32, #tpu.memory_space<vmem>>, vector<32x128xf32>,
    %c0_i32_8 = arith.constant 0 : i32
    %9 = arith.cmpi eq, %arg2, %c0_i32_8 : i32
    %10 = arith.extui %9 : i1 to i32
    %c0_i32_9 = arith.constant 0 : i32
    %11 = arith.cmpi ne, %10, %c0_i32_9 : i32
    scf.if %11 {
      %c0_10 = arith.constant 0 : index
      %c0_11 = arith.constant 0 : index
      %12 = vector.load %arg7[%c0_10, %c0_11] : memref<32x128xf32, #tpu.memory_space<vmem>>, vector<32x128xf32>
      %c0_12 = arith.constant 0 : index
      %c0_13 = arith.constant 0 : index
      %13 = vector.load %arg5[%c0_12, %c0_13] : memref<32x128xf32, #tpu.memory_space<vmem>>, vector<32x128xf32>
      tpu.vector_store %arg5[%c0_12, %c0_13], %12 {strides = array<i32>} : memref<32x128xf32, #tpu.memory_space<vmem>>, vector<32x128xf32>,
      %cst_14 = arith.constant dense<0.000000e+00> : vector<128xf32>
      %14 = vector.multi_reduction <add>, %12, %cst_14 [0] : vector<32x128xf32> to vector<128xf32>
      %15 = vector.shape_cast %14 : vector<128xf32> to vector<1x128xf32>
      %16 = arith.mulf %12, %12 : vector<32x128xf32>
      %cst_15 = arith.constant dense<0.000000e+00> : vector<128xf32>
      %17 = vector.multi_reduction <add>, %16, %cst_15 [0] : vector<32x128xf32> to vector<128xf32>
      %18 = vector.shape_cast %17 : vector<128xf32> to vector<1x128xf32>
      %19 = tpu.iota {dimensions = array<i32: 0>} : vector<8x128xi32>
      %c0_i32_16 = arith.constant 0 : i32
      %20 = vector.broadcast %c0_i32_16 : i32 to vector<8x128xi32>
      %21 = arith.cmpi eq, %19, %20 : vector<8x128xi32>
      %22 = vector.shape_cast %15 : vector<1x128xf32> to vector<1x128xf32>
      %23 = vector.broadcast %22 : vector<1x128xf32> to vector<8x128xf32>
      %c1_i32 = arith.constant 1 : i32
      %24 = vector.broadcast %c1_i32 : i32 to vector<8x128xi32>
      %25 = arith.cmpi eq, %19, %24 : vector<8x128xi32>
      %26 = vector.shape_cast %18 : vector<1x128xf32> to vector<1x128xf32>
      %27 = vector.broadcast %26 : vector<1x128xf32> to vector<8x128xf32>
      %cst_17 = arith.constant 0.000000e+00 : f32
      %28 = vector.broadcast %cst_17 : f32 to vector<8x128xf32>
      %29 = arith.select %25, %27, %28 : vector<8x128xi1>, vector<8x128xf32>
      %30 = arith.select %21, %23, %29 : vector<8x128xi1>, vector<8x128xf32>
      %c0_18 = arith.constant 0 : index
      %c0_19 = arith.constant 0 : index
      %31 = vector.load %arg6[%c0_18, %c0_19] : memref<8x128xf32, #tpu.memory_space<vmem>>, vector<8x128xf32>
      tpu.vector_store %arg6[%c0_18, %c0_19], %30 {strides = array<i32>} : memref<8x128xf32, #tpu.memory_space<vmem>>, vector<8x128xf32>,
    } else {
    }
    return
  }
  func.func @transform_0(%arg0: i32, %arg1: i32, %arg2: i32) -> (i32, i32) {
    %c0_i32 = arith.constant 0 : i32
    return %arg0, %arg2 : i32, i32
  }
  func.func @transform_1(%arg0: i32, %arg1: i32, %arg2: i32) -> (i32, i32) {
    %c0_i32 = arith.constant 0 : i32
    return %arg2, %arg1 : i32, i32
  }
  func.func @transform_2(%arg0: i32, %arg1: i32, %arg2: i32) -> (i32, i32) {
    %c0_i32 = arith.constant 0 : i32
    return %arg0, %arg1 : i32, i32
  }
  func.func @transform_3(%arg0: i32, %arg1: i32, %arg2: i32) -> (i32, i32) {
    %c0_i32 = arith.constant 0 : i32
    return %arg0, %arg1 : i32, i32
  }
}

module attributes {stable_mosaic.version = 11 : i64} {
  func.func @_affine_leaky_kernel(%arg0: i32, %arg1: i32, %arg2: memref<32x128xf32, #tpu.memory_space<vmem>>, %arg3: memref<1x128xf32, #tpu.memory_space<vmem>>, %arg4: memref<1x128xf32, #tpu.memory_space<vmem>>, %arg5: memref<32x128xbf16, #tpu.memory_space<vmem>>) attributes {dimension_semantics = [#tpu.dimension_semantics<parallel>, #tpu.dimension_semantics<parallel>], iteration_bounds = array<i64: 1, 1>, scalar_prefetch = 0 : i64, scratch_operands = 0 : i64, tpu.core_type = #tpu.core_type<tc>, window_params = [{transform_indices = @transform_0, window_bounds = array<i64: 32, 128>}, {transform_indices = @transform_1, window_bounds = array<i64: 1, 128>}, {transform_indices = @transform_2, window_bounds = array<i64: 1, 128>}, {transform_indices = @transform_3, window_bounds = array<i64: 32, 128>}]} {
    %c0 = arith.constant 0 : index
    %c0_0 = arith.constant 0 : index
    %0 = vector.load %arg2[%c0, %c0_0] : memref<32x128xf32, #tpu.memory_space<vmem>>, vector<32x128xf32>
    %c0_1 = arith.constant 0 : index
    %c0_2 = arith.constant 0 : index
    %1 = vector.load %arg3[%c0_1, %c0_2] : memref<1x128xf32, #tpu.memory_space<vmem>>, vector<1x128xf32>
    %2 = vector.broadcast %1 : vector<1x128xf32> to vector<32x128xf32>
    %3 = arith.mulf %0, %2 : vector<32x128xf32>
    %c0_3 = arith.constant 0 : index
    %c0_4 = arith.constant 0 : index
    %4 = vector.load %arg4[%c0_3, %c0_4] : memref<1x128xf32, #tpu.memory_space<vmem>>, vector<1x128xf32>
    %5 = vector.broadcast %4 : vector<1x128xf32> to vector<32x128xf32>
    %6 = arith.addf %3, %5 : vector<32x128xf32>
    %cst = arith.constant 0.000000e+00 : f32
    %7 = vector.broadcast %cst : f32 to vector<32x128xf32>
    %8 = arith.cmpf ogt, %6, %7 : vector<32x128xf32>
    %cst_5 = arith.constant 2.000000e-01 : f32
    %9 = vector.broadcast %cst_5 : f32 to vector<32x128xf32>
    %10 = arith.mulf %9, %6 : vector<32x128xf32>
    %11 = arith.select %8, %6, %10 : vector<32x128xi1>, vector<32x128xf32>
    %12 = arith.truncf %11 : vector<32x128xf32> to vector<32x128xbf16>
    %c0_6 = arith.constant 0 : index
    %c0_7 = arith.constant 0 : index
    %13 = vector.load %arg5[%c0_6, %c0_7] : memref<32x128xbf16, #tpu.memory_space<vmem>>, vector<32x128xbf16>
    tpu.vector_store %arg5[%c0_6, %c0_7], %12 {strides = array<i32>} : memref<32x128xbf16, #tpu.memory_space<vmem>>, vector<32x128xbf16>,
    return
  }
  func.func @transform_0(%arg0: i32, %arg1: i32) -> (i32, i32) {
    %c0_i32 = arith.constant 0 : i32
    return %arg0, %arg1 : i32, i32
  }
  func.func @transform_1(%arg0: i32, %arg1: i32) -> (i32, i32) {
    %c0_i32 = arith.constant 0 : i32
    %c0_i32_0 = arith.constant 0 : i32
    return %c0_i32, %arg1 : i32, i32
  }
  func.func @transform_2(%arg0: i32, %arg1: i32) -> (i32, i32) {
    %c0_i32 = arith.constant 0 : i32
    %c0_i32_0 = arith.constant 0 : i32
    return %c0_i32, %arg1 : i32, i32
  }
  func.func @transform_3(%arg0: i32, %arg1: i32) -> (i32, i32) {
    %c0_i32 = arith.constant 0 : i32
    return %arg0, %arg1 : i32, i32
  }
}

module attributes {stable_mosaic.version = 11 : i64} {
  func.func @_matmul_act_kernel(%arg0: i32, %arg1: i32, %arg2: i32, %arg3: memref<8x512xbf16, #tpu.memory_space<vmem>>, %arg4: memref<512x128xbf16, #tpu.memory_space<vmem>>, %arg5: memref<8x128xf32, #tpu.memory_space<vmem>>, %arg6: memref<8x128xf32, #tpu.memory_space<vmem>>) attributes {dimension_semantics = [#tpu.dimension_semantics<parallel>, #tpu.dimension_semantics<parallel>, #tpu.dimension_semantics<arbitrary>], iteration_bounds = array<i64: 1, 1, 2>, scalar_prefetch = 0 : i64, scratch_operands = 1 : i64, tpu.core_type = #tpu.core_type<tc>, window_params = [{transform_indices = @transform_0, window_bounds = array<i64: 8, 512>}, {transform_indices = @transform_1, window_bounds = array<i64: 512, 128>}, {transform_indices = @transform_2, window_bounds = array<i64: 8, 128>}]} {
    %c0_i32 = arith.constant 0 : i32
    %0 = arith.cmpi eq, %arg2, %c0_i32 : i32
    %1 = arith.extui %0 : i1 to i32
    %c0_i32_0 = arith.constant 0 : i32
    %2 = arith.cmpi ne, %1, %c0_i32_0 : i32
    scf.if %2 {
      %cst_9 = arith.constant 0.000000e+00 : f32
      %12 = vector.broadcast %cst_9 : f32 to vector<8x128xf32>
      %c0_10 = arith.constant 0 : index
      %c0_11 = arith.constant 0 : index
      %13 = vector.load %arg6[%c0_10, %c0_11] : memref<8x128xf32, #tpu.memory_space<vmem>>, vector<8x128xf32>
      tpu.vector_store %arg6[%c0_10, %c0_11], %12 {strides = array<i32>} : memref<8x128xf32, #tpu.memory_space<vmem>>, vector<8x128xf32>,
    } else {
    }
    %c0 = arith.constant 0 : index
    %c0_1 = arith.constant 0 : index
    %3 = vector.load %arg6[%c0, %c0_1] : memref<8x128xf32, #tpu.memory_space<vmem>>, vector<8x128xf32>
    %c0_2 = arith.constant 0 : index
    %c0_3 = arith.constant 0 : index
    %4 = vector.load %arg3[%c0_2, %c0_3] : memref<8x512xbf16, #tpu.memory_space<vmem>>, vector<8x512xbf16>
    %c0_4 = arith.constant 0 : index
    %c0_5 = arith.constant 0 : index
    %5 = vector.load %arg4[%c0_4, %c0_5] : memref<512x128xbf16, #tpu.memory_space<vmem>>, vector<512x128xbf16>
    %cst = arith.constant dense<0.000000e+00> : vector<8x128xf32>
    %6 = tpu.matmul %4, %5, %cst {dimension_numbers = #tpu.dot_dimension_numbers<[1], [0], [0], [1], [0, 0, 1, 1], [], []>} : vector<8x512xbf16>, vector<512x128xbf16>, vector<8x128xf32> -> vector<8x128xf32>
    %7 = arith.addf %3, %6 : vector<8x128xf32>
    %c0_6 = arith.constant 0 : index
    %c0_7 = arith.constant 0 : index
    %8 = vector.load %arg6[%c0_6, %c0_7] : memref<8x128xf32, #tpu.memory_space<vmem>>, vector<8x128xf32>
    tpu.vector_store %arg6[%c0_6, %c0_7], %7 {strides = array<i32>} : memref<8x128xf32, #tpu.memory_space<vmem>>, vector<8x128xf32>,
    %c1_i32 = arith.constant 1 : i32
    %9 = arith.cmpi eq, %arg2, %c1_i32 : i32
    %10 = arith.extui %9 : i1 to i32
    %c0_i32_8 = arith.constant 0 : i32
    %11 = arith.cmpi ne, %10, %c0_i32_8 : i32
    scf.if %11 {
      %c0_9 = arith.constant 0 : index
      %c0_10 = arith.constant 0 : index
      %12 = vector.load %arg6[%c0_9, %c0_10] : memref<8x128xf32, #tpu.memory_space<vmem>>, vector<8x128xf32>
      %cst_11 = arith.constant 0.000000e+00 : f32
      %13 = vector.broadcast %cst_11 : f32 to vector<8x128xf32>
      %14 = arith.subf %13, %12 : vector<8x128xf32>
      %15 = math.exp %14 : vector<8x128xf32>
      %cst_12 = arith.constant 1.000000e+00 : f32
      %16 = vector.broadcast %cst_12 : f32 to vector<8x128xf32>
      %17 = arith.addf %16, %15 : vector<8x128xf32>
      %18 = tpu.reciprocal %17 {approx = true} : vector<8x128xf32> -> vector<8x128xf32>
      %c0_13 = arith.constant 0 : index
      %c0_14 = arith.constant 0 : index
      %19 = vector.load %arg5[%c0_13, %c0_14] : memref<8x128xf32, #tpu.memory_space<vmem>>, vector<8x128xf32>
      tpu.vector_store %arg5[%c0_13, %c0_14], %18 {strides = array<i32>} : memref<8x128xf32, #tpu.memory_space<vmem>>, vector<8x128xf32>,
    } else {
    }
    return
  }
  func.func @transform_0(%arg0: i32, %arg1: i32, %arg2: i32) -> (i32, i32) {
    %c0_i32 = arith.constant 0 : i32
    return %arg0, %arg2 : i32, i32
  }
  func.func @transform_1(%arg0: i32, %arg1: i32, %arg2: i32) -> (i32, i32) {
    %c0_i32 = arith.constant 0 : i32
    return %arg2, %arg1 : i32, i32
  }
  func.func @transform_2(%arg0: i32, %arg1: i32, %arg2: i32) -> (i32, i32) {
    %c0_i32 = arith.constant 0 : i32
    return %arg0, %arg1 : i32, i32
  }
}

</mosaic_0001>

<bundles_post_ra>
// kernel: discriminator_forward.8
= control target key start
LH: loop header
LB: loop body
LE: loop exit
PB: predicated region body
PF: predicated region fallthrough
CT: control target
= control target key end

     0   :  { %s2376_s9 = smov 0   ;;  %s2378_s10 = smov 0   ;;  %s2517_s0 = inlined_call_operand.vmem [shape: bf16[2048,128], index: 0, kind: input, shape index: {}]   ;;  %s2518_s1 = inlined_call_operand.vmem [shape: bf16[128,128], index: 1, kind: input, shape index: {}]   ;;  %s2519_s2 = inlined_call_operand.vmem [shape: bf16[2048,128], index: 2, kind: output, shape index: {}]  }
   0x1   :  { %s2380_s11 = smov 0  }
   0x2 LB: > { %s31_s12 = sadd.s32 1, %s2355_s10  ;;  %p1771_p0 = scmp.ge.s32.totalorder %s2359_s11, 1  ;;  %s2359_s11 = sphi %s2380_s11, %s12_s11   ;;  %s2355_s10 = sphi %s2378_s10, %s2521_s10   ;;  %s2351_s9 = sphi %s2376_s9, %s2520_s9  }
   0x3   : > { %p33_p1 = scmp.ge.s32.totalorder %s31_s12, 4  ;;  %p155_p2 = scmp.lt.s32.totalorder %s2359_s11, 5 }
   0x5   : > { %s2523_s12 = smov (%p33_p1, %s31_s12), 0  ;;  %p156_p3 = pnand %p1771_p0, %p155_p2 }
   0x6   : > { %s1772_s15 = sshll.u32 (!%p156_p3), %s2351_s9, 6 }
   0x7   : > { %159 = sbr.rel (%p156_p3) target bundleno = 307 (0x133), region = 28  ;;  %p192_p4 = scmp.lt.s32.totalorder (!%p156_p3), %s1772_s15, 255 }
   0xc   : > { %v2297_v0 = vld [vmem:[%s2518_s1 + $0x38] sm:$0xff]   ;;  %v2298_v1 = vld [vmem:[%s2518_s1 + $0x30] sm:$0xff]   ;;  %s2525_s15 = smov (!%p192_p4, %s1772_s15), 255  ;;  %v2299_v2 = vld [vmem:[%s2518_s1 + $0x28] sm:$0xff]  }
   0xd   : > { %2177 = vmatprep.subr.bf16.mxu0 %v2297_v0  ;;  %2257 = vmatprep.subr.bf16.mxu1 %v2297_v0  ;;  %s1773_s20 = sshll.u32 %s2525_s15, 2  ;;  %v2300_v3 = vld [vmem:[%s2518_s1 + $0x20] sm:$0xff]   ;;  %v2301_v6 = vld [vmem:[%s2518_s1 + $0x18] sm:$0xff]   ;;  %v2302_v7 = vld [vmem:[%s2518_s1 + $0x10] sm:$0xff]  }
   0xe   : > { %2178 = vmatpush3.bf16.msra.mxu0 %v2297_v0  ;;  %2265 = vmatpush3.bf16.msra.mxu1 %v2297_v0  ;;  %s2411_s23 = scalar_lea.vmem %s2517_s0, %s1773_s20  ;;  %v2303_v8 = vld [vmem:[%s2518_s1 + $0x8] sm:$0xff]   ;;  %v2304_v9 = vld [vmem:[%s2518_s1] sm:$0xff]   ;;  %s2465_s8 = scalar_lea.vmem %s2519_s2, %s1773_s20 }
   0xf   : > { %2179 = vmatprep.subr.bf16.mxu0 %v2298_v1  ;;  %2258 = vmatprep.subr.bf16.mxu1 %v2298_v1  ;;  %v2305_v4 = vld [vmem:[%s2411_s23] sm:$0xff]   ;;  %v2307_v10 = vld [vmem:[%s2411_s23 + $0x8] sm:$0xff]   ;;  %v2309_v12 = vld [vmem:[%s2411_s23 + $0x10] sm:$0xff]  }
  0x10   : > { %v2306_v5 = vld [vmem:[%s2411_s23 + $0x80] sm:$0xff]   ;;  %2193 = vmatprep.mubr.bf16.mxu0 %v2305_v4  ;;  %v2308_v11 = vld [vmem:[%s2411_s23 + $0x88] sm:$0xff]   ;;  %v2310_v13 = vld [vmem:[%s2411_s23 + $0x90] sm:$0xff]  }
  0x11   : > { %2225 = vmatprep.mubr.bf16.mxu1 %v2306_v5  ;;  %v2311_v14 = vld [vmem:[%s2411_s23 + $0x18] sm:$0xff]   ;;  %v2313_v16 = vld [vmem:[%s2411_s23 + $0x20] sm:$0xff]   ;;  %v2315_v18 = vld [vmem:[%s2411_s23 + $0x28] sm:$0xff]  }
  0x12   : > { %2180 = vmatpush3.bf16.msra.mxu0 %v2298_v1  ;;  %2266 = vmatpush3.bf16.msra.mxu1 %v2298_v1  ;;  %v2312_v15 = vld [vmem:[%s2411_s23 + $0x98] sm:$0xff]   ;;  %v2314_v17 = vld [vmem:[%s2411_s23 + $0xa0] sm:$0xff]   ;;  %v2316_v19 = vld [vmem:[%s2411_s23 + $0xa8] sm:$0xff]  }
  0x13   : > { %2181 = vmatprep.subr.bf16.mxu0 %v2299_v2  ;;  %2259 = vmatprep.subr.bf16.mxu1 %v2299_v2  ;;  %v2317_v20 = vld [vmem:[%s2411_s23 + $0x30] sm:$0xff]   ;;  %v2319_v22 = vld [vmem:[%s2411_s23 + $0x38] sm:$0xff]   ;;  %v2321_v24 = vld [vmem:[%s2411_s23 + $0x40] sm:$0xff]  }
  0x14   : > { %v2318_v21 = vld [vmem:[%s2411_s23 + $0xb0] sm:$0xff]   ;;  %v2320_v23 = vld [vmem:[%s2411_s23 + $0xb8] sm:$0xff]   ;;  %v2322_v25 = vld [vmem:[%s2411_s23 + $0xc0] sm:$0xff]  }
  0x15   : > { %v2323_v26 = vld [vmem:[%s2411_s23 + $0x48] sm:$0xff]   ;;  %v2325_v28 = vld [vmem:[%s2411_s23 + $0x50] sm:$0xff]   ;;  %v2327_v30 = vld [vmem:[%s2411_s23 + $0x58] sm:$0xff]  }
  0x16   : > { %2182 = vmatpush3.bf16.msra.mxu0 %v2299_v2  ;;  %2267 = vmatpush3.bf16.msra.mxu1 %v2299_v2  ;;  %v2324_v27 = vld [vmem:[%s2411_s23 + $0xc8] sm:$0xff]   ;;  %v2326_v29 = vld [vmem:[%s2411_s23 + $0xd0] sm:$0xff]   ;;  %v2328_v31 = vld [vmem:[%s2411_s23 + $0xd8] sm:$0xff]  }
  0x17   : > { %2183 = vmatprep.subr.bf16.mxu0 %v2300_v3  ;;  %2260 = vmatprep.subr.bf16.mxu1 %v2300_v3  ;;  %v2329_v32 = vld [vmem:[%s2411_s23 + $0x60] sm:$0xff]   ;;  %v2331_v34 = vld [vmem:[%s2411_s23 + $0x68] sm:$0xff]   ;;  %v2333_v36 = vld [vmem:[%s2411_s23 + $0x70] sm:$0xff]  }
  0x18   : > { %v2330_v33 = vld [vmem:[%s2411_s23 + $0xe0] sm:$0xff]   ;;  %v2332_v35 = vld [vmem:[%s2411_s23 + $0xe8] sm:$0xff]   ;;  %v2334_v37 = vld [vmem:[%s2411_s23 + $0xf0] sm:$0xff]  }
  0x19   : > { %v2335_v38 = vld [vmem:[%s2411_s23 + $0x78] sm:$0xff]  }
  0x1a   : > { %2184 = vmatpush3.bf16.msra.mxu0 %v2300_v3  ;;  %2268 = vmatpush3.bf16.msra.mxu1 %v2300_v3  ;;  %v2336_v39 = vld [vmem:[%s2411_s23 + $0xf8] sm:$0xff]  }
  0x1b   : > { %2185 = vmatprep.subr.bf16.mxu0 %v2301_v6  ;;  %2261 = vmatprep.subr.bf16.mxu1 %v2301_v6 }
  0x1e   : > { %2186 = vmatpush3.bf16.msra.mxu0 %v2301_v6  ;;  %2269 = vmatpush3.bf16.msra.mxu1 %v2301_v6 }
  0x1f   : > { %2187 = vmatprep.subr.bf16.mxu0 %v2302_v7  ;;  %2262 = vmatprep.subr.bf16.mxu1 %v2302_v7 }
  0x22   : > { %2188 = vmatpush3.bf16.msra.mxu0 %v2302_v7  ;;  %2270 = vmatpush3.bf16.msra.mxu1 %v2302_v7 }
  0x23   : > { %2189 = vmatprep.subr.bf16.mxu0 %v2303_v8  ;;  %2263 = vmatprep.subr.bf16.mxu1 %v2303_v8 }
  0x26   : > { %2190 = vmatpush3.bf16.msra.mxu0 %v2303_v8  ;;  %2271 = vmatpush3.bf16.msra.mxu1 %v2303_v8 }
  0x27   : > { %2191 = vmatprep.subr.bf16.mxu0 %v2304_v9  ;;  %2264 = vmatprep.subr.bf16.mxu1 %v2304_v9 }
  0x2a   : > { %2192 = vmatpush3.bf16.msra.mxu0 %v2304_v9  ;;  %2272 = vmatpush3.bf16.msra.mxu1 %v2304_v9 }
  0x2d   : > { %2194 = vmatmul.mubr.bf16.vlgmr.msra.gmra.mxu0 %v2307_v10  ;;  %2226 = vmatmul.mubr.bf16.vlgmr.msra.gmra.mxu1 %v2308_v11 }
  0x2e   : > { %2197 = vmatprep.mubr.bf16.mxu0 %v2309_v12  ;;  %2229 = vmatprep.mubr.bf16.mxu1 %v2310_v13 }
  0x35   : > { %2198 = vmatmul.mubr.bf16.gmra.mxu0 %v2311_v14  ;;  %2230 = vmatmul.mubr.bf16.gmra.mxu1 %v2312_v15 }
  0x36   : > { %2201 = vmatprep.mubr.bf16.mxu0 %v2313_v16  ;;  %2233 = vmatprep.mubr.bf16.mxu1 %v2314_v17 }
  0x3d   : > { %2202 = vmatmul.mubr.bf16.gmra.mxu0 %v2315_v18  ;;  %2234 = vmatmul.mubr.bf16.gmra.mxu1 %v2316_v19 }
  0x3e   : > { %2205 = vmatprep.mubr.bf16.mxu0 %v2317_v20  ;;  %2237 = vmatprep.mubr.bf16.mxu1 %v2318_v21 }
  0x45   : > { %2206 = vmatmul.mubr.bf16.gmra.mxu0 %v2319_v22  ;;  %2238 = vmatmul.mubr.bf16.gmra.mxu1 %v2320_v23 }
  0x46   : > { %2209 = vmatprep.mubr.bf16.mxu0 %v2321_v24  ;;  %2241 = vmatprep.mubr.bf16.mxu1 %v2322_v25 }
  0x4d   : > { %2210 = vmatmul.mubr.bf16.gmra.mxu0 %v2323_v26  ;;  %2242 = vmatmul.mubr.bf16.gmra.mxu1 %v2324_v27 }
  0x4e   : > { %2213 = vmatprep.mubr.bf16.mxu0 %v2325_v28  ;;  %2245 = vmatprep.mubr.bf16.mxu1 %v2326_v29 }
  0x55   : > { %2214 = vmatmul.mubr.bf16.gmra.mxu0 %v2327_v30  ;;  %2246 = vmatmul.mubr.bf16.gmra.mxu1 %v2328_v31 }
  0x56   : > { %2217 = vmatprep.mubr.bf16.mxu0 %v2329_v32  ;;  %2249 = vmatprep.mubr.bf16.mxu1 %v2330_v33 }
  0x5d   : > { %2218 = vmatmul.mubr.bf16.gmra.mxu0 %v2331_v34  ;;  %2250 = vmatmul.mubr.bf16.gmra.mxu1 %v2332_v35 }
  0x5e   : > { %2221 = vmatprep.mubr.bf16.mxu0 %v2333_v36  ;;  %2253 = vmatprep.mubr.bf16.mxu1 %v2334_v37 }
  0x65   : > { %2222 = vmatmul.mubr.bf16.gmra.mxu0 %v2335_v38  ;;  %2254 = vmatmul.mubr.bf16.gmra.mxu1 %v2336_v39 }
  0xed   : > { %v2195_v40 = vpop.f32.mrf.mxu0  ;;  %v2227_v41 = vpop.f32.mrf.mxu1 }
  0xee   : > { %vm1157_vm0 = vcmp.gt.f32.partialorder %v2195_v40, 0.0  ;;  %v1221_v42 = vmul.f32 0.2, %v2195_v40  ;;  %v1253_v43 = vmul.f32 0.2, %v2227_v41  ;;  %vm1189_vm1 = vcmp.gt.f32.partialorder %v2227_v41, 0.0 }
  0xef   : > { %v705_v44 = vpop.f32.mrf.mxu0  ;;  %v833_v45 = vpop.f32.mrf.mxu1 }
  0xf0   : > { %v1285_v46 = vsel %vm1157_vm0, %v2195_v40, %v1221_v42  ;;  %v1219_v47 = vmul.f32 0.2, %v705_v44  ;;  %vm1155_vm2 = vcmp.gt.f32.partialorder %v705_v44, 0.0  ;;  %v1317_v51 = vsel %vm1189_vm1, %v2227_v41, %v1253_v43 }
  0xf1   : > { %v2196_v48 = vpop.f32.mrf.mxu0  ;;  %v2228_v49 = vpop.f32.mrf.mxu1  ;;  %vm1187_vm5 = vcmp.gt.f32.partialorder %v833_v45, 0.0  ;;  %v1251_v52 = vmul.f32 0.2, %v833_v45 }
  0xf2   : > { %vm1158_vm3 = vcmp.gt.f32.partialorder %v2196_v48, 0.0  ;;  %v1222_v50 = vmul.f32 0.2, %v2196_v48  ;;  %vm1190_vm4 = vcmp.gt.f32.partialorder %v2228_v49, 0.0  ;;  %v1254_v53 = vmul.f32 0.2, %v2228_v49 }
  0xf3   : > { %v708_v54 = vpop.f32.mrf.mxu0  ;;  %v836_v55 = vpop.f32.mrf.mxu1  ;;  %v1283_v58 = vsel %vm1155_vm2, %v705_v44, %v1219_v47  ;;  %v1315_v3 = vsel %vm1187_vm5, %v833_v45, %v1251_v52 }
  0xf4   : > { %v1286_v56 = vsel %vm1158_vm3, %v2196_v48, %v1222_v50  ;;  %vm1156_vm6 = vcmp.gt.f32.partialorder %v708_v54, 0.0  ;;  %v1220_v57 = vmul.f32 0.2, %v708_v54  ;;  %vm1188_vm7 = vcmp.gt.f32.partialorder %v836_v55, 0.0 }
  0xf5   : > { %v1954_v59 = vpack.c.bf16 %v1286_v56, %v1285_v46  ;;  %v1318_v60 = vsel %vm1190_vm4, %v2228_v49, %v1254_v53  ;;  %v1252_v61 = vmul.f32 0.2, %v836_v55  ;;  %v2199_v62 = vpop.f32.mrf.mxu0  ;;  %v2231_v63 = vpop.f32.mrf.mxu1 }
  0xf6   : > { %v2034_v0 = vpack.c.bf16 %v1318_v60, %v1317_v51  ;;  %v1284_v1 = vsel %vm1156_vm6, %v708_v54, %v1220_v57  ;;  %vm1161_vm8 = vcmp.gt.f32.partialorder %v2199_v62, 0.0  ;;  %v1225_v2 = vmul.f32 0.2, %v2199_v62 }
  0xf7   : > { %2106 = vst [vmem:[%s2465_s8 + $0x8] sm:$0xff] %v1954_v59   ;;  %v1949_v4 = vpack.c.bf16 %v1284_v1, %v1283_v58  ;;  %v1316_v5 = vsel %vm1188_vm7, %v836_v55, %v1252_v61  ;;  %v1257_v6 = vmul.f32 0.2, %v2231_v63  ;;  %v721_v7 = vpop.f32.mrf.mxu0  ;;  %v849_v8 = vpop.f32.mrf.mxu1  ;;  %vm1193_vm9 = vcmp.gt.f32.partialorder %v2231_v63, 0.0 }
  0xf8   : > { %2122 = vst [vmem:[%s2465_s8 + $0x88] sm:$0xff] %v2034_v0   ;;  %v2029_v9 = vpack.c.bf16 %v1316_v5, %v1315_v3  ;;  %v1289_v10 = vsel %vm1161_vm8, %v2199_v62, %v1225_v2  ;;  %v1223_v11 = vmul.f32 0.2, %v721_v7  ;;  %vm1159_vm10 = vcmp.gt.f32.partialorder %v721_v7, 0.0 }
  0xf9   : > { %1950 = vst [vmem:[%s2465_s8] sm:$0xff] %v1949_v4   ;;  %v2200_v12 = vpop.f32.mrf.mxu0  ;;  %v2232_v13 = vpop.f32.mrf.mxu1  ;;  %v1321_v15 = vsel %vm1193_vm9, %v2231_v63, %v1257_v6  ;;  %vm1191_vm13 = vcmp.gt.f32.partialorder %v849_v8, 0.0  ;;  %v1255_v16 = vmul.f32 0.2, %v849_v8 }
  0xfa   : > { %2121 = vst [vmem:[%s2465_s8 + $0x80] sm:$0xff] %v2029_v9   ;;  %vm1162_vm11 = vcmp.gt.f32.partialorder %v2200_v12, 0.0  ;;  %v1226_v14 = vmul.f32 0.2, %v2200_v12  ;;  %vm1194_vm12 = vcmp.gt.f32.partialorder %v2232_v13, 0.0  ;;  %v1287_v22 = vsel %vm1159_vm10, %v721_v7, %v1223_v11 }
  0xfb   : > { %v1258_v17 = vmul.f32 0.2, %v2232_v13  ;;  %v724_v18 = vpop.f32.mrf.mxu0  ;;  %v852_v19 = vpop.f32.mrf.mxu1  ;;  %v1319_v31 = vsel %vm1191_vm13, %v849_v8, %v1255_v16 }
  0xfc   : > { %v1290_v20 = vsel %vm1162_vm11, %v2200_v12, %v1226_v14  ;;  %vm1160_vm14 = vcmp.gt.f32.partialorder %v724_v18, 0.0  ;;  %v1224_v21 = vmul.f32 0.2, %v724_v18  ;;  %vm1192_vm15 = vcmp.gt.f32.partialorder %v852_v19, 0.0 }
  0xfd   : > { %v1964_v23 = vpack.c.bf16 %v1290_v20, %v1289_v10  ;;  %v1322_v24 = vsel %vm1194_vm12, %v2232_v13, %v1258_v17  ;;  %v1256_v25 = vmul.f32 0.2, %v852_v19  ;;  %v2203_v26 = vpop.f32.mrf.mxu0  ;;  %v2235_v27 = vpop.f32.mrf.mxu1 }
  0xfe   : > { %v2044_v28 = vpack.c.bf16 %v1322_v24, %v1321_v15  ;;  %v1288_v29 = vsel %vm1160_vm14, %v724_v18, %v1224_v21  ;;  %vm1165_vm0 = vcmp.gt.f32.partialorder %v2203_v26, 0.0  ;;  %v1229_v30 = vmul.f32 0.2, %v2203_v26 }
  0xff   : > { %2108 = vst [vmem:[%s2465_s8 + $0x18] sm:$0xff] %v1964_v23   ;;  %v1959_v32 = vpack.c.bf16 %v1288_v29, %v1287_v22  ;;  %v1320_v33 = vsel %vm1192_vm15, %v852_v19, %v1256_v25  ;;  %v1261_v34 = vmul.f32 0.2, %v2235_v27  ;;  %v737_v35 = vpop.f32.mrf.mxu0  ;;  %v865_v36 = vpop.f32.mrf.mxu1  ;;  %vm1197_vm1 = vcmp.gt.f32.partialorder %v2235_v27, 0.0 }
 0x100   : > { %2124 = vst [vmem:[%s2465_s8 + $0x98] sm:$0xff] %v2044_v28   ;;  %v2039_v37 = vpack.c.bf16 %v1320_v33, %v1319_v31  ;;  %v1293_v38 = vsel %vm1165_vm0, %v2203_v26, %v1229_v30  ;;  %v1227_v39 = vmul.f32 0.2, %v737_v35  ;;  %vm1163_vm2 = vcmp.gt.f32.partialorder %v737_v35, 0.0 }
 0x101   : > { %2107 = vst [vmem:[%s2465_s8 + $0x10] sm:$0xff] %v1959_v32   ;;  %v2204_v40 = vpop.f32.mrf.mxu0  ;;  %v2236_v41 = vpop.f32.mrf.mxu1  ;;  %v1325_v43 = vsel %vm1197_vm1, %v2235_v27, %v1261_v34  ;;  %vm1195_vm5 = vcmp.gt.f32.partialorder %v865_v36, 0.0  ;;  %v1259_v44 = vmul.f32 0.2, %v865_v36 }
 0x102   : > { %2123 = vst [vmem:[%s2465_s8 + $0x90] sm:$0xff] %v2039_v37   ;;  %vm1166_vm3 = vcmp.gt.f32.partialorder %v2204_v40, 0.0  ;;  %v1230_v42 = vmul.f32 0.2, %v2204_v40  ;;  %vm1198_vm4 = vcmp.gt.f32.partialorder %v2236_v41, 0.0  ;;  %v1291_v50 = vsel %vm1163_vm2, %v737_v35, %v1227_v39 }
 0x103   : > { %v1262_v45 = vmul.f32 0.2, %v2236_v41  ;;  %v740_v46 = vpop.f32.mrf.mxu0  ;;  %v868_v47 = vpop.f32.mrf.mxu1  ;;  %v1323_v59 = vsel %vm1195_vm5, %v865_v36, %v1259_v44 }
 0x104   : > { %v1294_v48 = vsel %vm1166_vm3, %v2204_v40, %v1230_v42  ;;  %vm1164_vm6 = vcmp.gt.f32.partialorder %v740_v46, 0.0  ;;  %v1228_v49 = vmul.f32 0.2, %v740_v46  ;;  %vm1196_vm7 = vcmp.gt.f32.partialorder %v868_v47, 0.0 }
 0x105   : > { %v1974_v51 = vpack.c.bf16 %v1294_v48, %v1293_v38  ;;  %v1326_v52 = vsel %vm1198_vm4, %v2236_v41, %v1262_v45  ;;  %v1260_v53 = vmul.f32 0.2, %v868_v47  ;;  %v2207_v54 = vpop.f32.mrf.mxu0  ;;  %v2239_v55 = vpop.f32.mrf.mxu1 }
 0x106   : > { %v2054_v56 = vpack.c.bf16 %v1326_v52, %v1325_v43  ;;  %v1292_v57 = vsel %vm1164_vm6, %v740_v46, %v1228_v49  ;;  %vm1169_vm8 = vcmp.gt.f32.partialorder %v2207_v54, 0.0  ;;  %v1233_v58 = vmul.f32 0.2, %v2207_v54 }
 0x107   : > { %2110 = vst [vmem:[%s2465_s8 + $0x28] sm:$0xff] %v1974_v51   ;;  %v1969_v60 = vpack.c.bf16 %v1292_v57, %v1291_v50  ;;  %v1324_v61 = vsel %vm1196_vm7, %v868_v47, %v1260_v53  ;;  %v1265_v62 = vmul.f32 0.2, %v2239_v55  ;;  %v753_v63 = vpop.f32.mrf.mxu0  ;;  %v881_v0 = vpop.f32.mrf.mxu1  ;;  %vm1201_vm9 = vcmp.gt.f32.partialorder %v2239_v55, 0.0 }
 0x108   : > { %2126 = vst [vmem:[%s2465_s8 + $0xa8] sm:$0xff] %v2054_v56   ;;  %v2049_v1 = vpack.c.bf16 %v1324_v61, %v1323_v59  ;;  %v1297_v2 = vsel %vm1169_vm8, %v2207_v54, %v1233_v58  ;;  %v1231_v3 = vmul.f32 0.2, %v753_v63  ;;  %vm1167_vm10 = vcmp.gt.f32.partialorder %v753_v63, 0.0 }
 0x109   : > { %2109 = vst [vmem:[%s2465_s8 + $0x20] sm:$0xff] %v1969_v60   ;;  %v2208_v4 = vpop.f32.mrf.mxu0  ;;  %v2240_v5 = vpop.f32.mrf.mxu1  ;;  %v1329_v7 = vsel %vm1201_vm9, %v2239_v55, %v1265_v62  ;;  %vm1199_vm13 = vcmp.gt.f32.partialorder %v881_v0, 0.0  ;;  %v1263_v8 = vmul.f32 0.2, %v881_v0 }
 0x10a   : > { %2125 = vst [vmem:[%s2465_s8 + $0xa0] sm:$0xff] %v2049_v1   ;;  %vm1170_vm11 = vcmp.gt.f32.partialorder %v2208_v4, 0.0  ;;  %v1234_v6 = vmul.f32 0.2, %v2208_v4  ;;  %vm1202_vm12 = vcmp.gt.f32.partialorder %v2240_v5, 0.0  ;;  %v1295_v14 = vsel %vm1167_vm10, %v753_v63, %v1231_v3 }
 0x10b   : > { %v1266_v9 = vmul.f32 0.2, %v2240_v5  ;;  %v756_v10 = vpop.f32.mrf.mxu0  ;;  %v884_v11 = vpop.f32.mrf.mxu1  ;;  %v1327_v23 = vsel %vm1199_vm13, %v881_v0, %v1263_v8 }
 0x10c   : > { %v1298_v12 = vsel %vm1170_vm11, %v2208_v4, %v1234_v6  ;;  %vm1168_vm14 = vcmp.gt.f32.partialorder %v756_v10, 0.0  ;;  %v1232_v13 = vmul.f32 0.2, %v756_v10  ;;  %vm1200_vm15 = vcmp.gt.f32.partialorder %v884_v11, 0.0 }
 0x10d   : > { %v1984_v15 = vpack.c.bf16 %v1298_v12, %v1297_v2  ;;  %v1330_v16 = vsel %vm1202_vm12, %v2240_v5, %v1266_v9  ;;  %v1264_v17 = vmul.f32 0.2, %v884_v11  ;;  %v2211_v18 = vpop.f32.mrf.mxu0  ;;  %v2243_v19 = vpop.f32.mrf.mxu1 }
 0x10e   : > { %v2064_v20 = vpack.c.bf16 %v1330_v16, %v1329_v7  ;;  %v1296_v21 = vsel %vm1168_vm14, %v756_v10, %v1232_v13  ;;  %vm1173_vm0 = vcmp.gt.f32.partialorder %v2211_v18, 0.0  ;;  %v1237_v22 = vmul.f32 0.2, %v2211_v18 }
 0x10f   : > { %2112 = vst [vmem:[%s2465_s8 + $0x38] sm:$0xff] %v1984_v15   ;;  %v1979_v24 = vpack.c.bf16 %v1296_v21, %v1295_v14  ;;  %v1328_v25 = vsel %vm1200_vm15, %v884_v11, %v1264_v17  ;;  %v1269_v26 = vmul.f32 0.2, %v2243_v19  ;;  %v769_v27 = vpop.f32.mrf.mxu0  ;;  %v897_v28 = vpop.f32.mrf.mxu1  ;;  %vm1205_vm1 = vcmp.gt.f32.partialorder %v2243_v19, 0.0 }
 0x110   : > { %2128 = vst [vmem:[%s2465_s8 + $0xb8] sm:$0xff] %v2064_v20   ;;  %v2059_v29 = vpack.c.bf16 %v1328_v25, %v1327_v23  ;;  %v1301_v30 = vsel %vm1173_vm0, %v2211_v18, %v1237_v22  ;;  %v1235_v31 = vmul.f32 0.2, %v769_v27  ;;  %vm1171_vm2 = vcmp.gt.f32.partialorder %v769_v27, 0.0 }
 0x111   : > { %2111 = vst [vmem:[%s2465_s8 + $0x30] sm:$0xff] %v1979_v24   ;;  %v2212_v32 = vpop.f32.mrf.mxu0  ;;  %v2244_v33 = vpop.f32.mrf.mxu1  ;;  %v1333_v35 = vsel %vm1205_vm1, %v2243_v19, %v1269_v26  ;;  %vm1203_vm5 = vcmp.gt.f32.partialorder %v897_v28, 0.0  ;;  %v1267_v36 = vmul.f32 0.2, %v897_v28 }
 0x112   : > { %2127 = vst [vmem:[%s2465_s8 + $0xb0] sm:$0xff] %v2059_v29   ;;  %vm1174_vm3 = vcmp.gt.f32.partialorder %v2212_v32, 0.0  ;;  %v1238_v34 = vmul.f32 0.2, %v2212_v32  ;;  %vm1206_vm4 = vcmp.gt.f32.partialorder %v2244_v33, 0.0  ;;  %v1299_v42 = vsel %vm1171_vm2, %v769_v27, %v1235_v31 }
 0x113   : > { %v1270_v37 = vmul.f32 0.2, %v2244_v33  ;;  %v772_v38 = vpop.f32.mrf.mxu0  ;;  %v900_v39 = vpop.f32.mrf.mxu1  ;;  %v1331_v51 = vsel %vm1203_vm5, %v897_v28, %v1267_v36 }
 0x114   : > { %v1302_v40 = vsel %vm1174_vm3, %v2212_v32, %v1238_v34  ;;  %vm1172_vm6 = vcmp.gt.f32.partialorder %v772_v38, 0.0  ;;  %v1236_v41 = vmul.f32 0.2, %v772_v38  ;;  %vm1204_vm7 = vcmp.gt.f32.partialorder %v900_v39, 0.0 }
 0x115   : > { %v1994_v43 = vpack.c.bf16 %v1302_v40, %v1301_v30  ;;  %v1334_v44 = vsel %vm1206_vm4, %v2244_v33, %v1270_v37  ;;  %v1268_v45 = vmul.f32 0.2, %v900_v39  ;;  %v2215_v46 = vpop.f32.mrf.mxu0  ;;  %v2247_v47 = vpop.f32.mrf.mxu1 }
 0x116   : > { %v2074_v48 = vpack.c.bf16 %v1334_v44, %v1333_v35  ;;  %v1300_v49 = vsel %vm1172_vm6, %v772_v38, %v1236_v41  ;;  %vm1177_vm8 = vcmp.gt.f32.partialorder %v2215_v46, 0.0  ;;  %v1241_v50 = vmul.f32 0.2, %v2215_v46 }
 0x117   : > { %2114 = vst [vmem:[%s2465_s8 + $0x48] sm:$0xff] %v1994_v43   ;;  %v1989_v52 = vpack.c.bf16 %v1300_v49, %v1299_v42  ;;  %v1332_v53 = vsel %vm1204_vm7, %v900_v39, %v1268_v45  ;;  %v1273_v54 = vmul.f32 0.2, %v2247_v47  ;;  %v785_v55 = vpop.f32.mrf.mxu0  ;;  %v913_v56 = vpop.f32.mrf.mxu1  ;;  %vm1209_vm9 = vcmp.gt.f32.partialorder %v2247_v47, 0.0 }
 0x118   : > { %2130 = vst [vmem:[%s2465_s8 + $0xc8] sm:$0xff] %v2074_v48   ;;  %v2069_v57 = vpack.c.bf16 %v1332_v53, %v1331_v51  ;;  %v1305_v58 = vsel %vm1177_vm8, %v2215_v46, %v1241_v50  ;;  %v1239_v59 = vmul.f32 0.2, %v785_v55  ;;  %vm1175_vm10 = vcmp.gt.f32.partialorder %v785_v55, 0.0 }
 0x119   : > { %2113 = vst [vmem:[%s2465_s8 + $0x40] sm:$0xff] %v1989_v52   ;;  %v2216_v60 = vpop.f32.mrf.mxu0  ;;  %v2248_v61 = vpop.f32.mrf.mxu1  ;;  %v1337_v63 = vsel %vm1209_vm9, %v2247_v47, %v1273_v54  ;;  %vm1207_vm13 = vcmp.gt.f32.partialorder %v913_v56, 0.0  ;;  %v1271_v0 = vmul.f32 0.2, %v913_v56 }
 0x11a   : > { %2129 = vst [vmem:[%s2465_s8 + $0xc0] sm:$0xff] %v2069_v57   ;;  %vm1178_vm11 = vcmp.gt.f32.partialorder %v2216_v60, 0.0  ;;  %v1242_v62 = vmul.f32 0.2, %v2216_v60  ;;  %vm1210_vm12 = vcmp.gt.f32.partialorder %v2248_v61, 0.0  ;;  %v1303_v6 = vsel %vm1175_vm10, %v785_v55, %v1239_v59 }
 0x11b   : > { %v1274_v1 = vmul.f32 0.2, %v2248_v61  ;;  %v788_v2 = vpop.f32.mrf.mxu0  ;;  %v916_v3 = vpop.f32.mrf.mxu1  ;;  %v1335_v15 = vsel %vm1207_vm13, %v913_v56, %v1271_v0 }
 0x11c   : > { %v1306_v4 = vsel %vm1178_vm11, %v2216_v60, %v1242_v62  ;;  %vm1176_vm14 = vcmp.gt.f32.partialorder %v788_v2, 0.0  ;;  %v1240_v5 = vmul.f32 0.2, %v788_v2  ;;  %vm1208_vm15 = vcmp.gt.f32.partialorder %v916_v3, 0.0 }
 0x11d   : > { %v2004_v7 = vpack.c.bf16 %v1306_v4, %v1305_v58  ;;  %v1338_v8 = vsel %vm1210_vm12, %v2248_v61, %v1274_v1  ;;  %v1272_v9 = vmul.f32 0.2, %v916_v3  ;;  %v2219_v10 = vpop.f32.mrf.mxu0  ;;  %v2251_v11 = vpop.f32.mrf.mxu1 }
 0x11e   : > { %v2084_v12 = vpack.c.bf16 %v1338_v8, %v1337_v63  ;;  %v1304_v13 = vsel %vm1176_vm14, %v788_v2, %v1240_v5  ;;  %vm1181_vm0 = vcmp.gt.f32.partialorder %v2219_v10, 0.0  ;;  %v1245_v14 = vmul.f32 0.2, %v2219_v10 }
 0x11f   : > { %2116 = vst [vmem:[%s2465_s8 + $0x58] sm:$0xff] %v2004_v7   ;;  %v1999_v16 = vpack.c.bf16 %v1304_v13, %v1303_v6  ;;  %v1336_v17 = vsel %vm1208_vm15, %v916_v3, %v1272_v9  ;;  %v1277_v18 = vmul.f32 0.2, %v2251_v11  ;;  %v801_v19 = vpop.f32.mrf.mxu0  ;;  %v929_v20 = vpop.f32.mrf.mxu1  ;;  %vm1213_vm1 = vcmp.gt.f32.partialorder %v2251_v11, 0.0 }
 0x120   : > { %2132 = vst [vmem:[%s2465_s8 + $0xd8] sm:$0xff] %v2084_v12   ;;  %v2079_v21 = vpack.c.bf16 %v1336_v17, %v1335_v15  ;;  %v1309_v22 = vsel %vm1181_vm0, %v2219_v10, %v1245_v14  ;;  %v1243_v23 = vmul.f32 0.2, %v801_v19  ;;  %vm1179_vm2 = vcmp.gt.f32.partialorder %v801_v19, 0.0 }
 0x121   : > { %2115 = vst [vmem:[%s2465_s8 + $0x50] sm:$0xff] %v1999_v16   ;;  %v2220_v24 = vpop.f32.mrf.mxu0  ;;  %v2252_v25 = vpop.f32.mrf.mxu1  ;;  %v1341_v27 = vsel %vm1213_vm1, %v2251_v11, %v1277_v18  ;;  %vm1211_vm5 = vcmp.gt.f32.partialorder %v929_v20, 0.0  ;;  %v1275_v28 = vmul.f32 0.2, %v929_v20 }
 0x122   : > { %2131 = vst [vmem:[%s2465_s8 + $0xd0] sm:$0xff] %v2079_v21   ;;  %vm1182_vm3 = vcmp.gt.f32.partialorder %v2220_v24, 0.0  ;;  %v1246_v26 = vmul.f32 0.2, %v2220_v24  ;;  %vm1214_vm4 = vcmp.gt.f32.partialorder %v2252_v25, 0.0  ;;  %v1307_v34 = vsel %vm1179_vm2, %v801_v19, %v1243_v23 }
 0x123   : > { %v1278_v29 = vmul.f32 0.2, %v2252_v25  ;;  %v804_v30 = vpop.f32.mrf.mxu0  ;;  %v932_v31 = vpop.f32.mrf.mxu1  ;;  %v1339_v43 = vsel %vm1211_vm5, %v929_v20, %v1275_v28 }
 0x124   : > { %v1310_v32 = vsel %vm1182_vm3, %v2220_v24, %v1246_v26  ;;  %vm1180_vm6 = vcmp.gt.f32.partialorder %v804_v30, 0.0  ;;  %v1244_v33 = vmul.f32 0.2, %v804_v30  ;;  %vm1212_vm7 = vcmp.gt.f32.partialorder %v932_v31, 0.0 }
 0x125   : > { %v2014_v35 = vpack.c.bf16 %v1310_v32, %v1309_v22  ;;  %v1342_v36 = vsel %vm1214_vm4, %v2252_v25, %v1278_v29  ;;  %v1276_v37 = vmul.f32 0.2, %v932_v31  ;;  %v2223_v38 = vpop.f32.mrf.mxu0  ;;  %v2255_v39 = vpop.f32.mrf.mxu1 }
 0x126   : > { %v2094_v40 = vpack.c.bf16 %v1342_v36, %v1341_v27  ;;  %v1308_v41 = vsel %vm1180_vm6, %v804_v30, %v1244_v33  ;;  %vm1185_vm8 = vcmp.gt.f32.partialorder %v2223_v38, 0.0  ;;  %v1249_v42 = vmul.f32 0.2, %v2223_v38 }
 0x127   : > { %2118 = vst [vmem:[%s2465_s8 + $0x68] sm:$0xff] %v2014_v35   ;;  %v2009_v44 = vpack.c.bf16 %v1308_v41, %v1307_v34  ;;  %v1340_v45 = vsel %vm1212_vm7, %v932_v31, %v1276_v37  ;;  %v817_v46 = vpop.f32.mrf.mxu0  ;;  %v945_v47 = vpop.f32.mrf.mxu1  ;;  %vm1217_vm9 = vcmp.gt.f32.partialorder %v2255_v39, 0.0  ;;  %v1281_v50 = vmul.f32 0.2, %v2255_v39 }
 0x128   : > { %2134 = vst [vmem:[%s2465_s8 + $0xe8] sm:$0xff] %v2094_v40   ;;  %v2089_v48 = vpack.c.bf16 %v1340_v45, %v1339_v43  ;;  %v1313_v49 = vsel %vm1185_vm8, %v2223_v38, %v1249_v42  ;;  %v1247_v53 = vmul.f32 0.2, %v817_v46  ;;  %vm1183_vm12 = vcmp.gt.f32.partialorder %v817_v46, 0.0 }
 0x129   : > { %2117 = vst [vmem:[%s2465_s8 + $0x60] sm:$0xff] %v2009_v44   ;;  %v2224_v51 = vpop.f32.mrf.mxu0  ;;  %v2256_v52 = vpop.f32.mrf.mxu1  ;;  %vm1215_vm13 = vcmp.gt.f32.partialorder %v945_v47, 0.0  ;;  %v1279_v55 = vmul.f32 0.2, %v945_v47  ;;  %v1345_v61 = vsel %vm1217_vm9, %v2255_v39, %v1281_v50 }
 0x12a   : > { %2133 = vst [vmem:[%s2465_s8 + $0xe0] sm:$0xff] %v2089_v48   ;;  %vm1186_vm10 = vcmp.gt.f32.partialorder %v2224_v51, 0.0  ;;  %v1250_v54 = vmul.f32 0.2, %v2224_v51  ;;  %vm1218_vm11 = vcmp.gt.f32.partialorder %v2256_v52, 0.0  ;;  %v1311_v1 = vsel %vm1183_vm12, %v817_v46, %v1247_v53 }
 0x12b   : > { %v1282_v56 = vmul.f32 0.2, %v2256_v52  ;;  %v820_v57 = vpop.f32.mrf.mxu0  ;;  %v948_v58 = vpop.f32.mrf.mxu1  ;;  %v1343_v4 = vsel %vm1215_vm13, %v945_v47, %v1279_v55 }
 0x12c   : > { %v1314_v59 = vsel %vm1186_vm10, %v2224_v51, %v1250_v54  ;;  %vm1184_vm14 = vcmp.gt.f32.partialorder %v820_v57, 0.0  ;;  %v1248_v60 = vmul.f32 0.2, %v820_v57  ;;  %vm1216_vm15 = vcmp.gt.f32.partialorder %v948_v58, 0.0 }
 0x12d   : > { %v2024_v62 = vpack.c.bf16 %v1314_v59, %v1313_v49  ;;  %v1346_v63 = vsel %vm1218_vm11, %v2256_v52, %v1282_v56  ;;  %v1280_v0 = vmul.f32 0.2, %v948_v58 }
 0x12e   : > { %v2104_v2 = vpack.c.bf16 %v1346_v63, %v1345_v61  ;;  %v1312_v3 = vsel %vm1184_vm14, %v820_v57, %v1248_v60 }
 0x12f   : > { %2120 = vst [vmem:[%s2465_s8 + $0x78] sm:$0xff] %v2024_v62   ;;  %v2019_v5 = vpack.c.bf16 %v1312_v3, %v1311_v1  ;;  %v1344_v6 = vsel %vm1216_vm15, %v948_v58, %v1280_v0 }
 0x130   : > { %2136 = vst [vmem:[%s2465_s8 + $0xf8] sm:$0xff] %v2104_v2   ;;  %v2099_v7 = vpack.c.bf16 %v1344_v6, %v1343_v4 }
 0x131   : > { %2119 = vst [vmem:[%s2465_s8 + $0x70] sm:$0xff] %v2019_v5  }
 0x132   : > { %2135 = vst [vmem:[%s2465_s8 + $0xf0] sm:$0xff] %v2099_v7  }
 0x133 PF: > { %s12_s11 = sadd.s32 1, %s2359_s11   ;;  %s2520_s9 = smov %s2355_s10 }
 0x134   : > { %p9_p5 = scmp.ge.s32.totalorder %s12_s11, 6   ;;  %s2521_s10 = smov %s2523_s12 }
 0x136   :  { %11 = sbr.rel (!%p9_p5) target bundleno = 2 (0x2), region = 69 }

// kernel: discriminator_forward.9
= control target key start
LH: loop header
LB: loop body
LE: loop exit
PB: predicated region body
PF: predicated region fallthrough
CT: control target
= control target key end

     0   :  { %s1974_s1 = inlined_call_operand.vmem [shape: bf16[128,128], index: 1, kind: input, shape index: {}]   ;;  %s1975_s0 = inlined_call_operand.vmem [shape: bf16[512,128], index: 0, kind: input, shape index: {}]   ;;  %s1976_s2 = inlined_call_operand.vmem [shape: f32[512,128], index: 2, kind: output, shape index: {0}]   ;;  %s1977_s3 = inlined_call_operand.vmem [shape: f32[8,128], index: 3, kind: output, shape index: {1}]  }
   0x1   :  { %v1407_v0 = vld [vmem:[%s1974_s1 + $0x38] sm:$0xff]   ;;  %v1408_v1 = vld [vmem:[%s1974_s1 + $0x30] sm:$0xff]   ;;  %v1409_v2 = vld [vmem:[%s1974_s1 + $0x28] sm:$0xff]  }
   0x2   :  { %1311 = vmatprep.subr.bf16.mxu0 %v1407_v0  ;;  %1391 = vmatprep.subr.bf16.mxu1 %v1407_v0  ;;  %v1410_v3 = vld [vmem:[%s1974_s1 + $0x20] sm:$0xff]   ;;  %v1411_v5 = vld [vmem:[%s1974_s1 + $0x18] sm:$0xff]   ;;  %v1412_v6 = vld [vmem:[%s1974_s1 + $0x10] sm:$0xff]  }
   0x3   :  { %1312 = vmatpush3.bf16.msra.mxu0 %v1407_v0  ;;  %1399 = vmatpush3.bf16.msra.mxu1 %v1407_v0  ;;  %v1415_v4 = vld [vmem:[%s1975_s0] sm:$0xff]   ;;  %v1413_v7 = vld [vmem:[%s1974_s1 + $0x8] sm:$0xff]   ;;  %v1417_v11 = vld [vmem:[%s1975_s0 + $0x10] sm:$0xff]  }
   0x4   :  { %1313 = vmatprep.subr.bf16.mxu0 %v1408_v1  ;;  %1392 = vmatprep.subr.bf16.mxu1 %v1408_v1  ;;  %v1414_v8 = vld [vmem:[%s1974_s1] sm:$0xff]   ;;  %v1416_v10 = vld [vmem:[%s1975_s0 + $0x8] sm:$0xff]   ;;  %v1433_v13 = vld [vmem:[%s1975_s0 + $0x90] sm:$0xff]  }
   0x5   :  { %1327 = vmatprep.mubr.bf16.mxu0 %v1415_v4  ;;  %v1431_v9 = vld [vmem:[%s1975_s0 + $0x80] sm:$0xff]   ;;  %v1432_v12 = vld [vmem:[%s1975_s0 + $0x88] sm:$0xff]   ;;  %v1418_v14 = vld [vmem:[%s1975_s0 + $0x18] sm:$0xff]  }
   0x6   :  { %1359 = vmatprep.mubr.bf16.mxu1 %v1431_v9  ;;  %v1419_v15 = vld [vmem:[%s1975_s0 + $0x20] sm:$0xff]   ;;  %v1434_v16 = vld [vmem:[%s1975_s0 + $0x98] sm:$0xff]   ;;  %v1420_v18 = vld [vmem:[%s1975_s0 + $0x28] sm:$0xff]  }
   0x7   :  { %1314 = vmatpush3.bf16.msra.mxu0 %v1408_v1  ;;  %1400 = vmatpush3.bf16.msra.mxu1 %v1408_v1  ;;  %v1435_v17 = vld [vmem:[%s1975_s0 + $0xa0] sm:$0xff]   ;;  %v1436_v19 = vld [vmem:[%s1975_s0 + $0xa8] sm:$0xff]   ;;  %v1421_v20 = vld [vmem:[%s1975_s0 + $0x30] sm:$0xff]  }
   0x8   :  { %1315 = vmatprep.subr.bf16.mxu0 %v1409_v2  ;;  %1393 = vmatprep.subr.bf16.mxu1 %v1409_v2  ;;  %v1437_v21 = vld [vmem:[%s1975_s0 + $0xb0] sm:$0xff]   ;;  %v1422_v22 = vld [vmem:[%s1975_s0 + $0x38] sm:$0xff]   ;;  %v1423_v24 = vld [vmem:[%s1975_s0 + $0x40] sm:$0xff]  }
   0x9   :  { %v1438_v23 = vld [vmem:[%s1975_s0 + $0xb8] sm:$0xff]   ;;  %v1439_v25 = vld [vmem:[%s1975_s0 + $0xc0] sm:$0xff]   ;;  %v1424_v26 = vld [vmem:[%s1975_s0 + $0x48] sm:$0xff]  }
   0xa   :  { %v1440_v27 = vld [vmem:[%s1975_s0 + $0xc8] sm:$0xff]   ;;  %v1425_v28 = vld [vmem:[%s1975_s0 + $0x50] sm:$0xff]   ;;  %v1426_v30 = vld [vmem:[%s1975_s0 + $0x58] sm:$0xff]  }
   0xb   :  { %1316 = vmatpush3.bf16.msra.mxu0 %v1409_v2  ;;  %1401 = vmatpush3.bf16.msra.mxu1 %v1409_v2  ;;  %v1441_v29 = vld [vmem:[%s1975_s0 + $0xd0] sm:$0xff]   ;;  %v1442_v31 = vld [vmem:[%s1975_s0 + $0xd8] sm:$0xff]   ;;  %v1427_v32 = vld [vmem:[%s1975_s0 + $0x60] sm:$0xff]  }
   0xc   :  { %1317 = vmatprep.subr.bf16.mxu0 %v1410_v3  ;;  %1394 = vmatprep.subr.bf16.mxu1 %v1410_v3  ;;  %v1443_v33 = vld [vmem:[%s1975_s0 + $0xe0] sm:$0xff]   ;;  %v1428_v34 = vld [vmem:[%s1975_s0 + $0x68] sm:$0xff]   ;;  %v1429_v36 = vld [vmem:[%s1975_s0 + $0x70] sm:$0xff]  }
   0xd   :  { %v1444_v35 = vld [vmem:[%s1975_s0 + $0xe8] sm:$0xff]   ;;  %v1445_v37 = vld [vmem:[%s1975_s0 + $0xf0] sm:$0xff]   ;;  %v1430_v38 = vld [vmem:[%s1975_s0 + $0x78] sm:$0xff]  }
   0xe   :  { %v1446_v39 = vld [vmem:[%s1975_s0 + $0xf8] sm:$0xff]  }
   0xf   :  { %1318 = vmatpush3.bf16.msra.mxu0 %v1410_v3  ;;  %1402 = vmatpush3.bf16.msra.mxu1 %v1410_v3 }
  0x10   :  { %1319 = vmatprep.subr.bf16.mxu0 %v1411_v5  ;;  %1395 = vmatprep.subr.bf16.mxu1 %v1411_v5 }
  0x13   :  { %1320 = vmatpush3.bf16.msra.mxu0 %v1411_v5  ;;  %1403 = vmatpush3.bf16.msra.mxu1 %v1411_v5 }
  0x14   :  { %1321 = vmatprep.subr.bf16.mxu0 %v1412_v6  ;;  %1396 = vmatprep.subr.bf16.mxu1 %v1412_v6 }
  0x17   :  { %1322 = vmatpush3.bf16.msra.mxu0 %v1412_v6  ;;  %1404 = vmatpush3.bf16.msra.mxu1 %v1412_v6 }
  0x18   :  { %1323 = vmatprep.subr.bf16.mxu0 %v1413_v7  ;;  %1397 = vmatprep.subr.bf16.mxu1 %v1413_v7 }
  0x1b   :  { %1324 = vmatpush3.bf16.msra.mxu0 %v1413_v7  ;;  %1405 = vmatpush3.bf16.msra.mxu1 %v1413_v7 }
  0x1c   :  { %1325 = vmatprep.subr.bf16.mxu0 %v1414_v8  ;;  %1398 = vmatprep.subr.bf16.mxu1 %v1414_v8 }
  0x1f   :  { %1326 = vmatpush3.bf16.msra.mxu0 %v1414_v8  ;;  %1406 = vmatpush3.bf16.msra.mxu1 %v1414_v8 }
  0x22   :  { %1328 = vmatmul.mubr.bf16.vlgmr.msra.gmra.mxu0 %v1416_v10  ;;  %1360 = vmatmul.mubr.bf16.vlgmr.msra.gmra.mxu1 %v1432_v12 }
  0x23   :  { %1331 = vmatprep.mubr.bf16.mxu0 %v1417_v11  ;;  %1363 = vmatprep.mubr.bf16.mxu1 %v1433_v13 }
  0x2a   :  { %1332 = vmatmul.mubr.bf16.gmra.mxu0 %v1418_v14  ;;  %1364 = vmatmul.mubr.bf16.gmra.mxu1 %v1434_v16 }
  0x2b   :  { %1335 = vmatprep.mubr.bf16.mxu0 %v1419_v15  ;;  %1367 = vmatprep.mubr.bf16.mxu1 %v1435_v17 }
  0x32   :  { %1336 = vmatmul.mubr.bf16.gmra.mxu0 %v1420_v18  ;;  %1368 = vmatmul.mubr.bf16.gmra.mxu1 %v1436_v19 }
  0x33   :  { %1339 = vmatprep.mubr.bf16.mxu0 %v1421_v20  ;;  %1371 = vmatprep.mubr.bf16.mxu1 %v1437_v21 }
  0x3a   :  { %1340 = vmatmul.mubr.bf16.gmra.mxu0 %v1422_v22  ;;  %1372 = vmatmul.mubr.bf16.gmra.mxu1 %v1438_v23 }
  0x3b   :  { %1343 = vmatprep.mubr.bf16.mxu0 %v1423_v24  ;;  %1375 = vmatprep.mubr.bf16.mxu1 %v1439_v25 }
  0x42   :  { %1344 = vmatmul.mubr.bf16.gmra.mxu0 %v1424_v26  ;;  %1376 = vmatmul.mubr.bf16.gmra.mxu1 %v1440_v27 }
  0x43   :  { %1347 = vmatprep.mubr.bf16.mxu0 %v1425_v28  ;;  %1379 = vmatprep.mubr.bf16.mxu1 %v1441_v29 }
  0x4a   :  { %1348 = vmatmul.mubr.bf16.gmra.mxu0 %v1426_v30  ;;  %1380 = vmatmul.mubr.bf16.gmra.mxu1 %v1442_v31 }
  0x4b   :  { %1351 = vmatprep.mubr.bf16.mxu0 %v1427_v32  ;;  %1383 = vmatprep.mubr.bf16.mxu1 %v1443_v33 }
  0x52   :  { %1352 = vmatmul.mubr.bf16.gmra.mxu0 %v1428_v34  ;;  %1384 = vmatmul.mubr.bf16.gmra.mxu1 %v1444_v35 }
  0x53   :  { %1355 = vmatprep.mubr.bf16.mxu0 %v1429_v36  ;;  %1387 = vmatprep.mubr.bf16.mxu1 %v1445_v37 }
  0x5a   :  { %1356 = vmatmul.mubr.bf16.gmra.mxu0 %v1430_v38  ;;  %1388 = vmatmul.mubr.bf16.gmra.mxu1 %v1446_v39 }
  0xe2   :  { %v1329_v40 = vpop.f32.mrf.mxu0  ;;  %v1587_v41 = vpop.f32.mrf.mxu1 }
  0xe3   :  { %952 = vst [vmem:[%s1976_s2 + $0x10] sm:$0xff] %v1329_v40  ;;  %984 = vst [vmem:[%s1976_s2 + $0x110] sm:$0xff] %v1587_v41  ;;  %v1085_v53 = vmul.f32 %v1329_v40, %v1329_v40 }
  0xe4   :  { %v500_v42 = vpop.f32.mrf.mxu0  ;;  %v1596_v43 = vpop.f32.mrf.mxu1 }
  0xe5   :  { %950 = vst [vmem:[%s1976_s2] sm:$0xff] %v500_v42  ;;  %982 = vst [vmem:[%s1976_s2 + $0x100] sm:$0xff] %v1596_v43  ;;  %v1083_v48 = vmul.f32 %v500_v42, %v500_v42 }
  0xe6   :  { %v1330_v44 = vpop.f32.mrf.mxu0  ;;  %v1605_v45 = vpop.f32.mrf.mxu1 }
  0xe7   :  { %953 = vst [vmem:[%s1976_s2 + $0x18] sm:$0xff] %v1330_v44  ;;  %985 = vst [vmem:[%s1976_s2 + $0x118] sm:$0xff] %v1605_v45  ;;  %v1086_v58 = vmul.f32 %v1330_v44, %v1330_v44 }
  0xe8   :  { %v503_v46 = vpop.f32.mrf.mxu0  ;;  %v1614_v47 = vpop.f32.mrf.mxu1 }
  0xe9   :  { %951 = vst [vmem:[%s1976_s2 + $0x8] sm:$0xff] %v503_v46  ;;  %v1014_v49 = vadd.f32 %v503_v46, %v500_v42  ;;  %v1084_v50 = vmul.f32 %v503_v46, %v503_v46  ;;  %983 = vst [vmem:[%s1976_s2 + $0x108] sm:$0xff] %v1614_v47 }
  0xea   :  { %v1333_v51 = vpop.f32.mrf.mxu0  ;;  %v1623_v52 = vpop.f32.mrf.mxu1 }
  0xeb   :  { %v1015_v54 = vadd.f32 %v1329_v40, %v1014_v49  ;;  %v1147_v55 = vadd.f32 %v1084_v50, %v1083_v48  ;;  %956 = vst [vmem:[%s1976_s2 + $0x30] sm:$0xff] %v1333_v51  ;;  %988 = vst [vmem:[%s1976_s2 + $0x130] sm:$0xff] %v1623_v52  ;;  %v1089_v9 = vmul.f32 %v1333_v51, %v1333_v51 }
  0xec   :  { %v516_v56 = vpop.f32.mrf.mxu0  ;;  %v1632_v57 = vpop.f32.mrf.mxu1 }
  0xed   :  { %v1148_v59 = vadd.f32 %v1147_v55, %v1085_v53  ;;  %954 = vst [vmem:[%s1976_s2 + $0x20] sm:$0xff] %v516_v56  ;;  %v1016_v60 = vadd.f32 %v1330_v44, %v1015_v54  ;;  %986 = vst [vmem:[%s1976_s2 + $0x120] sm:$0xff] %v1632_v57  ;;  %v1087_v0 = vmul.f32 %v516_v56, %v516_v56 }
  0xee   :  { %v1334_v61 = vpop.f32.mrf.mxu0  ;;  %v1641_v62 = vpop.f32.mrf.mxu1 }
  0xef   :  { %v1017_v63 = vadd.f32 %v1016_v60, %v516_v56  ;;  %v1149_v1 = vadd.f32 %v1148_v59, %v1086_v58  ;;  %957 = vst [vmem:[%s1976_s2 + $0x38] sm:$0xff] %v1334_v61  ;;  %989 = vst [vmem:[%s1976_s2 + $0x138] sm:$0xff] %v1641_v62  ;;  %v1090_v14 = vmul.f32 %v1334_v61, %v1334_v61 }
  0xf0   :  { %v519_v2 = vpop.f32.mrf.mxu0  ;;  %v1650_v3 = vpop.f32.mrf.mxu1 }
  0xf1   :  { %v1150_v4 = vadd.f32 %v1149_v1, %v1087_v0  ;;  %955 = vst [vmem:[%s1976_s2 + $0x28] sm:$0xff] %v519_v2  ;;  %v1018_v5 = vadd.f32 %v1017_v63, %v519_v2  ;;  %v1088_v6 = vmul.f32 %v519_v2, %v519_v2  ;;  %987 = vst [vmem:[%s1976_s2 + $0x128] sm:$0xff] %v1650_v3 }
  0xf2   :  { %v1337_v7 = vpop.f32.mrf.mxu0  ;;  %v1659_v8 = vpop.f32.mrf.mxu1 }
  0xf3   :  { %v1019_v10 = vadd.f32 %v1333_v51, %v1018_v5  ;;  %v1151_v11 = vadd.f32 %v1150_v4, %v1088_v6  ;;  %960 = vst [vmem:[%s1976_s2 + $0x50] sm:$0xff] %v1337_v7  ;;  %992 = vst [vmem:[%s1976_s2 + $0x150] sm:$0xff] %v1659_v8  ;;  %v1093_v29 = vmul.f32 %v1337_v7, %v1337_v7 }
  0xf4   :  { %v532_v12 = vpop.f32.mrf.mxu0  ;;  %v1668_v13 = vpop.f32.mrf.mxu1 }
  0xf5   :  { %v1152_v15 = vadd.f32 %v1151_v11, %v1089_v9  ;;  %958 = vst [vmem:[%s1976_s2 + $0x40] sm:$0xff] %v532_v12  ;;  %v1020_v16 = vadd.f32 %v1334_v61, %v1019_v10  ;;  %990 = vst [vmem:[%s1976_s2 + $0x140] sm:$0xff] %v1668_v13  ;;  %v1091_v20 = vmul.f32 %v532_v12, %v532_v12 }
  0xf6   :  { %v1338_v17 = vpop.f32.mrf.mxu0  ;;  %v1677_v18 = vpop.f32.mrf.mxu1 }
  0xf7   :  { %v1021_v19 = vadd.f32 %v1020_v16, %v532_v12  ;;  %v1153_v21 = vadd.f32 %v1152_v15, %v1090_v14  ;;  %961 = vst [vmem:[%s1976_s2 + $0x58] sm:$0xff] %v1338_v17  ;;  %993 = vst [vmem:[%s1976_s2 + $0x158] sm:$0xff] %v1677_v18  ;;  %v1094_v34 = vmul.f32 %v1338_v17, %v1338_v17 }
  0xf8   :  { %v535_v22 = vpop.f32.mrf.mxu0  ;;  %v1686_v23 = vpop.f32.mrf.mxu1 }
  0xf9   :  { %v1154_v24 = vadd.f32 %v1153_v21, %v1091_v20  ;;  %959 = vst [vmem:[%s1976_s2 + $0x48] sm:$0xff] %v535_v22  ;;  %v1022_v25 = vadd.f32 %v1021_v19, %v535_v22  ;;  %v1092_v26 = vmul.f32 %v535_v22, %v535_v22  ;;  %991 = vst [vmem:[%s1976_s2 + $0x148] sm:$0xff] %v1686_v23 }
  0xfa   :  { %v1341_v27 = vpop.f32.mrf.mxu0  ;;  %v1695_v28 = vpop.f32.mrf.mxu1 }
  0xfb   :  { %v1023_v30 = vadd.f32 %v1337_v7, %v1022_v25  ;;  %v1155_v31 = vadd.f32 %v1154_v24, %v1092_v26  ;;  %964 = vst [vmem:[%s1976_s2 + $0x70] sm:$0xff] %v1341_v27  ;;  %996 = vst [vmem:[%s1976_s2 + $0x170] sm:$0xff] %v1695_v28  ;;  %v1097_v54 = vmul.f32 %v1341_v27, %v1341_v27 }
  0xfc   :  { %v548_v32 = vpop.f32.mrf.mxu0  ;;  %v1704_v33 = vpop.f32.mrf.mxu1 }
  0xfd   :  { %v1156_v35 = vadd.f32 %v1155_v31, %v1093_v29  ;;  %962 = vst [vmem:[%s1976_s2 + $0x60] sm:$0xff] %v548_v32  ;;  %v1024_v36 = vadd.f32 %v1338_v17, %v1023_v30  ;;  %994 = vst [vmem:[%s1976_s2 + $0x160] sm:$0xff] %v1704_v33  ;;  %v1095_v40 = vmul.f32 %v548_v32, %v548_v32 }
  0xfe   :  { %v1342_v37 = vpop.f32.mrf.mxu0  ;;  %v1713_v38 = vpop.f32.mrf.mxu1 }
  0xff   :  { %v1025_v39 = vadd.f32 %v1024_v36, %v548_v32  ;;  %v1157_v42 = vadd.f32 %v1156_v35, %v1094_v34  ;;  %965 = vst [vmem:[%s1976_s2 + $0x78] sm:$0xff] %v1342_v37  ;;  %997 = vst [vmem:[%s1976_s2 + $0x178] sm:$0xff] %v1713_v38  ;;  %v1098_v60 = vmul.f32 %v1342_v37, %v1342_v37 }
 0x100   :  { %v551_v44 = vpop.f32.mrf.mxu0  ;;  %v1722_v46 = vpop.f32.mrf.mxu1 }
 0x101   :  { %v1158_v48 = vadd.f32 %v1157_v42, %v1095_v40  ;;  %963 = vst [vmem:[%s1976_s2 + $0x68] sm:$0xff] %v551_v44  ;;  %v1026_v49 = vadd.f32 %v1025_v39, %v551_v44  ;;  %v1096_v50 = vmul.f32 %v551_v44, %v551_v44  ;;  %995 = vst [vmem:[%s1976_s2 + $0x168] sm:$0xff] %v1722_v46 }
 0x102   :  { %v1345_v51 = vpop.f32.mrf.mxu0  ;;  %v1731_v53 = vpop.f32.mrf.mxu1 }
 0x103   :  { %v1027_v55 = vadd.f32 %v1341_v27, %v1026_v49  ;;  %v1159_v56 = vadd.f32 %v1158_v48, %v1096_v50  ;;  %968 = vst [vmem:[%s1976_s2 + $0x90] sm:$0xff] %v1345_v51  ;;  %1000 = vst [vmem:[%s1976_s2 + $0x190] sm:$0xff] %v1731_v53  ;;  %v1101_v15 = vmul.f32 %v1345_v51, %v1345_v51 }
 0x104   :  { %v564_v58 = vpop.f32.mrf.mxu0  ;;  %v1740_v59 = vpop.f32.mrf.mxu1 }
 0x105   :  { %v1160_v61 = vadd.f32 %v1159_v56, %v1097_v54  ;;  %966 = vst [vmem:[%s1976_s2 + $0x80] sm:$0xff] %v564_v58  ;;  %v1028_v63 = vadd.f32 %v1342_v37, %v1027_v55  ;;  %998 = vst [vmem:[%s1976_s2 + $0x180] sm:$0xff] %v1740_v59  ;;  %v1099_v4 = vmul.f32 %v564_v58, %v564_v58 }
 0x106   :  { %v1346_v0 = vpop.f32.mrf.mxu0  ;;  %v1749_v1 = vpop.f32.mrf.mxu1 }
 0x107   :  { %v1029_v2 = vadd.f32 %v1028_v63, %v564_v58  ;;  %v1161_v5 = vadd.f32 %v1160_v61, %v1098_v60  ;;  %969 = vst [vmem:[%s1976_s2 + $0x98] sm:$0xff] %v1346_v0  ;;  %1001 = vst [vmem:[%s1976_s2 + $0x198] sm:$0xff] %v1749_v1  ;;  %v1102_v21 = vmul.f32 %v1346_v0, %v1346_v0 }
 0x108   :  { %v567_v6 = vpop.f32.mrf.mxu0  ;;  %v1758_v7 = vpop.f32.mrf.mxu1 }
 0x109   :  { %v1162_v9 = vadd.f32 %v1161_v5, %v1099_v4  ;;  %967 = vst [vmem:[%s1976_s2 + $0x88] sm:$0xff] %v567_v6  ;;  %v1030_v10 = vadd.f32 %v1029_v2, %v567_v6  ;;  %v1100_v11 = vmul.f32 %v567_v6, %v567_v6  ;;  %999 = vst [vmem:[%s1976_s2 + $0x188] sm:$0xff] %v1758_v7 }
 0x10a   :  { %v1349_v12 = vpop.f32.mrf.mxu0  ;;  %v1767_v14 = vpop.f32.mrf.mxu1 }
 0x10b   :  { %v1031_v16 = vadd.f32 %v1345_v51, %v1030_v10  ;;  %v1163_v17 = vadd.f32 %v1162_v9, %v1100_v11  ;;  %972 = vst [vmem:[%s1976_s2 + $0xb0] sm:$0xff] %v1349_v12  ;;  %1004 = vst [vmem:[%s1976_s2 + $0x1b0] sm:$0xff] %v1767_v14  ;;  %v1105_v40 = vmul.f32 %v1349_v12, %v1349_v12 }
 0x10c   :  { %v580_v19 = vpop.f32.mrf.mxu0  ;;  %v1776_v20 = vpop.f32.mrf.mxu1 }
 0x10d   :  { %v1164_v22 = vadd.f32 %v1163_v17, %v1101_v15  ;;  %970 = vst [vmem:[%s1976_s2 + $0xa0] sm:$0xff] %v580_v19  ;;  %v1032_v24 = vadd.f32 %v1346_v0, %v1031_v16  ;;  %1002 = vst [vmem:[%s1976_s2 + $0x1a0] sm:$0xff] %v1776_v20  ;;  %v1103_v29 = vmul.f32 %v580_v19, %v580_v19 }
 0x10e   :  { %v1350_v25 = vpop.f32.mrf.mxu0  ;;  %v1785_v26 = vpop.f32.mrf.mxu1 }
 0x10f   :  { %v1033_v27 = vadd.f32 %v1032_v24, %v580_v19  ;;  %v1165_v30 = vadd.f32 %v1164_v22, %v1102_v21  ;;  %973 = vst [vmem:[%s1976_s2 + $0xb8] sm:$0xff] %v1350_v25  ;;  %1005 = vst [vmem:[%s1976_s2 + $0x1b8] sm:$0xff] %v1785_v26  ;;  %v1106_v50 = vmul.f32 %v1350_v25, %v1350_v25 }
 0x110   :  { %v583_v31 = vpop.f32.mrf.mxu0  ;;  %v1794_v32 = vpop.f32.mrf.mxu1 }
 0x111   :  { %v1166_v34 = vadd.f32 %v1165_v30, %v1103_v29  ;;  %971 = vst [vmem:[%s1976_s2 + $0xa8] sm:$0xff] %v583_v31  ;;  %v1034_v35 = vadd.f32 %v1033_v27, %v583_v31  ;;  %v1104_v36 = vmul.f32 %v583_v31, %v583_v31  ;;  %1003 = vst [vmem:[%s1976_s2 + $0x1a8] sm:$0xff] %v1794_v32 }
 0x112   :  { %v1353_v37 = vpop.f32.mrf.mxu0  ;;  %v1803_v39 = vpop.f32.mrf.mxu1 }
 0x113   :  { %v1035_v42 = vadd.f32 %v1349_v12, %v1034_v35  ;;  %v1167_v44 = vadd.f32 %v1166_v34, %v1104_v36  ;;  %976 = vst [vmem:[%s1976_s2 + $0xd0] sm:$0xff] %v1353_v37  ;;  %1008 = vst [vmem:[%s1976_s2 + $0x1d0] sm:$0xff] %v1803_v39  ;;  %v1109_v10 = vmul.f32 %v1353_v37, %v1353_v37 }
 0x114   :  { %v596_v48 = vpop.f32.mrf.mxu0  ;;  %v1812_v49 = vpop.f32.mrf.mxu1 }
 0x115   :  { %v1168_v51 = vadd.f32 %v1167_v44, %v1105_v40  ;;  %974 = vst [vmem:[%s1976_s2 + $0xc0] sm:$0xff] %v596_v48  ;;  %v1036_v54 = vadd.f32 %v1350_v25, %v1035_v42  ;;  %1006 = vst [vmem:[%s1976_s2 + $0x1c0] sm:$0xff] %v1812_v49  ;;  %v1107_v60 = vmul.f32 %v596_v48, %v596_v48 }
 0x116   :  { %v1354_v55 = vpop.f32.mrf.mxu0  ;;  %v1821_v56 = vpop.f32.mrf.mxu1 }
 0x117   :  { %v1037_v58 = vadd.f32 %v1036_v54, %v596_v48  ;;  %v1169_v61 = vadd.f32 %v1168_v51, %v1106_v50  ;;  %977 = vst [vmem:[%s1976_s2 + $0xd8] sm:$0xff] %v1354_v55  ;;  %1009 = vst [vmem:[%s1976_s2 + $0x1d8] sm:$0xff] %v1821_v56  ;;  %v1110_v17 = vmul.f32 %v1354_v55, %v1354_v55 }
 0x118   :  { %v599_v63 = vpop.f32.mrf.mxu0  ;;  %v1830_v0 = vpop.f32.mrf.mxu1  ;;  %v1115_v51 = vmul.f32 %v1596_v43, %v1596_v43 }
 0x119   :  { %v1170_v2 = vadd.f32 %v1169_v61, %v1107_v60  ;;  %975 = vst [vmem:[%s1976_s2 + $0xc8] sm:$0xff] %v599_v63  ;;  %v1038_v4 = vadd.f32 %v1037_v58, %v599_v63  ;;  %v1108_v5 = vmul.f32 %v599_v63, %v599_v63  ;;  %1007 = vst [vmem:[%s1976_s2 + $0x1c8] sm:$0xff] %v1830_v0 }
 0x11a   :  { %v1357_v6 = vpop.f32.mrf.mxu0  ;;  %v1839_v9 = vpop.f32.mrf.mxu1  ;;  %v1116_v60 = vmul.f32 %v1614_v47, %v1614_v47  ;;  %v1117_v63 = vmul.f32 %v1587_v41, %v1587_v41 }
 0x11b   :  { %v1039_v11 = vadd.f32 %v1353_v37, %v1038_v4  ;;  %v1171_v12 = vadd.f32 %v1170_v2, %v1108_v5  ;;  %980 = vst [vmem:[%s1976_s2 + $0xf0] sm:$0xff] %v1357_v6  ;;  %1012 = vst [vmem:[%s1976_s2 + $0x1f0] sm:$0xff] %v1839_v9  ;;  %v1113_v37 = vmul.f32 %v1357_v6, %v1357_v6 }
 0x11c   :  { %v612_v15 = vpop.f32.mrf.mxu0  ;;  %v1848_v16 = vpop.f32.mrf.mxu1  ;;  %v1118_v5 = vmul.f32 %v1605_v45, %v1605_v45 }
 0x11d   :  { %v1172_v19 = vadd.f32 %v1171_v12, %v1109_v10  ;;  %978 = vst [vmem:[%s1976_s2 + $0xe0] sm:$0xff] %v612_v15  ;;  %v1040_v21 = vadd.f32 %v1354_v55, %v1039_v11  ;;  %1010 = vst [vmem:[%s1976_s2 + $0x1e0] sm:$0xff] %v1848_v16  ;;  %v1111_v27 = vmul.f32 %v612_v15, %v612_v15 }
 0x11e   :  { %v1358_v22 = vpop.f32.mrf.mxu0  ;;  %v1857_v24 = vpop.f32.mrf.mxu1  ;;  %v1119_v11 = vmul.f32 %v1632_v57, %v1632_v57 }
 0x11f   :  { %v1041_v25 = vadd.f32 %v1040_v21, %v612_v15  ;;  %v1173_v29 = vadd.f32 %v1172_v19, %v1110_v17  ;;  %981 = vst [vmem:[%s1976_s2 + $0xf8] sm:$0xff] %v1358_v22  ;;  %1013 = vst [vmem:[%s1976_s2 + $0x1f8] sm:$0xff] %v1857_v24  ;;  %v1114_v44 = vmul.f32 %v1358_v22, %v1358_v22 }
 0x120   :  { %v615_v30 = vpop.f32.mrf.mxu0  ;;  %v1866_v31 = vpop.f32.mrf.mxu1  ;;  %v1120_v17 = vmul.f32 %v1650_v3, %v1650_v3 }
 0x121   :  { %v1174_v34 = vadd.f32 %v1173_v29, %v1111_v27  ;;  %979 = vst [vmem:[%s1976_s2 + $0xe8] sm:$0xff] %v615_v30  ;;  %v1042_v35 = vadd.f32 %v1041_v25, %v615_v30  ;;  %v1112_v36 = vmul.f32 %v615_v30, %v615_v30  ;;  %1011 = vst [vmem:[%s1976_s2 + $0x1e8] sm:$0xff] %v1866_v31 }
 0x122   :  { %v1123_v27 = vmul.f32 %v1668_v13, %v1668_v13 }
 0x123   :  { %v1043_v40 = vadd.f32 %v1357_v6, %v1042_v35  ;;  %v1175_v42 = vadd.f32 %v1174_v34, %v1112_v36  ;;  %v1124_v34 = vmul.f32 %v1686_v23, %v1686_v23 }
 0x125   :  { %v1044_v48 = vadd.f32 %v1358_v22, %v1043_v40  ;;  %v1176_v50 = vadd.f32 %v1175_v42, %v1113_v37  ;;  %v1127_v42 = vmul.f32 %v1704_v33, %v1704_v33 }
 0x127   :  { %v1177_v54 = vadd.f32 %v1176_v50, %v1114_v44  ;;  %v1045_v55 = vadd.f32 %v1044_v48, %v1596_v43  ;;  %v1128_v50 = vmul.f32 %v1722_v46, %v1722_v46 }
 0x129   :  { %v1046_v58 = vadd.f32 %v1045_v55, %v1614_v47  ;;  %v1178_v61 = vadd.f32 %v1177_v54, %v1115_v51 }
 0x12b   :  { %v1047_v2 = vadd.f32 %v1587_v41, %v1046_v58  ;;  %v1179_v4 = vadd.f32 %v1178_v61, %v1116_v60  ;;  %v1121_v41 = vmul.f32 %v1623_v52, %v1623_v52  ;;  %v1131_v60 = vmul.f32 %v1740_v59, %v1740_v59 }
 0x12d   :  { %v1180_v6 = vadd.f32 %v1179_v4, %v1117_v63  ;;  %v1048_v10 = vadd.f32 %v1605_v45, %v1047_v2  ;;  %v1122_v45 = vmul.f32 %v1641_v62, %v1641_v62  ;;  %v1132_v2 = vmul.f32 %v1758_v7, %v1758_v7 }
 0x12f   :  { %v1049_v43 = vadd.f32 %v1048_v10, %v1632_v57  ;;  %v1181_v12 = vadd.f32 %v1180_v6, %v1118_v5 }
 0x131   :  { %v1182_v47 = vadd.f32 %v1181_v12, %v1119_v11  ;;  %v1050_v15 = vadd.f32 %v1049_v43, %v1650_v3  ;;  %v1135_v43 = vmul.f32 %v1776_v20, %v1776_v20 }
 0x133   :  { %v1051_v19 = vadd.f32 %v1623_v52, %v1050_v15  ;;  %v1183_v21 = vadd.f32 %v1182_v47, %v1120_v17  ;;  %v1125_v52 = vmul.f32 %v1659_v8, %v1659_v8  ;;  %v1136_v47 = vmul.f32 %v1794_v32, %v1794_v32 }
 0x135   :  { %v1184_v22 = vadd.f32 %v1183_v21, %v1121_v41  ;;  %v1052_v25 = vadd.f32 %v1641_v62, %v1051_v19  ;;  %v1126_v62 = vmul.f32 %v1677_v18, %v1677_v18  ;;  %v1139_v21 = vmul.f32 %v1812_v49, %v1812_v49 }
 0x137   :  { %v1053_v57 = vadd.f32 %v1052_v25, %v1668_v13  ;;  %v1185_v29 = vadd.f32 %v1184_v22, %v1122_v45  ;;  %v1140_v25 = vmul.f32 %v1830_v0, %v1830_v0 }
 0x139   :  { %v1186_v30 = vadd.f32 %v1185_v29, %v1123_v27  ;;  %v1054_v3 = vadd.f32 %v1053_v57, %v1686_v23 }
 0x13b   :  { %v1055_v35 = vadd.f32 %v1659_v8, %v1054_v3  ;;  %v1187_v36 = vadd.f32 %v1186_v30, %v1124_v34  ;;  %v1129_v8 = vmul.f32 %v1695_v28, %v1695_v28  ;;  %v1143_v3 = vmul.f32 %v1848_v16, %v1848_v16 }
 0x13d   :  { %v1188_v37 = vadd.f32 %v1187_v36, %v1125_v52  ;;  %v1056_v40 = vadd.f32 %v1677_v18, %v1055_v35  ;;  %v1130_v18 = vmul.f32 %v1713_v38, %v1713_v38  ;;  %v1144_v35 = vmul.f32 %v1866_v31, %v1866_v31 }
 0x13f   :  { %v1057_v13 = vadd.f32 %v1056_v40, %v1704_v33  ;;  %v1189_v44 = vadd.f32 %v1188_v37, %v1126_v62 }
 0x141   :  { %v1190_v48 = vadd.f32 %v1189_v44, %v1127_v42  ;;  %v1058_v23 = vadd.f32 %v1057_v13, %v1722_v46 }
 0x143   :  { %v1059_v51 = vadd.f32 %v1695_v28, %v1058_v23  ;;  %v1191_v54 = vadd.f32 %v1190_v48, %v1128_v50  ;;  %v1133_v28 = vmul.f32 %v1731_v53, %v1731_v53  ;;  %v1216_v48 = vlaneseq }
 0x145   :  { %v1192_v55 = vadd.f32 %v1191_v54, %v1129_v8  ;;  %v1060_v58 = vadd.f32 %v1713_v38, %v1059_v51  ;;  %v1134_v38 = vmul.f32 %v1749_v1, %v1749_v1  ;;  %v1217_v51 = vshrl.u32 %v1216_v48, 7 }
 0x147   :  { %v1061_v33 = vadd.f32 %v1060_v58, %v1740_v59  ;;  %v1193_v61 = vadd.f32 %v1192_v55, %v1130_v18  ;;  %vm1219_vm0 = vcmp.eq.s32.totalorder %v1217_v51, 1  ;;  %vm1218_vm1 = vcmp.eq.s32.totalorder %v1217_v51, 0 }
 0x149   :  { %v1194_v63 = vadd.f32 %v1193_v61, %v1131_v60  ;;  %v1062_v46 = vadd.f32 %v1061_v33, %v1758_v7 }
 0x14b   :  { %v1063_v4 = vadd.f32 %v1731_v53, %v1062_v46  ;;  %v1195_v5 = vadd.f32 %v1194_v63, %v1132_v2  ;;  %v1137_v53 = vmul.f32 %v1767_v14, %v1767_v14 }
 0x14d   :  { %v1196_v6 = vadd.f32 %v1195_v5, %v1133_v28  ;;  %v1064_v10 = vadd.f32 %v1749_v1, %v1063_v4  ;;  %v1138_v1 = vmul.f32 %v1785_v26, %v1785_v26 }
 0x14f   :  { %v1065_v59 = vadd.f32 %v1064_v10, %v1776_v20  ;;  %v1197_v11 = vadd.f32 %v1196_v6, %v1134_v38 }
 0x151   :  { %v1198_v12 = vadd.f32 %v1197_v11, %v1135_v43  ;;  %v1066_v7 = vadd.f32 %v1065_v59, %v1794_v32 }
 0x153   :  { %v1067_v15 = vadd.f32 %v1767_v14, %v1066_v7  ;;  %v1199_v17 = vadd.f32 %v1198_v12, %v1136_v47  ;;  %v1141_v14 = vmul.f32 %v1803_v39, %v1803_v39 }
 0x155   :  { %v1200_v41 = vadd.f32 %v1199_v17, %v1137_v53  ;;  %v1068_v19 = vadd.f32 %v1785_v26, %v1067_v15  ;;  %v1142_v26 = vmul.f32 %v1821_v56, %v1821_v56 }
 0x157   :  { %v1069_v20 = vadd.f32 %v1068_v19, %v1812_v49  ;;  %v1201_v45 = vadd.f32 %v1200_v41, %v1138_v1 }
 0x159   :  { %v1202_v22 = vadd.f32 %v1201_v45, %v1139_v21  ;;  %v1070_v32 = vadd.f32 %v1069_v20, %v1830_v0 }
 0x15b   :  { %v1071_v57 = vadd.f32 %v1803_v39, %v1070_v32  ;;  %v1203_v27 = vadd.f32 %v1202_v22, %v1140_v25  ;;  %v1145_v39 = vmul.f32 %v1839_v9, %v1839_v9 }
 0x15d   :  { %v1204_v29 = vadd.f32 %v1203_v27, %v1141_v14  ;;  %v1072_v30 = vadd.f32 %v1821_v56, %v1071_v57  ;;  %v1146_v56 = vmul.f32 %v1857_v24, %v1857_v24 }
 0x15f   :  { %v1073_v49 = vadd.f32 %v1072_v30, %v1848_v16  ;;  %v1205_v34 = vadd.f32 %v1204_v29, %v1142_v26 }
 0x161   :  { %v1206_v52 = vadd.f32 %v1205_v34, %v1143_v3  ;;  %v1074_v0 = vadd.f32 %v1073_v49, %v1866_v31 }
 0x163   :  { %v1075_v36 = vadd.f32 %v1839_v9, %v1074_v0  ;;  %v1207_v62 = vadd.f32 %v1206_v52, %v1144_v35 }
 0x165   :  { %v1076_v37 = vadd.f32 %v1857_v24, %v1075_v36  ;;  %v1208_v40 = vadd.f32 %v1207_v62, %v1145_v39 }
 0x167   :  { %v1077_v16 = vrot.slane %v1076_v37, 4  ;;  %v1209_v13 = vadd.f32 %v1208_v40, %v1146_v56 }
 0x169   :  { %v1078_v42 = vadd.f32 %v1077_v16, %v1076_v37  ;;  %v1210_v44 = vrot.slane %v1209_v13, 4 }
 0x16b   :  { %v1079_v23 = vrot.slane %v1078_v42, 2  ;;  %v1211_v50 = vadd.f32 %v1210_v44, %v1209_v13 }
 0x16d   :  { %v1080_v31 = vadd.f32 %v1079_v23, %v1078_v42  ;;  %v1212_v8 = vrot.slane %v1211_v50, 2 }
 0x16f   :  { %v1213_v54 = vadd.f32 %v1212_v8, %v1211_v50  ;;  %v1081_v18 = vrot.slane %v1080_v31, 1 }
 0x171   :  { %v1214_v9 = vrot.slane %v1213_v54, 1  ;;  %v1082_v58 = vadd.f32 %v1081_v18, %v1080_v31 }
 0x173   :  { %v1215_v55 = vadd.f32 %v1214_v9, %v1213_v54 }
 0x175   :  { %v1220_v33 = vsel %vm1219_vm0, %v1215_v55, 0.0 }
 0x176   :  { %v1221_v24 = vsel %vm1218_vm1, %v1082_v58, %v1220_v33 }
 0x177   :  { %1222 = vst [vmem:[%s1977_s3] sm:$0xff] %v1221_v24 }

// kernel: discriminator_forward.10
= control target key start
LH: loop header
LB: loop body
LE: loop exit
PB: predicated region body
PF: predicated region fallthrough
CT: control target
= control target key end

     0   :  { %s1503_s0 = inlined_call_operand.vmem [shape: f32[512,128], index: 0, kind: input, shape index: {}]   ;;  %s1504_s1 = inlined_call_operand.vmem [shape: f32[1,128], index: 1, kind: input, shape index: {}]   ;;  %s1505_s2 = inlined_call_operand.vmem [shape: f32[1,128], index: 2, kind: input, shape index: {}]   ;;  %s1506_s3 = inlined_call_operand.vmem [shape: bf16[512,128], index: 3, kind: output, shape index: {}]  }
   0x1   :  { %v14_v0 = vld [vmem:[%s1503_s0] sm:$0xff]  ;;  %v15_v1 = vld [vmem:[%s1503_s0 + $0x8] sm:$0xff]  ;;  %v16_v6 = vld [vmem:[%s1503_s0 + $0x10] sm:$0xff] }
   0x2   :  { %v1086_v2 = vld [vmem:[%s1504_s1] ss:$0 sm:$0xff]  ;;  %v17_v7 = vld [vmem:[%s1503_s0 + $0x18] sm:$0xff]  ;;  %v19_v11 = vld [vmem:[%s1503_s0 + $0x28] sm:$0xff] }
   0x3   :  { %v85_v3 = vmul.f32 %v1086_v2, %v14_v0  ;;  %v86_v4 = vmul.f32 %v1086_v2, %v15_v1  ;;  %v1093_v5 = vld [vmem:[%s1505_s2] ss:$0 sm:$0xff]  ;;  %v87_v8 = vmul.f32 %v1086_v2, %v16_v6  ;;  %v88_v9 = vmul.f32 %v1086_v2, %v17_v7  ;;  %v20_v12 = vld [vmem:[%s1503_s0 + $0x30] sm:$0xff]  ;;  %v21_v17 = vld [vmem:[%s1503_s0 + $0x38] sm:$0xff] }
   0x4   :  { %v18_v10 = vld [vmem:[%s1503_s0 + $0x20] sm:$0xff]  ;;  %v90_v16 = vmul.f32 %v1086_v2, %v19_v11  ;;  %v91_v20 = vmul.f32 %v1086_v2, %v20_v12  ;;  %v92_v21 = vmul.f32 %v1086_v2, %v21_v17  ;;  %v23_v35 = vld [vmem:[%s1503_s0 + $0x48] sm:$0xff]  ;;  %v24_v36 = vld [vmem:[%s1503_s0 + $0x50] sm:$0xff] }
   0x5   :  { %v156_v13 = vadd.f32 %v1093_v5, %v85_v3  ;;  %v157_v14 = vadd.f32 %v1093_v5, %v86_v4  ;;  %v89_v15 = vmul.f32 %v1086_v2, %v18_v10  ;;  %v158_v18 = vadd.f32 %v1093_v5, %v87_v8  ;;  %v22_v34 = vld [vmem:[%s1503_s0 + $0x40] sm:$0xff]  ;;  %v25_v42 = vld [vmem:[%s1503_s0 + $0x58] sm:$0xff]  ;;  %v27_v48 = vld [vmem:[%s1503_s0 + $0x68] sm:$0xff] }
   0x6   :  { %v159_v19 = vadd.f32 %v1093_v5, %v88_v9  ;;  %v161_v29 = vadd.f32 %v1093_v5, %v90_v16  ;;  %v162_v33 = vadd.f32 %v1093_v5, %v91_v20  ;;  %v163_v40 = vadd.f32 %v1093_v5, %v92_v21  ;;  %v26_v47 = vld [vmem:[%s1503_s0 + $0x60] sm:$0xff]  ;;  %v28_v60 = vld [vmem:[%s1503_s0 + $0x70] sm:$0xff]  ;;  %v29_v7 = vld [vmem:[%s1503_s0 + $0x78] sm:$0xff] }
   0x7   :  { %vm220_vm0 = vcmp.gt.f32.partialorder %v156_v13, 0.0  ;;  %vm221_vm1 = vcmp.gt.f32.partialorder %v157_v14, 0.0  ;;  %v284_v22 = vmul.f32 0.2, %v156_v13  ;;  %v285_v23 = vmul.f32 0.2, %v157_v14 }
   0x8   :  { %vm222_vm2 = vcmp.gt.f32.partialorder %v158_v18, 0.0  ;;  %vm223_vm3 = vcmp.gt.f32.partialorder %v159_v19, 0.0  ;;  %v286_v24 = vmul.f32 0.2, %v158_v18  ;;  %v287_v25 = vmul.f32 0.2, %v159_v19 }
   0x9   :  { %v348_v26 = vsel %vm220_vm0, %v156_v13, %v284_v22  ;;  %v349_v27 = vsel %vm221_vm1, %v157_v14, %v285_v23  ;;  %v160_v28 = vadd.f32 %v1093_v5, %v89_v15  ;;  %vm225_vm5 = vcmp.gt.f32.partialorder %v161_v29, 0.0  ;;  %v30_v12 = vld [vmem:[%s1503_s0 + $0x80] sm:$0xff]  ;;  %v31_v13 = vld [vmem:[%s1503_s0 + $0x88] sm:$0xff]  ;;  %v32_v20 = vld [vmem:[%s1503_s0 + $0x90] sm:$0xff] }
   0xa   :  { %v869_v30 = vpack.c.bf16 %v349_v27, %v348_v26  ;;  %v350_v31 = vsel %vm222_vm2, %v158_v18, %v286_v24  ;;  %v351_v32 = vsel %vm223_vm3, %v159_v19, %v287_v25  ;;  %v289_v39 = vmul.f32 0.2, %v161_v29  ;;  %v33_v25 = vld [vmem:[%s1503_s0 + $0x98] sm:$0xff] }
   0xb   :  { %v874_v37 = vpack.c.bf16 %v351_v32, %v350_v31  ;;  %vm224_vm4 = vcmp.gt.f32.partialorder %v160_v28, 0.0  ;;  %v288_v38 = vmul.f32 0.2, %v160_v28  ;;  %vm226_vm6 = vcmp.gt.f32.partialorder %v162_v33, 0.0 }
   0xc   :  { %870 = vst [vmem:[%s1506_s3] sm:$0xff] %v869_v30   ;;  %v290_v41 = vmul.f32 0.2, %v162_v33  ;;  %v93_v44 = vmul.f32 %v1086_v2, %v22_v34  ;;  %v94_v45 = vmul.f32 %v1086_v2, %v23_v35  ;;  %v95_v46 = vmul.f32 %v1086_v2, %v24_v36 }
   0xd   :  { %1026 = vst [vmem:[%s1506_s3 + $0x8] sm:$0xff] %v874_v37   ;;  %v352_v43 = vsel %vm224_vm4, %v160_v28, %v288_v38  ;;  %v353_v49 = vsel %vm225_vm5, %v161_v29, %v289_v39  ;;  %vm227_vm7 = vcmp.gt.f32.partialorder %v163_v40, 0.0  ;;  %v291_v50 = vmul.f32 0.2, %v163_v40  ;;  %v35_v37 = vld [vmem:[%s1503_s0 + $0xa8] sm:$0xff] }
   0xe   :  { %v354_v51 = vsel %vm226_vm6, %v162_v33, %v290_v41  ;;  %v879_v52 = vpack.c.bf16 %v353_v49, %v352_v43  ;;  %v164_v53 = vadd.f32 %v1093_v5, %v93_v44  ;;  %v165_v54 = vadd.f32 %v1093_v5, %v94_v45  ;;  %v34_v33 = vld [vmem:[%s1503_s0 + $0xa0] sm:$0xff]  ;;  %v36_v44 = vld [vmem:[%s1503_s0 + $0xb0] sm:$0xff]  ;;  %v37_v49 = vld [vmem:[%s1503_s0 + $0xb8] sm:$0xff] }
   0xf   :  { %v96_v55 = vmul.f32 %v1086_v2, %v25_v42  ;;  %v355_v56 = vsel %vm227_vm7, %v163_v40, %v291_v50  ;;  %v166_v57 = vadd.f32 %v1093_v5, %v95_v46  ;;  %v97_v58 = vmul.f32 %v1086_v2, %v26_v47  ;;  %v38_v50 = vld [vmem:[%s1503_s0 + $0xc0] sm:$0xff] }
  0x10   :  { %v98_v59 = vmul.f32 %v1086_v2, %v27_v48  ;;  %1027 = vst [vmem:[%s1506_s3 + $0x10] sm:$0xff] %v879_v52   ;;  %v884_v61 = vpack.c.bf16 %v355_v56, %v354_v51  ;;  %vm228_vm8 = vcmp.gt.f32.partialorder %v164_v53, 0.0  ;;  %vm229_vm9 = vcmp.gt.f32.partialorder %v165_v54, 0.0  ;;  %v39_v51 = vld [vmem:[%s1503_s0 + $0xc8] sm:$0xff] }
  0x11   :  { %v292_v62 = vmul.f32 0.2, %v164_v53  ;;  %v293_v63 = vmul.f32 0.2, %v165_v54  ;;  %v167_v0 = vadd.f32 %v1093_v5, %v96_v55  ;;  %vm230_vm10 = vcmp.gt.f32.partialorder %v166_v57, 0.0 }
  0x12   :  { %v294_v1 = vmul.f32 0.2, %v166_v57  ;;  %1028 = vst [vmem:[%s1506_s3 + $0x18] sm:$0xff] %v884_v61   ;;  %v168_v4 = vadd.f32 %v1093_v5, %v97_v58  ;;  %v169_v6 = vadd.f32 %v1093_v5, %v98_v59  ;;  %v99_v8 = vmul.f32 %v1086_v2, %v28_v60 }
  0x13   :  { %v356_v3 = vsel %vm228_vm8, %v164_v53, %v292_v62  ;;  %v357_v9 = vsel %vm229_vm9, %v165_v54, %v293_v63  ;;  %vm231_vm11 = vcmp.gt.f32.partialorder %v167_v0, 0.0  ;;  %v295_v10 = vmul.f32 0.2, %v167_v0  ;;  %v40_v62 = vld [vmem:[%s1503_s0 + $0xd0] sm:$0xff] }
  0x14   :  { %v358_v11 = vsel %vm230_vm10, %v166_v57, %v294_v1  ;;  %v889_v14 = vpack.c.bf16 %v357_v9, %v356_v3  ;;  %vm232_vm12 = vcmp.gt.f32.partialorder %v168_v4, 0.0  ;;  %vm233_vm13 = vcmp.gt.f32.partialorder %v169_v6, 0.0 }
  0x15   :  { %v296_v15 = vmul.f32 0.2, %v168_v4  ;;  %v359_v16 = vsel %vm231_vm11, %v167_v0, %v295_v10  ;;  %v297_v17 = vmul.f32 0.2, %v169_v6  ;;  %v100_v18 = vmul.f32 %v1086_v2, %v29_v7  ;;  %v41_v10 = vld [vmem:[%s1503_s0 + $0xd8] sm:$0xff] }
  0x16   :  { %v170_v19 = vadd.f32 %v1093_v5, %v99_v8  ;;  %1029 = vst [vmem:[%s1506_s3 + $0x20] sm:$0xff] %v889_v14   ;;  %v894_v21 = vpack.c.bf16 %v359_v16, %v358_v11  ;;  %v101_v23 = vmul.f32 %v1086_v2, %v30_v12  ;;  %v102_v24 = vmul.f32 %v1086_v2, %v31_v13  ;;  %v42_v14 = vld [vmem:[%s1503_s0 + $0xe0] sm:$0xff] }
  0x17   :  { %v360_v22 = vsel %vm232_vm12, %v168_v4, %v296_v15  ;;  %v361_v26 = vsel %vm233_vm13, %v169_v6, %v297_v17  ;;  %v171_v27 = vadd.f32 %v1093_v5, %v100_v18  ;;  %v103_v32 = vmul.f32 %v1086_v2, %v32_v20  ;;  %v43_v15 = vld [vmem:[%s1503_s0 + $0xe8] sm:$0xff] }
  0x18   :  { %vm234_vm14 = vcmp.gt.f32.partialorder %v170_v19, 0.0  ;;  %v298_v28 = vmul.f32 0.2, %v170_v19  ;;  %1030 = vst [vmem:[%s1506_s3 + $0x28] sm:$0xff] %v894_v21   ;;  %v899_v29 = vpack.c.bf16 %v361_v26, %v360_v22  ;;  %v172_v30 = vadd.f32 %v1093_v5, %v101_v23  ;;  %v44_v26 = vld [vmem:[%s1503_s0 + $0xf0] sm:$0xff] }
  0x19   :  { %v173_v31 = vadd.f32 %v1093_v5, %v102_v24  ;;  %vm235_vm15 = vcmp.gt.f32.partialorder %v171_v27, 0.0  ;;  %v299_v34 = vmul.f32 0.2, %v171_v27  ;;  %v104_v36 = vmul.f32 %v1086_v2, %v33_v25 }
  0x1a   :  { %v362_v35 = vsel %vm234_vm14, %v170_v19, %v298_v28  ;;  %1031 = vst [vmem:[%s1506_s3 + $0x30] sm:$0xff] %v899_v29   ;;  %vm236_vm0 = vcmp.gt.f32.partialorder %v172_v30, 0.0  ;;  %v300_v38 = vmul.f32 0.2, %v172_v30  ;;  %v174_v41 = vadd.f32 %v1093_v5, %v103_v32 }
  0x1b   :  { %vm237_vm1 = vcmp.gt.f32.partialorder %v173_v31, 0.0  ;;  %v301_v39 = vmul.f32 0.2, %v173_v31  ;;  %v363_v40 = vsel %vm235_vm15, %v171_v27, %v299_v34  ;;  %v175_v42 = vadd.f32 %v1093_v5, %v104_v36 }
  0x1c   :  { %v105_v43 = vmul.f32 %v1086_v2, %v34_v33  ;;  %v904_v45 = vpack.c.bf16 %v363_v40, %v362_v35  ;;  %v364_v46 = vsel %vm236_vm0, %v172_v30, %v300_v38  ;;  %v106_v48 = vmul.f32 %v1086_v2, %v35_v37  ;;  %v46_v38 = vld [vmem:[%s1503_s0 + $0x100] sm:$0xff] }
  0x1d   :  { %v365_v47 = vsel %vm237_vm1, %v173_v31, %v301_v39  ;;  %vm238_vm2 = vcmp.gt.f32.partialorder %v174_v41, 0.0  ;;  %vm239_vm3 = vcmp.gt.f32.partialorder %v175_v42, 0.0  ;;  %v302_v53 = vmul.f32 0.2, %v174_v41  ;;  %v45_v31 = vld [vmem:[%s1503_s0 + $0xf8] sm:$0xff] }
  0x1e   :  { %v909_v52 = vpack.c.bf16 %v365_v47, %v364_v46  ;;  %1032 = vst [vmem:[%s1506_s3 + $0x38] sm:$0xff] %v904_v45   ;;  %v303_v54 = vmul.f32 0.2, %v175_v42  ;;  %v176_v55 = vadd.f32 %v1093_v5, %v105_v43  ;;  %v177_v56 = vadd.f32 %v1093_v5, %v106_v48 }
  0x1f   :  { %v107_v57 = vmul.f32 %v1086_v2, %v36_v44  ;;  %v366_v58 = vsel %vm238_vm2, %v174_v41, %v302_v53  ;;  %v108_v59 = vmul.f32 %v1086_v2, %v37_v49  ;;  %v109_v60 = vmul.f32 %v1086_v2, %v38_v50  ;;  %v48_v50 = vld [vmem:[%s1503_s0 + $0x110] sm:$0xff] }
  0x20   :  { %1033 = vst [vmem:[%s1506_s3 + $0x40] sm:$0xff] %v909_v52   ;;  %v110_v61 = vmul.f32 %v1086_v2, %v39_v51  ;;  %v367_v63 = vsel %vm239_vm3, %v175_v42, %v303_v54  ;;  %vm240_vm4 = vcmp.gt.f32.partialorder %v176_v55, 0.0  ;;  %vm241_vm5 = vcmp.gt.f32.partialorder %v177_v56, 0.0  ;;  %v47_v42 = vld [vmem:[%s1503_s0 + $0x108] sm:$0xff]  ;;  %v49_v51 = vld [vmem:[%s1503_s0 + $0x118] sm:$0xff] }
  0x21   :  { %v304_v0 = vmul.f32 0.2, %v176_v55  ;;  %v914_v1 = vpack.c.bf16 %v367_v63, %v366_v58  ;;  %v305_v3 = vmul.f32 0.2, %v177_v56  ;;  %v178_v4 = vadd.f32 %v1093_v5, %v107_v57  ;;  %v51_v63 = vld [vmem:[%s1503_s0 + $0x128] sm:$0xff] }
  0x22   :  { %v179_v6 = vadd.f32 %v1093_v5, %v108_v59  ;;  %v180_v8 = vadd.f32 %v1093_v5, %v109_v60  ;;  %v181_v9 = vadd.f32 %v1093_v5, %v110_v61  ;;  %v111_v11 = vmul.f32 %v1086_v2, %v40_v62 }
  0x23   :  { %v368_v7 = vsel %vm240_vm4, %v176_v55, %v304_v0  ;;  %1034 = vst [vmem:[%s1506_s3 + $0x48] sm:$0xff] %v914_v1   ;;  %v369_v12 = vsel %vm241_vm5, %v177_v56, %v305_v3  ;;  %vm242_vm6 = vcmp.gt.f32.partialorder %v178_v4, 0.0  ;;  %v306_v13 = vmul.f32 0.2, %v178_v4  ;;  %v50_v55 = vld [vmem:[%s1503_s0 + $0x120] sm:$0xff] }
  0x24   :  { %vm243_vm7 = vcmp.gt.f32.partialorder %v179_v6, 0.0  ;;  %v919_v16 = vpack.c.bf16 %v369_v12, %v368_v7  ;;  %v307_v17 = vmul.f32 0.2, %v179_v6  ;;  %vm244_vm8 = vcmp.gt.f32.partialorder %v180_v8, 0.0 }
  0x25   :  { %vm245_vm9 = vcmp.gt.f32.partialorder %v181_v9, 0.0  ;;  %v370_v18 = vsel %vm242_vm6, %v178_v4, %v306_v13  ;;  %v308_v19 = vmul.f32 0.2, %v180_v8  ;;  %v309_v20 = vmul.f32 0.2, %v181_v9  ;;  %v52_v4 = vld [vmem:[%s1503_s0 + $0x130] sm:$0xff] }
  0x26   :  { %v112_v21 = vmul.f32 %v1086_v2, %v41_v10  ;;  %1035 = vst [vmem:[%s1506_s3 + $0x50] sm:$0xff] %v919_v16   ;;  %v371_v22 = vsel %vm243_vm7, %v179_v6, %v307_v17  ;;  %v182_v23 = vadd.f32 %v1093_v5, %v111_v11  ;;  %v113_v24 = vmul.f32 %v1086_v2, %v42_v14  ;;  %v53_v13 = vld [vmem:[%s1503_s0 + $0x138] sm:$0xff] }
  0x27   :  { %v114_v25 = vmul.f32 %v1086_v2, %v43_v15  ;;  %v924_v27 = vpack.c.bf16 %v371_v22, %v370_v18  ;;  %v372_v28 = vsel %vm244_vm8, %v180_v8, %v308_v19  ;;  %v373_v29 = vsel %vm245_vm9, %v181_v9, %v309_v20  ;;  %v54_v20 = vld [vmem:[%s1503_s0 + $0x140] sm:$0xff] }
  0x28   :  { %v183_v30 = vadd.f32 %v1093_v5, %v112_v21  ;;  %v929_v32 = vpack.c.bf16 %v373_v29, %v372_v28  ;;  %vm246_vm10 = vcmp.gt.f32.partialorder %v182_v23, 0.0  ;;  %v310_v33 = vmul.f32 0.2, %v182_v23 }
  0x29   :  { %v184_v34 = vadd.f32 %v1093_v5, %v113_v24  ;;  %1036 = vst [vmem:[%s1506_s3 + $0x58] sm:$0xff] %v924_v27   ;;  %v185_v36 = vadd.f32 %v1093_v5, %v114_v25  ;;  %v115_v37 = vmul.f32 %v1086_v2, %v44_v26  ;;  %v116_v41 = vmul.f32 %v1086_v2, %v45_v31  ;;  %v55_v24 = vld [vmem:[%s1503_s0 + $0x148] sm:$0xff] }
  0x2a   :  { %vm247_vm11 = vcmp.gt.f32.partialorder %v183_v30, 0.0  ;;  %v311_v35 = vmul.f32 0.2, %v183_v30  ;;  %1037 = vst [vmem:[%s1506_s3 + $0x60] sm:$0xff] %v929_v32   ;;  %v374_v39 = vsel %vm246_vm10, %v182_v23, %v310_v33  ;;  %v117_v49 = vmul.f32 %v1086_v2, %v46_v38  ;;  %v56_v32 = vld [vmem:[%s1503_s0 + $0x150] sm:$0xff]  ;;  %v57_v33 = vld [vmem:[%s1503_s0 + $0x158] sm:$0xff] }
  0x2b   :  { %vm248_vm12 = vcmp.gt.f32.partialorder %v184_v34, 0.0  ;;  %v312_v40 = vmul.f32 0.2, %v184_v34  ;;  %vm249_vm13 = vcmp.gt.f32.partialorder %v185_v36, 0.0  ;;  %v313_v44 = vmul.f32 0.2, %v185_v36 }
  0x2c   :  { %v375_v43 = vsel %vm247_vm11, %v183_v30, %v311_v35  ;;  %v186_v45 = vadd.f32 %v1093_v5, %v115_v37  ;;  %v187_v48 = vadd.f32 %v1093_v5, %v116_v41  ;;  %v118_v54 = vmul.f32 %v1086_v2, %v47_v42  ;;  %v58_v37 = vld [vmem:[%s1503_s0 + $0x160] sm:$0xff] }
  0x2d   :  { %v934_v46 = vpack.c.bf16 %v375_v43, %v374_v39  ;;  %v376_v47 = vsel %vm248_vm12, %v184_v34, %v312_v40  ;;  %v377_v52 = vsel %vm249_vm13, %v185_v36, %v313_v44  ;;  %v188_v58 = vadd.f32 %v1093_v5, %v117_v49  ;;  %v60_v49 = vld [vmem:[%s1503_s0 + $0x170] sm:$0xff] }
  0x2e   :  { %vm250_vm14 = vcmp.gt.f32.partialorder %v186_v45, 0.0  ;;  %v314_v53 = vmul.f32 0.2, %v186_v45  ;;  %v939_v56 = vpack.c.bf16 %v377_v52, %v376_v47  ;;  %vm251_vm15 = vcmp.gt.f32.partialorder %v187_v48, 0.0 }
  0x2f   :  { %1038 = vst [vmem:[%s1506_s3 + $0x68] sm:$0xff] %v934_v46   ;;  %v315_v57 = vmul.f32 0.2, %v187_v48  ;;  %v189_v60 = vadd.f32 %v1093_v5, %v118_v54  ;;  %v119_v61 = vmul.f32 %v1086_v2, %v48_v50  ;;  %v120_v62 = vmul.f32 %v1086_v2, %v49_v51 }
  0x30   :  { %v378_v59 = vsel %vm250_vm14, %v186_v45, %v314_v53  ;;  %1039 = vst [vmem:[%s1506_s3 + $0x70] sm:$0xff] %v939_v56   ;;  %vm252_vm0 = vcmp.gt.f32.partialorder %v188_v58, 0.0  ;;  %v316_v1 = vmul.f32 0.2, %v188_v58  ;;  %v121_v3 = vmul.f32 %v1086_v2, %v50_v55  ;;  %v59_v45 = vld [vmem:[%s1503_s0 + $0x168] sm:$0xff] }
  0x31   :  { %v379_v0 = vsel %vm251_vm15, %v187_v48, %v315_v57  ;;  %vm253_vm1 = vcmp.gt.f32.partialorder %v189_v60, 0.0  ;;  %v317_v7 = vmul.f32 0.2, %v189_v60  ;;  %v190_v8 = vadd.f32 %v1093_v5, %v119_v61  ;;  %v61_v57 = vld [vmem:[%s1503_s0 + $0x178] sm:$0xff] }
  0x32   :  { %v944_v6 = vpack.c.bf16 %v379_v0, %v378_v59  ;;  %v380_v9 = vsel %vm252_vm0, %v188_v58, %v316_v1  ;;  %v191_v10 = vadd.f32 %v1093_v5, %v120_v62  ;;  %v122_v11 = vmul.f32 %v1086_v2, %v51_v63  ;;  %v62_v0 = vld [vmem:[%s1503_s0 + $0x180] sm:$0xff] }
  0x33   :  { %v192_v12 = vadd.f32 %v1093_v5, %v121_v3  ;;  %v381_v14 = vsel %vm253_vm1, %v189_v60, %v317_v7  ;;  %vm254_vm2 = vcmp.gt.f32.partialorder %v190_v8, 0.0  ;;  %v318_v15 = vmul.f32 0.2, %v190_v8 }
  0x34   :  { %1040 = vst [vmem:[%s1506_s3 + $0x78] sm:$0xff] %v944_v6   ;;  %v123_v16 = vmul.f32 %v1086_v2, %v52_v4  ;;  %v949_v17 = vpack.c.bf16 %v381_v14, %v380_v9  ;;  %vm255_vm3 = vcmp.gt.f32.partialorder %v191_v10, 0.0  ;;  %v319_v18 = vmul.f32 0.2, %v191_v10  ;;  %v63_v6 = vld [vmem:[%s1503_s0 + $0x188] sm:$0xff]  ;;  %v64_v14 = vld [vmem:[%s1503_s0 + $0x190] sm:$0xff] }
  0x35   :  { %v193_v19 = vadd.f32 %v1093_v5, %v122_v11  ;;  %v382_v21 = vsel %vm254_vm2, %v190_v8, %v318_v15  ;;  %vm256_vm4 = vcmp.gt.f32.partialorder %v192_v12, 0.0  ;;  %v320_v22 = vmul.f32 0.2, %v192_v12  ;;  %v65_v15 = vld [vmem:[%s1503_s0 + $0x198] sm:$0xff] }
  0x36   :  { %v124_v23 = vmul.f32 %v1086_v2, %v53_v13  ;;  %1041 = vst [vmem:[%s1506_s3 + $0x80] sm:$0xff] %v949_v17   ;;  %v383_v25 = vsel %vm255_vm3, %v191_v10, %v319_v18  ;;  %v194_v27 = vadd.f32 %v1093_v5, %v123_v16  ;;  %v125_v31 = vmul.f32 %v1086_v2, %v54_v20 }
  0x37   :  { %vm257_vm5 = vcmp.gt.f32.partialorder %v193_v19, 0.0  ;;  %v321_v26 = vmul.f32 0.2, %v193_v19  ;;  %v954_v28 = vpack.c.bf16 %v383_v25, %v382_v21  ;;  %v384_v29 = vsel %vm256_vm4, %v192_v12, %v320_v22 }
  0x38   :  { %v195_v30 = vadd.f32 %v1093_v5, %v124_v23  ;;  %vm258_vm6 = vcmp.gt.f32.partialorder %v194_v27, 0.0  ;;  %v322_v35 = vmul.f32 0.2, %v194_v27  ;;  %v126_v36 = vmul.f32 %v1086_v2, %v55_v24 }
  0x39   :  { %v385_v34 = vsel %vm257_vm5, %v193_v19, %v321_v26  ;;  %1042 = vst [vmem:[%s1506_s3 + $0x88] sm:$0xff] %v954_v28   ;;  %v196_v40 = vadd.f32 %v1093_v5, %v125_v31  ;;  %v127_v43 = vmul.f32 %v1086_v2, %v56_v32  ;;  %v128_v44 = vmul.f32 %v1086_v2, %v57_v33  ;;  %v66_v19 = vld [vmem:[%s1503_s0 + $0x1a0] sm:$0xff]  ;;  %v68_v31 = vld [vmem:[%s1503_s0 + $0x1b0] sm:$0xff] }
  0x3a   :  { %v959_v38 = vpack.c.bf16 %v385_v34, %v384_v29  ;;  %vm259_vm7 = vcmp.gt.f32.partialorder %v195_v30, 0.0  ;;  %v323_v39 = vmul.f32 0.2, %v195_v30  ;;  %v386_v41 = vsel %vm258_vm6, %v194_v27, %v322_v35  ;;  %v67_v27 = vld [vmem:[%s1503_s0 + $0x1a8] sm:$0xff] }
  0x3b   :  { %v197_v42 = vadd.f32 %v1093_v5, %v126_v36  ;;  %vm260_vm8 = vcmp.gt.f32.partialorder %v196_v40, 0.0  ;;  %v324_v47 = vmul.f32 0.2, %v196_v40  ;;  %v129_v48 = vmul.f32 %v1086_v2, %v58_v37 }
  0x3c   :  { %1043 = vst [vmem:[%s1506_s3 + $0x90] sm:$0xff] %v959_v38   ;;  %v387_v46 = vsel %vm259_vm7, %v195_v30, %v323_v39  ;;  %v198_v52 = vadd.f32 %v1093_v5, %v127_v43  ;;  %v199_v54 = vadd.f32 %v1093_v5, %v128_v44  ;;  %v130_v55 = vmul.f32 %v1086_v2, %v59_v45  ;;  %v69_v39 = vld [vmem:[%s1503_s0 + $0x1b8] sm:$0xff] }
  0x3d   :  { %v964_v50 = vpack.c.bf16 %v387_v46, %v386_v41  ;;  %vm261_vm9 = vcmp.gt.f32.partialorder %v197_v42, 0.0  ;;  %v325_v51 = vmul.f32 0.2, %v197_v42  ;;  %v388_v53 = vsel %vm260_vm8, %v196_v40, %v324_v47  ;;  %v70_v46 = vld [vmem:[%s1503_s0 + $0x1c0] sm:$0xff] }
  0x3e   :  { %v200_v56 = vadd.f32 %v1093_v5, %v129_v48  ;;  %vm262_vm10 = vcmp.gt.f32.partialorder %v198_v52, 0.0  ;;  %v326_v59 = vmul.f32 0.2, %v198_v52  ;;  %v131_v60 = vmul.f32 %v1086_v2, %v60_v49 }
  0x3f   :  { %1044 = vst [vmem:[%s1506_s3 + $0x98] sm:$0xff] %v964_v50   ;;  %v389_v58 = vsel %vm261_vm9, %v197_v42, %v325_v51  ;;  %vm263_vm11 = vcmp.gt.f32.partialorder %v199_v54, 0.0  ;;  %v327_v62 = vmul.f32 0.2, %v199_v54  ;;  %v201_v63 = vadd.f32 %v1093_v5, %v130_v55  ;;  %v71_v50 = vld [vmem:[%s1503_s0 + $0x1c8] sm:$0xff] }
  0x40   :  { %v969_v61 = vpack.c.bf16 %v389_v58, %v388_v53  ;;  %v390_v1 = vsel %vm262_vm10, %v198_v52, %v326_v59  ;;  %vm264_vm12 = vcmp.gt.f32.partialorder %v200_v56, 0.0  ;;  %v328_v3 = vmul.f32 0.2, %v200_v56  ;;  %v72_v58 = vld [vmem:[%s1503_s0 + $0x1d0] sm:$0xff]  ;;  %v73_v59 = vld [vmem:[%s1503_s0 + $0x1d8] sm:$0xff] }
  0x41   :  { %v132_v4 = vmul.f32 %v1086_v2, %v61_v57  ;;  %v391_v7 = vsel %vm263_vm11, %v199_v54, %v327_v62  ;;  %vm265_vm13 = vcmp.gt.f32.partialorder %v201_v63, 0.0  ;;  %v329_v8 = vmul.f32 0.2, %v201_v63 }
  0x42   :  { %1045 = vst [vmem:[%s1506_s3 + $0xa0] sm:$0xff] %v969_v61   ;;  %v202_v9 = vadd.f32 %v1093_v5, %v131_v60  ;;  %v974_v10 = vpack.c.bf16 %v391_v7, %v390_v1  ;;  %v392_v11 = vsel %vm264_vm12, %v200_v56, %v328_v3  ;;  %v133_v13 = vmul.f32 %v1086_v2, %v62_v0 }
  0x43   :  { %v203_v12 = vadd.f32 %v1093_v5, %v132_v4  ;;  %v393_v16 = vsel %vm265_vm13, %v201_v63, %v329_v8  ;;  %v134_v18 = vmul.f32 %v1086_v2, %v63_v6  ;;  %v135_v25 = vmul.f32 %v1086_v2, %v64_v14  ;;  %v74_v63 = vld [vmem:[%s1503_s0 + $0x1e0] sm:$0xff] }
  0x44   :  { %vm266_vm14 = vcmp.gt.f32.partialorder %v202_v9, 0.0  ;;  %v330_v17 = vmul.f32 0.2, %v202_v9  ;;  %1046 = vst [vmem:[%s1506_s3 + $0xa8] sm:$0xff] %v974_v10   ;;  %v979_v20 = vpack.c.bf16 %v393_v16, %v392_v11  ;;  %v204_v22 = vadd.f32 %v1093_v5, %v133_v13  ;;  %v76_v13 = vld [vmem:[%s1503_s0 + $0x1f0] sm:$0xff] }
  0x45   :  { %vm267_vm15 = vcmp.gt.f32.partialorder %v203_v12, 0.0  ;;  %v331_v21 = vmul.f32 0.2, %v203_v12  ;;  %v205_v24 = vadd.f32 %v1093_v5, %v134_v18  ;;  %v136_v26 = vmul.f32 %v1086_v2, %v65_v15 }
  0x46   :  { %v394_v23 = vsel %vm266_vm14, %v202_v9, %v330_v17  ;;  %1047 = vst [vmem:[%s1506_s3 + $0xb0] sm:$0xff] %v979_v20   ;;  %vm268_vm0 = vcmp.gt.f32.partialorder %v204_v22, 0.0  ;;  %v332_v29 = vmul.f32 0.2, %v204_v22  ;;  %v137_v30 = vmul.f32 %v1086_v2, %v66_v19  ;;  %v75_v9 = vld [vmem:[%s1503_s0 + $0x1e8] sm:$0xff] }
  0x47   :  { %v395_v28 = vsel %vm267_vm15, %v203_v12, %v331_v21  ;;  %vm269_vm1 = vcmp.gt.f32.partialorder %v205_v24, 0.0  ;;  %v333_v33 = vmul.f32 0.2, %v205_v24  ;;  %v206_v34 = vadd.f32 %v1093_v5, %v135_v25  ;;  %v77_v21 = vld [vmem:[%s1503_s0 + $0x1f8] sm:$0xff] }
  0x48   :  { %v984_v32 = vpack.c.bf16 %v395_v28, %v394_v23  ;;  %v396_v35 = vsel %vm268_vm0, %v204_v22, %v332_v29  ;;  %v207_v36 = vadd.f32 %v1093_v5, %v136_v26  ;;  %v138_v37 = vmul.f32 %v1086_v2, %v67_v27 }
  0x49   :  { %v208_v38 = vadd.f32 %v1093_v5, %v137_v30  ;;  %v397_v40 = vsel %vm269_vm1, %v205_v24, %v333_v33  ;;  %vm270_vm2 = vcmp.gt.f32.partialorder %v206_v34, 0.0  ;;  %v334_v41 = vmul.f32 0.2, %v206_v34 }
  0x4a   :  { %1048 = vst [vmem:[%s1506_s3 + $0xb8] sm:$0xff] %v984_v32   ;;  %v139_v42 = vmul.f32 %v1086_v2, %v68_v31  ;;  %v989_v43 = vpack.c.bf16 %v397_v40, %v396_v35  ;;  %vm271_vm3 = vcmp.gt.f32.partialorder %v207_v36, 0.0  ;;  %v335_v44 = vmul.f32 0.2, %v207_v36 }
  0x4b   :  { %v209_v45 = vadd.f32 %v1093_v5, %v138_v37  ;;  %v398_v47 = vsel %vm270_vm2, %v206_v34, %v334_v41  ;;  %vm272_vm4 = vcmp.gt.f32.partialorder %v208_v38, 0.0  ;;  %v336_v48 = vmul.f32 0.2, %v208_v38 }
  0x4c   :  { %v140_v49 = vmul.f32 %v1086_v2, %v69_v39  ;;  %1049 = vst [vmem:[%s1506_s3 + $0xc0] sm:$0xff] %v989_v43   ;;  %v399_v51 = vsel %vm271_vm3, %v207_v36, %v335_v44  ;;  %v210_v53 = vadd.f32 %v1093_v5, %v139_v42  ;;  %v141_v57 = vmul.f32 %v1086_v2, %v70_v46 }
  0x4d   :  { %vm273_vm5 = vcmp.gt.f32.partialorder %v209_v45, 0.0  ;;  %v337_v52 = vmul.f32 0.2, %v209_v45  ;;  %v994_v54 = vpack.c.bf16 %v399_v51, %v398_v47  ;;  %v400_v55 = vsel %vm272_vm4, %v208_v38, %v336_v48 }
  0x4e   :  { %v211_v56 = vadd.f32 %v1093_v5, %v140_v49  ;;  %vm274_vm6 = vcmp.gt.f32.partialorder %v210_v53, 0.0  ;;  %v338_v61 = vmul.f32 0.2, %v210_v53  ;;  %v142_v62 = vmul.f32 %v1086_v2, %v71_v50 }
  0x4f   :  { %v401_v60 = vsel %vm273_vm5, %v209_v45, %v337_v52  ;;  %1050 = vst [vmem:[%s1506_s3 + $0xc8] sm:$0xff] %v994_v54   ;;  %v212_v3 = vadd.f32 %v1093_v5, %v141_v57  ;;  %v143_v7 = vmul.f32 %v1086_v2, %v72_v58  ;;  %v144_v8 = vmul.f32 %v1086_v2, %v73_v59 }
  0x50   :  { %v999_v0 = vpack.c.bf16 %v401_v60, %v400_v55  ;;  %vm275_vm7 = vcmp.gt.f32.partialorder %v211_v56, 0.0  ;;  %v339_v1 = vmul.f32 0.2, %v211_v56  ;;  %v402_v4 = vsel %vm274_vm6, %v210_v53, %v338_v61 }
  0x51   :  { %v213_v6 = vadd.f32 %v1093_v5, %v142_v62  ;;  %vm276_vm8 = vcmp.gt.f32.partialorder %v212_v3, 0.0  ;;  %v340_v11 = vmul.f32 0.2, %v212_v3  ;;  %v145_v12 = vmul.f32 %v1086_v2, %v74_v63 }
  0x52   :  { %1051 = vst [vmem:[%s1506_s3 + $0xd0] sm:$0xff] %v999_v0   ;;  %v403_v10 = vsel %vm275_vm7, %v211_v56, %v339_v1  ;;  %v214_v16 = vadd.f32 %v1093_v5, %v143_v7  ;;  %v215_v18 = vadd.f32 %v1093_v5, %v144_v8  ;;  %v146_v19 = vmul.f32 %v1086_v2, %v75_v9 }
  0x53   :  { %v1004_v14 = vpack.c.bf16 %v403_v10, %v402_v4  ;;  %vm277_vm9 = vcmp.gt.f32.partialorder %v213_v6, 0.0  ;;  %v341_v15 = vmul.f32 0.2, %v213_v6  ;;  %v404_v17 = vsel %vm276_vm8, %v212_v3, %v340_v11 }
  0x54   :  { %v216_v20 = vadd.f32 %v1093_v5, %v145_v12  ;;  %vm278_vm10 = vcmp.gt.f32.partialorder %v214_v16, 0.0  ;;  %v342_v23 = vmul.f32 0.2, %v214_v16  ;;  %v147_v24 = vmul.f32 %v1086_v2, %v76_v13 }
  0x55   :  { %1052 = vst [vmem:[%s1506_s3 + $0xd8] sm:$0xff] %v1004_v14   ;;  %v405_v22 = vsel %vm277_vm9, %v213_v6, %v341_v15  ;;  %vm279_vm11 = vcmp.gt.f32.partialorder %v215_v18, 0.0  ;;  %v343_v26 = vmul.f32 0.2, %v215_v18  ;;  %v217_v27 = vadd.f32 %v1093_v5, %v146_v19 }
  0x56   :  { %v1009_v25 = vpack.c.bf16 %v405_v22, %v404_v17  ;;  %v406_v28 = vsel %vm278_vm10, %v214_v16, %v342_v23  ;;  %vm280_vm12 = vcmp.gt.f32.partialorder %v216_v20, 0.0  ;;  %v344_v29 = vmul.f32 0.2, %v216_v20 }
  0x57   :  { %v148_v30 = vmul.f32 %v1086_v2, %v77_v21  ;;  %v407_v31 = vsel %vm279_vm11, %v215_v18, %v343_v26  ;;  %vm281_vm13 = vcmp.gt.f32.partialorder %v217_v27, 0.0  ;;  %v345_v32 = vmul.f32 0.2, %v217_v27 }
  0x58   :  { %1053 = vst [vmem:[%s1506_s3 + $0xe0] sm:$0xff] %v1009_v25   ;;  %v218_v33 = vadd.f32 %v1093_v5, %v147_v24  ;;  %v1014_v34 = vpack.c.bf16 %v407_v31, %v406_v28  ;;  %v408_v35 = vsel %vm280_vm12, %v216_v20, %v344_v29 }
  0x59   :  { %v219_v36 = vadd.f32 %v1093_v5, %v148_v30  ;;  %v409_v37 = vsel %vm281_vm13, %v217_v27, %v345_v32 }
  0x5a   :  { %vm282_vm14 = vcmp.gt.f32.partialorder %v218_v33, 0.0  ;;  %v346_v38 = vmul.f32 0.2, %v218_v33  ;;  %1054 = vst [vmem:[%s1506_s3 + $0xe8] sm:$0xff] %v1014_v34   ;;  %v1019_v2 = vpack.c.bf16 %v409_v37, %v408_v35 }
  0x5b   :  { %vm283_vm15 = vcmp.gt.f32.partialorder %v219_v36, 0.0  ;;  %v347_v39 = vmul.f32 0.2, %v219_v36 }
  0x5c   :  { %v410_v40 = vsel %vm282_vm14, %v218_v33, %v346_v38  ;;  %1055 = vst [vmem:[%s1506_s3 + $0xf0] sm:$0xff] %v1019_v2  }
  0x5d   :  { %v411_v41 = vsel %vm283_vm15, %v219_v36, %v347_v39 }
  0x5e   :  { %v1024_v42 = vpack.c.bf16 %v411_v41, %v410_v40 }
  0x60   :  { %1056 = vst [vmem:[%s1506_s3 + $0xf8] sm:$0xff] %v1024_v42  }

// kernel: discriminator_forward.11
= control target key start
LH: loop header
LB: loop body
LE: loop exit
PB: predicated region body
PF: predicated region fallthrough
CT: control target
= control target key end

     0   :  { %s854_s1 = inlined_call_operand.vmem [shape: bf16[256,128], index: 1, kind: input, shape index: {}]   ;;  %s855_s0 = inlined_call_operand.vmem [shape: bf16[128,256], index: 0, kind: input, shape index: {}]   ;;  %s856_s2 = inlined_call_operand.vmem [shape: f32[128,128], index: 2, kind: output, shape index: {0}]   ;;  %s857_s3 = inlined_call_operand.vmem [shape: f32[8,128], index: 3, kind: output, shape index: {1}]  }
   0x1   :  { %v623_v0 = vld [vmem:[%s854_s1 + $0x78] sm:$0xff]   ;;  %v625_v2 = vld [vmem:[%s854_s1 + $0x70] sm:$0xff]   ;;  %v627_v4 = vld [vmem:[%s854_s1 + $0x68] sm:$0xff]  }
   0x2   :  { %v624_v1 = vld [vmem:[%s854_s1 + $0x38] sm:$0xff]   ;;  %543 = vmatprep.subr.bf16.mxu0 %v623_v0  ;;  %607 = vmatprep.subr.bf16.mxu1 %v623_v0  ;;  %v626_v3 = vld [vmem:[%s854_s1 + $0x30] sm:$0xff]   ;;  %v628_v5 = vld [vmem:[%s854_s1 + $0x28] sm:$0xff]  }
   0x3   :  { %544 = vmatpush3.bf16.msra.mxu0 %v624_v1  ;;  %615 = vmatpush3.bf16.msra.mxu1 %v624_v1  ;;  %v629_v6 = vld [vmem:[%s854_s1 + $0x60] sm:$0xff]   ;;  %v631_v8 = vld [vmem:[%s854_s1 + $0x58] sm:$0xff]   ;;  %v633_v10 = vld [vmem:[%s854_s1 + $0x50] sm:$0xff]  }
   0x4   :  { %545 = vmatprep.subr.bf16.mxu0 %v625_v2  ;;  %608 = vmatprep.subr.bf16.mxu1 %v625_v2  ;;  %v630_v7 = vld [vmem:[%s854_s1 + $0x20] sm:$0xff]   ;;  %v632_v9 = vld [vmem:[%s854_s1 + $0x18] sm:$0xff]   ;;  %v634_v12 = vld [vmem:[%s854_s1 + $0x10] sm:$0xff]  }
   0x5   :  { %v641_v11 = vld [vmem:[%s855_s0 + $0x4] ss:$8 sps:$4 sm:$0xff]   ;;  %v639_v18 = vld [vmem:[%s855_s0] ss:$8 sps:$4 sm:$0xff]   ;;  %v642_v20 = vld [vmem:[%s855_s0 + $0x14] ss:$8 sps:$4 sm:$0xff]  }
   0x6   :  { %v647_v13 = vld [vmem:[%s855_s0 + $0x44] ss:$8 sps:$4 sm:$0xff]   ;;  %306 = vmatprep.mubr.bf16.mxu0 %v641_v11  ;;  %v645_v19 = vld [vmem:[%s855_s0 + $0x40] ss:$8 sps:$4 sm:$0xff]   ;;  %v651_v21 = vld [vmem:[%s855_s0 + $0x54] ss:$8 sps:$4 sm:$0xff]  }
   0x7   :  { %546 = vmatpush3.bf16.msra.mxu0 %v626_v3  ;;  %616 = vmatpush3.bf16.msra.mxu1 %v626_v3  ;;  %v635_v14 = vld [vmem:[%s854_s1 + $0x48] sm:$0xff]   ;;  %v637_v16 = vld [vmem:[%s854_s1 + $0x40] sm:$0xff]   ;;  %v644_v22 = vld [vmem:[%s855_s0 + $0x10] ss:$8 sps:$4 sm:$0xff]  }
   0x8   :  { %547 = vmatprep.subr.bf16.mxu0 %v627_v4  ;;  %609 = vmatprep.subr.bf16.mxu1 %v627_v4  ;;  %v636_v15 = vld [vmem:[%s854_s1 + $0x8] sm:$0xff]   ;;  %v638_v17 = vld [vmem:[%s854_s1] sm:$0xff]   ;;  %v653_v23 = vld [vmem:[%s855_s0 + $0x50] ss:$8 sps:$4 sm:$0xff]  }
   0x9   :  { %338 = vmatprep.mubr.bf16.mxu1 %v647_v13  ;;  %v648_v24 = vld [vmem:[%s855_s0 + $0x24] ss:$8 sps:$4 sm:$0xff]   ;;  %v650_v26 = vld [vmem:[%s855_s0 + $0x20] ss:$8 sps:$4 sm:$0xff]   ;;  %v654_v28 = vld [vmem:[%s855_s0 + $0x34] ss:$8 sps:$4 sm:$0xff]  }
   0xa   :  { %v657_v25 = vld [vmem:[%s855_s0 + $0x64] ss:$8 sps:$4 sm:$0xff]   ;;  %v659_v27 = vld [vmem:[%s855_s0 + $0x60] ss:$8 sps:$4 sm:$0xff]   ;;  %v660_v29 = vld [vmem:[%s855_s0 + $0x74] ss:$8 sps:$4 sm:$0xff]  }
   0xb   :  { %548 = vmatpush3.bf16.msra.mxu0 %v628_v5  ;;  %617 = vmatpush3.bf16.msra.mxu1 %v628_v5  ;;  %v656_v30 = vld [vmem:[%s855_s0 + $0x30] ss:$8 sps:$4 sm:$0xff]  }
   0xc   :  { %549 = vmatprep.subr.bf16.mxu0 %v629_v6  ;;  %610 = vmatprep.subr.bf16.mxu1 %v629_v6  ;;  %v662_v31 = vld [vmem:[%s855_s0 + $0x70] ss:$8 sps:$4 sm:$0xff]  }
   0xf   :  { %550 = vmatpush3.bf16.msra.mxu0 %v630_v7  ;;  %618 = vmatpush3.bf16.msra.mxu1 %v630_v7 }
  0x10   :  { %551 = vmatprep.subr.bf16.mxu0 %v631_v8  ;;  %611 = vmatprep.subr.bf16.mxu1 %v631_v8 }
  0x13   :  { %552 = vmatpush3.bf16.msra.mxu0 %v632_v9  ;;  %619 = vmatpush3.bf16.msra.mxu1 %v632_v9 }
  0x14   :  { %553 = vmatprep.subr.bf16.mxu0 %v633_v10  ;;  %612 = vmatprep.subr.bf16.mxu1 %v633_v10 }
  0x17   :  { %554 = vmatpush3.bf16.msra.mxu0 %v634_v12  ;;  %620 = vmatpush3.bf16.msra.mxu1 %v634_v12 }
  0x18   :  { %555 = vmatprep.subr.bf16.mxu0 %v635_v14  ;;  %613 = vmatprep.subr.bf16.mxu1 %v635_v14 }
  0x1b   :  { %556 = vmatpush3.bf16.msra.mxu0 %v636_v15  ;;  %621 = vmatpush3.bf16.msra.mxu1 %v636_v15 }
  0x1c   :  { %557 = vmatprep.subr.bf16.mxu0 %v637_v16  ;;  %614 = vmatprep.subr.bf16.mxu1 %v637_v16 }
  0x1f   :  { %558 = vmatpush3.bf16.msra.mxu0 %v638_v17  ;;  %622 = vmatpush3.bf16.msra.mxu1 %v638_v17 }
  0x22   :  { %307 = vmatmul.mubr.bf16.vlgmr.msra.gmra.mxu0 %v639_v18  ;;  %339 = vmatmul.mubr.bf16.vlgmr.msra.gmra.mxu1 %v645_v19 }
  0x23   :  { %314 = vmatprep.mubr.bf16.mxu0 %v642_v20  ;;  %346 = vmatprep.mubr.bf16.mxu1 %v651_v21 }
  0x2a   :  { %315 = vmatmul.mubr.bf16.gmra.mxu0 %v644_v22  ;;  %347 = vmatmul.mubr.bf16.gmra.mxu1 %v653_v23 }
  0x2b   :  { %322 = vmatprep.mubr.bf16.mxu0 %v648_v24  ;;  %354 = vmatprep.mubr.bf16.mxu1 %v657_v25 }
  0x32   :  { %323 = vmatmul.mubr.bf16.gmra.mxu0 %v650_v26  ;;  %355 = vmatmul.mubr.bf16.gmra.mxu1 %v659_v27 }
  0x33   :  { %330 = vmatprep.mubr.bf16.mxu0 %v654_v28  ;;  %362 = vmatprep.mubr.bf16.mxu1 %v660_v29 }
  0x3a   :  { %331 = vmatmul.mubr.bf16.gmra.mxu0 %v656_v30  ;;  %363 = vmatmul.mubr.bf16.gmra.mxu1 %v662_v31 }
  0xe2   :  { %v559_v32 = vpop.f32.mrf.mxu0  ;;  %v583_v33 = vpop.f32.mrf.mxu1 }
  0xe4   :  { %v560_v34 = vpop.f32.mrf.mxu0  ;;  %v584_v35 = vpop.f32.mrf.mxu1 }
  0xe5   :  { %v561_v36 = vadd.f32 %v560_v34, %v559_v32  ;;  %v779_v37 = vadd.f32 %v584_v35, %v583_v33 }
  0xe6   :  { %v562_v38 = vpop.f32.mrf.mxu0  ;;  %v586_v39 = vpop.f32.mrf.mxu1 }
  0xe7   :  { %422 = vst [vmem:[%s856_s2] sm:$0xff] %v561_v36  ;;  %430 = vst [vmem:[%s856_s2 + $0x40] sm:$0xff] %v779_v37  ;;  %v459_v63 = vmul.f32 %v561_v36, %v561_v36 }
  0xe8   :  { %v563_v40 = vpop.f32.mrf.mxu0  ;;  %v587_v41 = vpop.f32.mrf.mxu1 }
  0xe9   :  { %v564_v42 = vadd.f32 %v563_v40, %v562_v38  ;;  %v788_v43 = vadd.f32 %v587_v41, %v586_v39  ;;  %v467_v38 = vmul.f32 %v779_v37, %v779_v37 }
  0xea   :  { %v565_v44 = vpop.f32.mrf.mxu0  ;;  %v589_v45 = vpop.f32.mrf.mxu1 }
  0xeb   :  { %423 = vst [vmem:[%s856_s2 + $0x8] sm:$0xff] %v564_v42  ;;  %431 = vst [vmem:[%s856_s2 + $0x48] sm:$0xff] %v788_v43  ;;  %v460_v58 = vmul.f32 %v564_v42, %v564_v42  ;;  %v438_v3 = vadd.f32 %v564_v42, %v561_v36  ;;  %v468_v41 = vmul.f32 %v788_v43, %v788_v43 }
  0xec   :  { %v566_v46 = vpop.f32.mrf.mxu0  ;;  %v590_v47 = vpop.f32.mrf.mxu1 }
  0xed   :  { %v567_v48 = vadd.f32 %v566_v46, %v565_v44  ;;  %v797_v49 = vadd.f32 %v590_v47, %v589_v45  ;;  %v475_v4 = vadd.f32 %v460_v58, %v459_v63 }
  0xee   :  { %v568_v50 = vpop.f32.mrf.mxu0  ;;  %v592_v51 = vpop.f32.mrf.mxu1 }
  0xef   :  { %424 = vst [vmem:[%s856_s2 + $0x10] sm:$0xff] %v567_v48  ;;  %432 = vst [vmem:[%s856_s2 + $0x50] sm:$0xff] %v797_v49  ;;  %v461_v0 = vmul.f32 %v567_v48, %v567_v48  ;;  %v439_v8 = vadd.f32 %v567_v48, %v438_v3  ;;  %v469_v45 = vmul.f32 %v797_v49, %v797_v49  ;;  %v496_v3 = vlaneseq }
  0xf0   :  { %v569_v52 = vpop.f32.mrf.mxu0  ;;  %v593_v53 = vpop.f32.mrf.mxu1 }
  0xf1   :  { %v570_v54 = vadd.f32 %v569_v52, %v568_v50  ;;  %v806_v55 = vadd.f32 %v593_v53, %v592_v51  ;;  %v476_v11 = vadd.f32 %v475_v4, %v461_v0 }
  0xf2   :  { %v571_v56 = vpop.f32.mrf.mxu0  ;;  %v595_v57 = vpop.f32.mrf.mxu1 }
  0xf3   :  { %425 = vst [vmem:[%s856_s2 + $0x18] sm:$0xff] %v570_v54  ;;  %433 = vst [vmem:[%s856_s2 + $0x58] sm:$0xff] %v806_v55  ;;  %v462_v5 = vmul.f32 %v570_v54, %v570_v54  ;;  %v440_v14 = vadd.f32 %v570_v54, %v439_v8  ;;  %v470_v48 = vmul.f32 %v806_v55, %v806_v55 }
  0xf4   :  { %v572_v59 = vpop.f32.mrf.mxu0  ;;  %v596_v60 = vpop.f32.mrf.mxu1 }
  0xf5   :  { %v573_v61 = vadd.f32 %v572_v59, %v571_v56  ;;  %v597_v62 = vadd.f32 %v596_v60, %v595_v57  ;;  %v477_v16 = vadd.f32 %v476_v11, %v462_v5 }
  0xf6   :  { %v574_v1 = vpop.f32.mrf.mxu0  ;;  %v598_v2 = vpop.f32.mrf.mxu1 }
  0xf7   :  { %426 = vst [vmem:[%s856_s2 + $0x20] sm:$0xff] %v573_v61  ;;  %434 = vst [vmem:[%s856_s2 + $0x60] sm:$0xff] %v597_v62  ;;  %v463_v15 = vmul.f32 %v573_v61, %v573_v61  ;;  %v441_v19 = vadd.f32 %v573_v61, %v440_v14 }
  0xf8   :  { %v575_v6 = vpop.f32.mrf.mxu0  ;;  %v599_v7 = vpop.f32.mrf.mxu1 }
  0xf9   :  { %v576_v9 = vadd.f32 %v575_v6, %v574_v1  ;;  %v600_v10 = vadd.f32 %v599_v7, %v598_v2  ;;  %v478_v25 = vadd.f32 %v477_v16, %v463_v15 }
  0xfa   :  { %v577_v12 = vpop.f32.mrf.mxu0  ;;  %v601_v13 = vpop.f32.mrf.mxu1 }
  0xfb   :  { %427 = vst [vmem:[%s856_s2 + $0x28] sm:$0xff] %v576_v9  ;;  %435 = vst [vmem:[%s856_s2 + $0x68] sm:$0xff] %v600_v10  ;;  %v464_v20 = vmul.f32 %v576_v9, %v576_v9  ;;  %v442_v26 = vadd.f32 %v576_v9, %v441_v19  ;;  %v472_v56 = vmul.f32 %v600_v10, %v600_v10 }
  0xfc   :  { %v578_v17 = vpop.f32.mrf.mxu0  ;;  %v602_v18 = vpop.f32.mrf.mxu1 }
  0xfd   :  { %v579_v21 = vadd.f32 %v578_v17, %v577_v12  ;;  %v603_v22 = vadd.f32 %v602_v18, %v601_v13  ;;  %v479_v30 = vadd.f32 %v478_v25, %v464_v20 }
  0xfe   :  { %v580_v23 = vpop.f32.mrf.mxu0  ;;  %v604_v24 = vpop.f32.mrf.mxu1 }
  0xff   :  { %428 = vst [vmem:[%s856_s2 + $0x30] sm:$0xff] %v579_v21  ;;  %v465_v27 = vmul.f32 %v579_v21, %v579_v21  ;;  %436 = vst [vmem:[%s856_s2 + $0x70] sm:$0xff] %v603_v22  ;;  %v443_v31 = vadd.f32 %v579_v21, %v442_v26  ;;  %v473_v59 = vmul.f32 %v603_v22, %v603_v22 }
 0x100   :  { %v581_v28 = vpop.f32.mrf.mxu0  ;;  %v605_v29 = vpop.f32.mrf.mxu1 }
 0x101   :  { %v582_v32 = vadd.f32 %v581_v28, %v580_v23  ;;  %v606_v33 = vadd.f32 %v605_v29, %v604_v24  ;;  %v480_v34 = vadd.f32 %v479_v30, %v465_v27 }
 0x103   :  { %429 = vst [vmem:[%s856_s2 + $0x38] sm:$0xff] %v582_v32  ;;  %v444_v35 = vadd.f32 %v582_v32, %v443_v31  ;;  %v466_v36 = vmul.f32 %v582_v32, %v582_v32  ;;  %437 = vst [vmem:[%s856_s2 + $0x78] sm:$0xff] %v606_v33  ;;  %v474_v63 = vmul.f32 %v606_v33, %v606_v33 }
 0x105   :  { %v445_v39 = vadd.f32 %v779_v37, %v444_v35  ;;  %v481_v40 = vadd.f32 %v480_v34, %v466_v36  ;;  %v471_v37 = vmul.f32 %v597_v62, %v597_v62 }
 0x107   :  { %v446_v42 = vadd.f32 %v788_v43, %v445_v39  ;;  %v482_v44 = vadd.f32 %v481_v40, %v467_v38 }
 0x109   :  { %v483_v46 = vadd.f32 %v482_v44, %v468_v41  ;;  %v447_v47 = vadd.f32 %v797_v49, %v446_v42 }
 0x10b   :  { %v448_v50 = vadd.f32 %v806_v55, %v447_v47  ;;  %v484_v51 = vadd.f32 %v483_v46, %v469_v45 }
 0x10d   :  { %v449_v52 = vadd.f32 %v597_v62, %v448_v50  ;;  %v485_v53 = vadd.f32 %v484_v51, %v470_v48  ;;  %v497_v62 = vshrl.u32 %v496_v3, 7 }
 0x10f   :  { %v450_v54 = vadd.f32 %v600_v10, %v449_v52  ;;  %v486_v57 = vadd.f32 %v485_v53, %v471_v37  ;;  %vm499_vm0 = vcmp.eq.s32.totalorder %v497_v62, 1  ;;  %vm498_vm1 = vcmp.eq.s32.totalorder %v497_v62, 0 }
 0x111   :  { %v487_v43 = vadd.f32 %v486_v57, %v472_v56  ;;  %v451_v58 = vadd.f32 %v603_v22, %v450_v54 }
 0x113   :  { %v488_v60 = vadd.f32 %v487_v43, %v473_v59  ;;  %v452_v61 = vadd.f32 %v606_v33, %v451_v58 }
 0x115   :  { %v453_v0 = vrot.slane %v452_v61, 4  ;;  %v489_v49 = vadd.f32 %v488_v60, %v474_v63 }
 0x117   :  { %v454_v1 = vadd.f32 %v453_v0, %v452_v61  ;;  %v490_v2 = vrot.slane %v489_v49, 4 }
 0x119   :  { %v455_v4 = vrot.slane %v454_v1, 2  ;;  %v491_v55 = vadd.f32 %v490_v2, %v489_v49 }
 0x11b   :  { %v456_v5 = vadd.f32 %v455_v4, %v454_v1  ;;  %v492_v6 = vrot.slane %v491_v55, 2 }
 0x11d   :  { %v493_v7 = vadd.f32 %v492_v6, %v491_v55  ;;  %v457_v8 = vrot.slane %v456_v5, 1 }
 0x11f   :  { %v494_v9 = vrot.slane %v493_v7, 1  ;;  %v458_v11 = vadd.f32 %v457_v8, %v456_v5 }
 0x121   :  { %v495_v10 = vadd.f32 %v494_v9, %v493_v7 }
 0x123   :  { %v500_v12 = vsel %vm499_vm0, %v495_v10, 0.0 }
 0x124   :  { %v501_v13 = vsel %vm498_vm1, %v458_v11, %v500_v12 }
 0x125   :  { %502 = vst [vmem:[%s857_s3] sm:$0xff] %v501_v13 }

// kernel: discriminator_forward.12
= control target key start
LH: loop header
LB: loop body
LE: loop exit
PB: predicated region body
PF: predicated region fallthrough
CT: control target
= control target key end

     0   :  { %s423_s0 = inlined_call_operand.vmem [shape: f32[128,128], index: 0, kind: input, shape index: {}]   ;;  %s424_s1 = inlined_call_operand.vmem [shape: f32[1,128], index: 1, kind: input, shape index: {}]   ;;  %s425_s2 = inlined_call_operand.vmem [shape: f32[1,128], index: 2, kind: input, shape index: {}]   ;;  %s426_s3 = inlined_call_operand.vmem [shape: bf16[128,128], index: 3, kind: output, shape index: {}]  }
   0x1   :  { %v14_v0 = vld [vmem:[%s423_s0] sm:$0xff]  ;;  %v15_v1 = vld [vmem:[%s423_s0 + $0x8] sm:$0xff]  ;;  %v16_v6 = vld [vmem:[%s423_s0 + $0x10] sm:$0xff] }
   0x2   :  { %v318_v2 = vld [vmem:[%s424_s1] ss:$0 sm:$0xff]  ;;  %v17_v7 = vld [vmem:[%s423_s0 + $0x18] sm:$0xff]  ;;  %v19_v11 = vld [vmem:[%s423_s0 + $0x28] sm:$0xff] }
   0x3   :  { %v37_v3 = vmul.f32 %v318_v2, %v14_v0  ;;  %v38_v4 = vmul.f32 %v318_v2, %v15_v1  ;;  %v325_v5 = vld [vmem:[%s425_s2] ss:$0 sm:$0xff]  ;;  %v39_v8 = vmul.f32 %v318_v2, %v16_v6  ;;  %v40_v9 = vmul.f32 %v318_v2, %v17_v7  ;;  %v20_v12 = vld [vmem:[%s423_s0 + $0x30] sm:$0xff]  ;;  %v21_v17 = vld [vmem:[%s423_s0 + $0x38] sm:$0xff] }
   0x4   :  { %v18_v10 = vld [vmem:[%s423_s0 + $0x20] sm:$0xff]  ;;  %v42_v16 = vmul.f32 %v318_v2, %v19_v11  ;;  %v43_v20 = vmul.f32 %v318_v2, %v20_v12  ;;  %v44_v21 = vmul.f32 %v318_v2, %v21_v17  ;;  %v23_v35 = vld [vmem:[%s423_s0 + $0x48] sm:$0xff]  ;;  %v24_v36 = vld [vmem:[%s423_s0 + $0x50] sm:$0xff] }
   0x5   :  { %v60_v13 = vadd.f32 %v325_v5, %v37_v3  ;;  %v61_v14 = vadd.f32 %v325_v5, %v38_v4  ;;  %v41_v15 = vmul.f32 %v318_v2, %v18_v10  ;;  %v62_v18 = vadd.f32 %v325_v5, %v39_v8  ;;  %v22_v34 = vld [vmem:[%s423_s0 + $0x40] sm:$0xff]  ;;  %v25_v42 = vld [vmem:[%s423_s0 + $0x58] sm:$0xff]  ;;  %v27_v48 = vld [vmem:[%s423_s0 + $0x68] sm:$0xff] }
   0x6   :  { %v63_v19 = vadd.f32 %v325_v5, %v40_v9  ;;  %v65_v29 = vadd.f32 %v325_v5, %v42_v16  ;;  %v66_v33 = vadd.f32 %v325_v5, %v43_v20  ;;  %v67_v40 = vadd.f32 %v325_v5, %v44_v21  ;;  %v26_v47 = vld [vmem:[%s423_s0 + $0x60] sm:$0xff]  ;;  %v28_v60 = vld [vmem:[%s423_s0 + $0x70] sm:$0xff]  ;;  %v29_v7 = vld [vmem:[%s423_s0 + $0x78] sm:$0xff] }
   0x7   :  { %vm76_vm0 = vcmp.gt.f32.partialorder %v60_v13, 0.0  ;;  %vm77_vm1 = vcmp.gt.f32.partialorder %v61_v14, 0.0  ;;  %v92_v22 = vmul.f32 0.2, %v60_v13  ;;  %v93_v23 = vmul.f32 0.2, %v61_v14 }
   0x8   :  { %vm78_vm2 = vcmp.gt.f32.partialorder %v62_v18, 0.0  ;;  %vm79_vm3 = vcmp.gt.f32.partialorder %v63_v19, 0.0  ;;  %v94_v24 = vmul.f32 0.2, %v62_v18  ;;  %v95_v25 = vmul.f32 0.2, %v63_v19 }
   0x9   :  { %v108_v26 = vsel %vm76_vm0, %v60_v13, %v92_v22  ;;  %v109_v27 = vsel %vm77_vm1, %v61_v14, %v93_v23  ;;  %v64_v28 = vadd.f32 %v325_v5, %v41_v15  ;;  %vm81_vm5 = vcmp.gt.f32.partialorder %v65_v29, 0.0 }
   0xa   :  { %v245_v30 = vpack.c.bf16 %v109_v27, %v108_v26  ;;  %v110_v31 = vsel %vm78_vm2, %v62_v18, %v94_v24  ;;  %v111_v32 = vsel %vm79_vm3, %v63_v19, %v95_v25  ;;  %v97_v39 = vmul.f32 0.2, %v65_v29 }
   0xb   :  { %v250_v37 = vpack.c.bf16 %v111_v32, %v110_v31  ;;  %vm80_vm4 = vcmp.gt.f32.partialorder %v64_v28, 0.0  ;;  %v96_v38 = vmul.f32 0.2, %v64_v28  ;;  %vm82_vm6 = vcmp.gt.f32.partialorder %v66_v33, 0.0 }
   0xc   :  { %246 = vst [vmem:[%s426_s3] sm:$0xff] %v245_v30   ;;  %v98_v41 = vmul.f32 0.2, %v66_v33  ;;  %v45_v44 = vmul.f32 %v318_v2, %v22_v34  ;;  %v46_v45 = vmul.f32 %v318_v2, %v23_v35  ;;  %v47_v46 = vmul.f32 %v318_v2, %v24_v36 }
   0xd   :  { %282 = vst [vmem:[%s426_s3 + $0x8] sm:$0xff] %v250_v37   ;;  %v112_v43 = vsel %vm80_vm4, %v64_v28, %v96_v38  ;;  %v113_v49 = vsel %vm81_vm5, %v65_v29, %v97_v39  ;;  %vm83_vm7 = vcmp.gt.f32.partialorder %v67_v40, 0.0  ;;  %v99_v50 = vmul.f32 0.2, %v67_v40 }
   0xe   :  { %v114_v51 = vsel %vm82_vm6, %v66_v33, %v98_v41  ;;  %v255_v52 = vpack.c.bf16 %v113_v49, %v112_v43  ;;  %v68_v53 = vadd.f32 %v325_v5, %v45_v44  ;;  %v69_v54 = vadd.f32 %v325_v5, %v46_v45 }
   0xf   :  { %v48_v55 = vmul.f32 %v318_v2, %v25_v42  ;;  %v115_v56 = vsel %vm83_vm7, %v67_v40, %v99_v50  ;;  %v70_v57 = vadd.f32 %v325_v5, %v47_v46  ;;  %v49_v58 = vmul.f32 %v318_v2, %v26_v47 }
  0x10   :  { %v50_v59 = vmul.f32 %v318_v2, %v27_v48  ;;  %283 = vst [vmem:[%s426_s3 + $0x10] sm:$0xff] %v255_v52   ;;  %v260_v61 = vpack.c.bf16 %v115_v56, %v114_v51  ;;  %vm84_vm8 = vcmp.gt.f32.partialorder %v68_v53, 0.0  ;;  %vm85_vm9 = vcmp.gt.f32.partialorder %v69_v54, 0.0 }
  0x11   :  { %v100_v62 = vmul.f32 0.2, %v68_v53  ;;  %v101_v63 = vmul.f32 0.2, %v69_v54  ;;  %v71_v0 = vadd.f32 %v325_v5, %v48_v55  ;;  %vm86_vm10 = vcmp.gt.f32.partialorder %v70_v57, 0.0 }
  0x12   :  { %v102_v1 = vmul.f32 0.2, %v70_v57  ;;  %284 = vst [vmem:[%s426_s3 + $0x18] sm:$0xff] %v260_v61   ;;  %v72_v4 = vadd.f32 %v325_v5, %v49_v58  ;;  %v73_v6 = vadd.f32 %v325_v5, %v50_v59  ;;  %v51_v8 = vmul.f32 %v318_v2, %v28_v60 }
  0x13   :  { %v116_v3 = vsel %vm84_vm8, %v68_v53, %v100_v62  ;;  %v117_v9 = vsel %vm85_vm9, %v69_v54, %v101_v63  ;;  %vm87_vm11 = vcmp.gt.f32.partialorder %v71_v0, 0.0  ;;  %v103_v10 = vmul.f32 0.2, %v71_v0 }
  0x14   :  { %v118_v11 = vsel %vm86_vm10, %v70_v57, %v102_v1  ;;  %v265_v12 = vpack.c.bf16 %v117_v9, %v116_v3  ;;  %vm88_vm12 = vcmp.gt.f32.partialorder %v72_v4, 0.0  ;;  %vm89_vm13 = vcmp.gt.f32.partialorder %v73_v6, 0.0 }
  0x15   :  { %v104_v13 = vmul.f32 0.2, %v72_v4  ;;  %v119_v14 = vsel %vm87_vm11, %v71_v0, %v103_v10  ;;  %v105_v15 = vmul.f32 0.2, %v73_v6  ;;  %v52_v16 = vmul.f32 %v318_v2, %v29_v7 }
  0x16   :  { %v74_v17 = vadd.f32 %v325_v5, %v51_v8  ;;  %285 = vst [vmem:[%s426_s3 + $0x20] sm:$0xff] %v265_v12   ;;  %v270_v18 = vpack.c.bf16 %v119_v14, %v118_v11 }
  0x17   :  { %v120_v19 = vsel %vm88_vm12, %v72_v4, %v104_v13  ;;  %v121_v20 = vsel %vm89_vm13, %v73_v6, %v105_v15  ;;  %v75_v21 = vadd.f32 %v325_v5, %v52_v16 }
  0x18   :  { %vm90_vm14 = vcmp.gt.f32.partialorder %v74_v17, 0.0  ;;  %v106_v22 = vmul.f32 0.2, %v74_v17  ;;  %286 = vst [vmem:[%s426_s3 + $0x28] sm:$0xff] %v270_v18   ;;  %v275_v23 = vpack.c.bf16 %v121_v20, %v120_v19 }
  0x19   :  { %vm91_vm15 = vcmp.gt.f32.partialorder %v75_v21, 0.0  ;;  %v107_v2 = vmul.f32 0.2, %v75_v21 }
  0x1a   :  { %v122_v24 = vsel %vm90_vm14, %v74_v17, %v106_v22  ;;  %287 = vst [vmem:[%s426_s3 + $0x30] sm:$0xff] %v275_v23  }
  0x1b   :  { %v123_v25 = vsel %vm91_vm15, %v75_v21, %v107_v2 }
  0x1c   :  { %v280_v26 = vpack.c.bf16 %v123_v25, %v122_v24 }
  0x1e   :  { %288 = vst [vmem:[%s426_s3 + $0x38] sm:$0xff] %v280_v26  }

// kernel: discriminator_forward.13
= control target key start
LH: loop header
LB: loop body
LE: loop exit
PB: predicated region body
PF: predicated region fallthrough
CT: control target
= control target key end

     0   :  { %s779_s1 = inlined_call_operand.vmem [shape: bf16[512,128], index: 1, kind: input, shape index: {}]   ;;  %s780_s0 = inlined_call_operand.vmem [shape: bf16[32,512], index: 0, kind: input, shape index: {}]   ;;  %s781_s2 = inlined_call_operand.vmem [shape: f32[32,128], index: 2, kind: output, shape index: {0}]   ;;  %s782_s3 = inlined_call_operand.vmem [shape: f32[8,128], index: 3, kind: output, shape index: {1}]  }
   0x1   :  { %v580_v0 = vld [vmem:[%s779_s1 + $0x78] sm:$0xff]   ;;  %v584_v4 = vld [vmem:[%s779_s1 + $0x70] sm:$0xff]   ;;  %v588_v8 = vld [vmem:[%s779_s1 + $0x68] sm:$0xff]  }
   0x2   :  { %v581_v1 = vld [vmem:[%s779_s1 + $0xf8] sm:$0xff]   ;;  %524 = vmatprep.subr.bf16.mxu0 %v580_v0  ;;  %v585_v5 = vld [vmem:[%s779_s1 + $0xf0] sm:$0xff]   ;;  %v589_v9 = vld [vmem:[%s779_s1 + $0xe8] sm:$0xff]  }
   0x3   :  { %v582_v2 = vld [vmem:[%s779_s1 + $0x38] sm:$0xff]   ;;  %552 = vmatprep.subr.bf16.mxu1 %v581_v1  ;;  %v586_v6 = vld [vmem:[%s779_s1 + $0x30] sm:$0xff]   ;;  %v590_v10 = vld [vmem:[%s779_s1 + $0x28] sm:$0xff]  }
   0x4   :  { %v583_v3 = vld [vmem:[%s779_s1 + $0xb8] sm:$0xff]   ;;  %525 = vmatpush3.bf16.msra.mxu0 %v582_v2  ;;  %v587_v7 = vld [vmem:[%s779_s1 + $0xb0] sm:$0xff]   ;;  %v591_v11 = vld [vmem:[%s779_s1 + $0xa8] sm:$0xff]  }
   0x5   :  { %553 = vmatpush3.bf16.msra.mxu1 %v583_v3  ;;  %526 = vmatprep.subr.bf16.mxu0 %v584_v4  ;;  %v592_v12 = vld [vmem:[%s779_s1 + $0x60] sm:$0xff]   ;;  %v596_v16 = vld [vmem:[%s779_s1 + $0x58] sm:$0xff]   ;;  %v600_v20 = vld [vmem:[%s779_s1 + $0x50] sm:$0xff]  }
   0x6   :  { %554 = vmatprep.subr.bf16.mxu1 %v585_v5  ;;  %v593_v13 = vld [vmem:[%s779_s1 + $0xe0] sm:$0xff]   ;;  %v597_v17 = vld [vmem:[%s779_s1 + $0xd8] sm:$0xff]   ;;  %v601_v21 = vld [vmem:[%s779_s1 + $0xd0] sm:$0xff]  }
   0x7   :  { %v594_v14 = vld [vmem:[%s779_s1 + $0x20] sm:$0xff]   ;;  %v598_v18 = vld [vmem:[%s779_s1 + $0x18] sm:$0xff]   ;;  %v602_v22 = vld [vmem:[%s779_s1 + $0x10] sm:$0xff]  }
   0x8   :  { %527 = vmatpush3.bf16.msra.mxu0 %v586_v6  ;;  %v595_v15 = vld [vmem:[%s779_s1 + $0xa0] sm:$0xff]   ;;  %v599_v19 = vld [vmem:[%s779_s1 + $0x98] sm:$0xff]   ;;  %v603_v23 = vld [vmem:[%s779_s1 + $0x90] sm:$0xff]  }
   0x9   :  { %555 = vmatpush3.bf16.msra.mxu1 %v587_v7  ;;  %528 = vmatprep.subr.bf16.mxu0 %v588_v8  ;;  %v604_v24 = vld [vmem:[%s779_s1 + $0x48] sm:$0xff]   ;;  %v608_v28 = vld [vmem:[%s779_s1 + $0x40] sm:$0xff]  }
   0xa   :  { %556 = vmatprep.subr.bf16.mxu1 %v589_v9  ;;  %v605_v25 = vld [vmem:[%s779_s1 + $0xc8] sm:$0xff]   ;;  %v609_v29 = vld [vmem:[%s779_s1 + $0xc0] sm:$0xff]  }
   0xb   :  { %v606_v26 = vld [vmem:[%s779_s1 + $0x8] sm:$0xff]   ;;  %v610_v30 = vld [vmem:[%s779_s1] sm:$0xff]  }
   0xc   :  { %529 = vmatpush3.bf16.msra.mxu0 %v590_v10  ;;  %v607_v27 = vld [vmem:[%s779_s1 + $0x88] sm:$0xff]   ;;  %v611_v31 = vld [vmem:[%s779_s1 + $0x80] sm:$0xff]  }
   0xd   :  { %557 = vmatpush3.bf16.msra.mxu1 %v591_v11  ;;  %530 = vmatprep.subr.bf16.mxu0 %v592_v12  ;;  %v612_v32 = vld [vmem:[%s780_s0] ss:$16 sps:$4 sm:$0xff]   ;;  %v614_v33 = vld [vmem:[%s780_s0 + $0x4] ss:$16 sps:$4 sm:$0xff]   ;;  %v615_v34 = vld [vmem:[%s780_s0 + $0x8] ss:$16 sps:$4 sm:$0xff]  }
   0xe   :  { %558 = vmatprep.subr.bf16.mxu1 %v593_v13  ;;  %v617_v35 = vld [vmem:[%s780_s0 + $0xc] ss:$16 sps:$4 sm:$0xff]   ;;  %362 = vmatprep.mubr.bf16.mxu0 %v614_v33  ;;  %v618_v36 = vld [vmem:[%s780_s0 + $0x24] ss:$16 sps:$4 sm:$0xff]   ;;  %v622_v38 = vld [vmem:[%s780_s0 + $0x20] ss:$16 sps:$4 sm:$0xff]  }
   0xf   :  { %411 = vmatprep.mubr.bf16.mxu1 %v617_v35  ;;  %v620_v37 = vld [vmem:[%s780_s0 + $0x2c] ss:$16 sps:$4 sm:$0xff]   ;;  %v623_v39 = vld [vmem:[%s780_s0 + $0x28] ss:$16 sps:$4 sm:$0xff]  }
  0x10   :  { %531 = vmatpush3.bf16.msra.mxu0 %v594_v14 }
  0x11   :  { %559 = vmatpush3.bf16.msra.mxu1 %v595_v15  ;;  %532 = vmatprep.subr.bf16.mxu0 %v596_v16 }
  0x12   :  { %560 = vmatprep.subr.bf16.mxu1 %v597_v17  ;;  %v469_v17 = vlaneseq }
  0x14   :  { %533 = vmatpush3.bf16.msra.mxu0 %v598_v18 }
  0x15   :  { %561 = vmatpush3.bf16.msra.mxu1 %v599_v19  ;;  %534 = vmatprep.subr.bf16.mxu0 %v600_v20 }
  0x16   :  { %562 = vmatprep.subr.bf16.mxu1 %v601_v21 }
  0x18   :  { %535 = vmatpush3.bf16.msra.mxu0 %v602_v22  ;;  %v470_v22 = vshrl.u32 %v469_v17, 7 }
  0x19   :  { %563 = vmatpush3.bf16.msra.mxu1 %v603_v23  ;;  %536 = vmatprep.subr.bf16.mxu0 %v604_v24 }
  0x1a   :  { %564 = vmatprep.subr.bf16.mxu1 %v605_v25  ;;  %vm472_vm0 = vcmp.eq.s32.totalorder %v470_v22, 1  ;;  %vm471_vm1 = vcmp.eq.s32.totalorder %v470_v22, 0 }
  0x1c   :  { %537 = vmatpush3.bf16.msra.mxu0 %v606_v26 }
  0x1d   :  { %565 = vmatpush3.bf16.msra.mxu1 %v607_v27  ;;  %538 = vmatprep.subr.bf16.mxu0 %v608_v28 }
  0x1e   :  { %566 = vmatprep.subr.bf16.mxu1 %v609_v29 }
  0x20   :  { %539 = vmatpush3.bf16.msra.mxu0 %v610_v30 }
  0x21   :  { %567 = vmatpush3.bf16.msra.mxu1 %v611_v31 }
  0x23   :  { %363 = vmatmul.mubr.bf16.vlgmr.msra.gmra.mxu0 %v612_v32 }
  0x24   :  { %412 = vmatmul.mubr.bf16.vlgmr.msra.gmra.mxu1 %v615_v34  ;;  %370 = vmatprep.mubr.bf16.mxu0 %v618_v36 }
  0x25   :  { %419 = vmatprep.mubr.bf16.mxu1 %v620_v37 }
  0x2b   :  { %371 = vmatmul.mubr.bf16.gmra.mxu0 %v622_v38 }
  0x2c   :  { %420 = vmatmul.mubr.bf16.gmra.mxu1 %v623_v39 }
  0xe3   :  { %v540_v40 = vpop.f32.mrf.mxu0 }
  0xe4   :  { %v568_v41 = vpop.f32.mrf.mxu1 }
  0xe5   :  { %v541_v42 = vpop.f32.mrf.mxu0 }
  0xe6   :  { %v542_v43 = vadd.f32 %v541_v42, %v540_v40  ;;  %v569_v44 = vpop.f32.mrf.mxu1 }
  0xe7   :  { %v570_v45 = vadd.f32 %v569_v44, %v568_v41  ;;  %v543_v46 = vpop.f32.mrf.mxu0 }
  0xe8   :  { %v571_v47 = vpop.f32.mrf.mxu1 }
  0xe9   :  { %v414_v48 = vadd.f32 %v570_v45, %v542_v43  ;;  %v544_v49 = vpop.f32.mrf.mxu0 }
  0xea   :  { %v545_v50 = vadd.f32 %v544_v49, %v543_v46  ;;  %v572_v51 = vpop.f32.mrf.mxu1 }
  0xeb   :  { %443 = vst [vmem:[%s781_s2] sm:$0xff] %v414_v48  ;;  %v573_v52 = vadd.f32 %v572_v51, %v571_v47  ;;  %v546_v53 = vpop.f32.mrf.mxu0  ;;  %v456_v3 = vmul.f32 %v414_v48, %v414_v48 }
  0xec   :  { %v574_v54 = vpop.f32.mrf.mxu1 }
  0xed   :  { %v417_v55 = vadd.f32 %v573_v52, %v545_v50  ;;  %v547_v56 = vpop.f32.mrf.mxu0 }
  0xee   :  { %v548_v57 = vadd.f32 %v547_v56, %v546_v53  ;;  %v575_v58 = vpop.f32.mrf.mxu1 }
  0xef   :  { %444 = vst [vmem:[%s781_s2 + $0x8] sm:$0xff] %v417_v55  ;;  %v576_v59 = vadd.f32 %v575_v58, %v574_v54  ;;  %v549_v60 = vpop.f32.mrf.mxu0  ;;  %v457_v62 = vmul.f32 %v417_v55, %v417_v55  ;;  %v447_v4 = vadd.f32 %v417_v55, %v414_v48 }
  0xf0   :  { %v577_v61 = vpop.f32.mrf.mxu1 }
  0xf1   :  { %v422_v63 = vadd.f32 %v576_v59, %v548_v57  ;;  %v550_v0 = vpop.f32.mrf.mxu0  ;;  %v460_v7 = vadd.f32 %v457_v62, %v456_v3 }
  0xf2   :  { %v551_v1 = vadd.f32 %v550_v0, %v549_v60  ;;  %v578_v2 = vpop.f32.mrf.mxu1 }
  0xf3   :  { %445 = vst [vmem:[%s781_s2 + $0x10] sm:$0xff] %v422_v63  ;;  %v458_v5 = vmul.f32 %v422_v63, %v422_v63  ;;  %v579_v6 = vadd.f32 %v578_v2, %v577_v61  ;;  %v448_v8 = vadd.f32 %v447_v4, %v422_v63 }
  0xf5   :  { %v425_v9 = vadd.f32 %v579_v6, %v551_v1  ;;  %v461_v10 = vadd.f32 %v460_v7, %v458_v5 }
  0xf7   :  { %446 = vst [vmem:[%s781_s2 + $0x18] sm:$0xff] %v425_v9  ;;  %v449_v11 = vadd.f32 %v448_v8, %v425_v9  ;;  %v459_v12 = vmul.f32 %v425_v9, %v425_v9 }
  0xf9   :  { %v450_v13 = vrot.slane %v449_v11, 4  ;;  %v462_v14 = vadd.f32 %v461_v10, %v459_v12 }
  0xfb   :  { %v451_v15 = vadd.f32 %v450_v13, %v449_v11  ;;  %v463_v16 = vrot.slane %v462_v14, 4 }
  0xfd   :  { %v452_v18 = vrot.slane %v451_v15, 2  ;;  %v464_v19 = vadd.f32 %v463_v16, %v462_v14 }
  0xff   :  { %v453_v20 = vadd.f32 %v452_v18, %v451_v15  ;;  %v465_v21 = vrot.slane %v464_v19, 2 }
 0x101   :  { %v466_v23 = vadd.f32 %v465_v21, %v464_v19  ;;  %v454_v24 = vrot.slane %v453_v20, 1 }
 0x103   :  { %v467_v25 = vrot.slane %v466_v23, 1  ;;  %v455_v27 = vadd.f32 %v454_v24, %v453_v20 }
 0x105   :  { %v468_v26 = vadd.f32 %v467_v25, %v466_v23 }
 0x107   :  { %v473_v28 = vsel %vm472_vm0, %v468_v26, 0.0 }
 0x108   :  { %v474_v29 = vsel %vm471_vm1, %v455_v27, %v473_v28 }
 0x109   :  { %475 = vst [vmem:[%s782_s3] sm:$0xff] %v474_v29 }

// kernel: discriminator_forward.14
= control target key start
LH: loop header
LB: loop body
LE: loop exit
PB: predicated region body
PF: predicated region fallthrough
CT: control target
= control target key end

     0   :  { %s141_s0 = inlined_call_operand.vmem [shape: f32[32,128], index: 0, kind: input, shape index: {}]   ;;  %s142_s1 = inlined_call_operand.vmem [shape: f32[1,128], index: 1, kind: input, shape index: {}]   ;;  %s143_s2 = inlined_call_operand.vmem [shape: f32[1,128], index: 2, kind: input, shape index: {}]   ;;  %s144_s3 = inlined_call_operand.vmem [shape: bf16[32,128], index: 3, kind: output, shape index: {}]  }
   0x1   :  { %v14_v0 = vld [vmem:[%s141_s0] sm:$0xff]  ;;  %v15_v1 = vld [vmem:[%s141_s0 + $0x8] sm:$0xff]  ;;  %v16_v6 = vld [vmem:[%s141_s0 + $0x10] sm:$0xff] }
   0x2   :  { %v76_v2 = vld [vmem:[%s142_s1] ss:$0 sm:$0xff]  ;;  %v17_v7 = vld [vmem:[%s141_s0 + $0x18] sm:$0xff] }
   0x3   :  { %v25_v3 = vmul.f32 %v76_v2, %v14_v0  ;;  %v26_v4 = vmul.f32 %v76_v2, %v15_v1  ;;  %v77_v5 = vld [vmem:[%s143_s2] ss:$0 sm:$0xff]  ;;  %v27_v8 = vmul.f32 %v76_v2, %v16_v6  ;;  %v28_v9 = vmul.f32 %v76_v2, %v17_v7 }
   0x5   :  { %v36_v10 = vadd.f32 %v77_v5, %v25_v3  ;;  %v37_v11 = vadd.f32 %v77_v5, %v26_v4  ;;  %v38_v12 = vadd.f32 %v77_v5, %v27_v8  ;;  %v39_v13 = vadd.f32 %v77_v5, %v28_v9 }
   0x7   :  { %vm40_vm0 = vcmp.gt.f32.partialorder %v36_v10, 0.0  ;;  %vm41_vm1 = vcmp.gt.f32.partialorder %v37_v11, 0.0  ;;  %v44_v14 = vmul.f32 0.2, %v36_v10  ;;  %v45_v15 = vmul.f32 0.2, %v37_v11 }
   0x8   :  { %vm42_vm2 = vcmp.gt.f32.partialorder %v38_v12, 0.0  ;;  %vm43_vm3 = vcmp.gt.f32.partialorder %v39_v13, 0.0  ;;  %v46_v16 = vmul.f32 0.2, %v38_v12  ;;  %v47_v17 = vmul.f32 0.2, %v39_v13 }
   0x9   :  { %v48_v18 = vsel %vm40_vm0, %v36_v10, %v44_v14  ;;  %v49_v19 = vsel %vm41_vm1, %v37_v11, %v45_v15 }
   0xa   :  { %v89_v20 = vpack.c.bf16 %v49_v19, %v48_v18  ;;  %v50_v21 = vsel %vm42_vm2, %v38_v12, %v46_v16  ;;  %v51_v22 = vsel %vm43_vm3, %v39_v13, %v47_v17 }
   0xb   :  { %v94_v23 = vpack.c.bf16 %v51_v22, %v50_v21 }
   0xc   :  { %90 = vst [vmem:[%s144_s3] sm:$0xff] %v89_v20  }
   0xd   :  { %96 = vst [vmem:[%s144_s3 + $0x8] sm:$0xff] %v94_v23  }

// kernel: discriminator_forward.15
= control target key start
LH: loop header
LB: loop body
LE: loop exit
PB: predicated region body
PF: predicated region fallthrough
CT: control target
= control target key end

     0   :  { %s881_s9 = smov 0   ;;  %s883_s10 = smov 0   ;;  %s961_s0 = inlined_call_operand.vmem [shape: bf16[8,1024], index: 0, kind: input, shape index: {}]   ;;  %s962_s1 = inlined_call_operand.vmem [shape: bf16[1024,128], index: 1, kind: input, shape index: {}]   ;;  %s963_s2 = inlined_call_operand.vmem [shape: f32[8,128], index: 2, kind: output, shape index: {}]  }
   0x1   :  { %s885_s11 = smov 0  }
   0x2 LB: > { %s24_s12 = sadd.s32 1, %s859_s10  ;;  %p686_p0 = scmp.ge.s32.totalorder %s863_s11, 1  ;;  %s863_s11 = sphi %s885_s11, %s12_s11   ;;  %s859_s10 = sphi %s883_s10, %s965_s10   ;;  %s855_s9 = sphi %s881_s9, %s964_s9  }
   0x3   : > { %p25_p1 = scmp.ge.s32.totalorder %s24_s12, 2  ;;  %p156_p2 = scmp.lt.s32.totalorder %s863_s11, 3 }
   0x5   : > { %s967_s12 = smov (%p25_p1, %s24_s12), 0  ;;  %p157_p3 = pnand %p686_p0, %p156_p2 }
   0x6   : > { %s687_s13 = sshll.u32 (!%p157_p3), %s855_s9, 2  ;;  %s689_s14 = sshll.u32 (!%p157_p3), %s855_s9, 6 }
   0x7   : > { %160 = sbr.rel (%p157_p3) target bundleno = 301 (0x12d), region = 28  ;;  %p195_p4 = scmp.lt.s32.totalorder (!%p157_p3), %s687_s13, 7 }
   0x8   : > { %p203_p5 = scmp.lt.s32.totalorder (!%p157_p3), %s689_s14, 127  ;;  %p691_p6 = scmp.ne.s32.totalorder (!%p157_p3), %s855_s9, 0 }
   0xc   : > { %s969_s13 = smov (!%p195_p4, %s687_s13), 7  ;;  %s971_s14 = smov (!%p203_p5, %s689_s14), 127 }
   0xd   : > { %s688_s15 = sshll.u32 %s969_s13, 2  ;;  %s690_s19 = sshll.u32 %s971_s14, 2 }
   0xe   : > { %s906_s18 = scalar_lea.vmem %s961_s0, %s688_s15  ;;  %s911_s22 = scalar_lea.vmem %s962_s1, %s690_s19 }
   0xf   : > { %222 = sbr.rel (%p691_p6) target bundleno = 22 (0x16), region = 32 }
  0x14   : > { %v865_v0 = vmov 0.0  }
  0x15   : > { %223 = vst [vmem:[#allocation2] sm:$0xff] %v865_v0 }
  0x16 PF: > { %v801_v1 = vld [vmem:[%s911_s22 + $0x78] sm:$0xff]   ;;  %v805_v5 = vld [vmem:[%s911_s22 + $0x70] sm:$0xff]   ;;  %v809_v9 = vld [vmem:[%s911_s22 + $0x68] sm:$0xff]   ;;  %p728_p7 = scmp.ne.s32.totalorder %s855_s9, 1 }
  0x17   : > { %v802_v2 = vld [vmem:[%s911_s22 + $0xf8] sm:$0xff]   ;;  %732 = vmatprep.subr.bf16.mxu0 %v801_v1  ;;  %v806_v6 = vld [vmem:[%s911_s22 + $0xf0] sm:$0xff]   ;;  %v810_v10 = vld [vmem:[%s911_s22 + $0xe8] sm:$0xff]  }
  0x18   : > { %v803_v3 = vld [vmem:[%s911_s22 + $0x38] sm:$0xff]   ;;  %754 = vmatprep.subr.bf16.mxu1 %v802_v2  ;;  %v807_v7 = vld [vmem:[%s911_s22 + $0x30] sm:$0xff]   ;;  %v811_v11 = vld [vmem:[%s911_s22 + $0x28] sm:$0xff]  }
  0x19   : > { %v804_v4 = vld [vmem:[%s911_s22 + $0xb8] sm:$0xff]   ;;  %733 = vmatpush3.bf16.msra.mxu0 %v803_v3  ;;  %v808_v8 = vld [vmem:[%s911_s22 + $0xb0] sm:$0xff]   ;;  %v812_v12 = vld [vmem:[%s911_s22 + $0xa8] sm:$0xff]  }
  0x1a   : > { %755 = vmatpush3.bf16.msra.mxu1 %v804_v4  ;;  %734 = vmatprep.subr.bf16.mxu0 %v805_v5  ;;  %v813_v13 = vld [vmem:[%s911_s22 + $0x60] sm:$0xff]   ;;  %v817_v17 = vld [vmem:[%s911_s22 + $0x58] sm:$0xff]   ;;  %v821_v21 = vld [vmem:[%s911_s22 + $0x50] sm:$0xff]  }
  0x1b   : > { %756 = vmatprep.subr.bf16.mxu1 %v806_v6  ;;  %v814_v14 = vld [vmem:[%s911_s22 + $0xe0] sm:$0xff]   ;;  %v818_v18 = vld [vmem:[%s911_s22 + $0xd8] sm:$0xff]   ;;  %v822_v22 = vld [vmem:[%s911_s22 + $0xd0] sm:$0xff]  }
  0x1c   : > { %v815_v15 = vld [vmem:[%s911_s22 + $0x20] sm:$0xff]   ;;  %v819_v19 = vld [vmem:[%s911_s22 + $0x18] sm:$0xff]   ;;  %v823_v23 = vld [vmem:[%s911_s22 + $0x10] sm:$0xff]  }
  0x1d   : > { %735 = vmatpush3.bf16.msra.mxu0 %v807_v7  ;;  %v816_v16 = vld [vmem:[%s911_s22 + $0xa0] sm:$0xff]   ;;  %v820_v20 = vld [vmem:[%s911_s22 + $0x98] sm:$0xff]   ;;  %v824_v24 = vld [vmem:[%s911_s22 + $0x90] sm:$0xff]  }
  0x1e   : > { %757 = vmatpush3.bf16.msra.mxu1 %v808_v8  ;;  %736 = vmatprep.subr.bf16.mxu0 %v809_v9  ;;  %v825_v25 = vld [vmem:[%s911_s22 + $0x48] sm:$0xff]   ;;  %v829_v29 = vld [vmem:[%s911_s22 + $0x40] sm:$0xff]  }
  0x1f   : > { %758 = vmatprep.subr.bf16.mxu1 %v810_v10  ;;  %v826_v26 = vld [vmem:[%s911_s22 + $0xc8] sm:$0xff]   ;;  %v830_v30 = vld [vmem:[%s911_s22 + $0xc0] sm:$0xff]  }
  0x20   : > { %v827_v27 = vld [vmem:[%s911_s22 + $0x8] sm:$0xff]   ;;  %v831_v31 = vld [vmem:[%s911_s22] sm:$0xff]  }
  0x21   : > { %737 = vmatpush3.bf16.msra.mxu0 %v811_v11  ;;  %v828_v28 = vld [vmem:[%s911_s22 + $0x88] sm:$0xff]   ;;  %v832_v32 = vld [vmem:[%s911_s22 + $0x80] sm:$0xff]  }
  0x22   : > { %759 = vmatpush3.bf16.msra.mxu1 %v812_v12  ;;  %738 = vmatprep.subr.bf16.mxu0 %v813_v13  ;;  %v225_v33 = vld [vmem:[%s906_s18] sm:$0xff]  ;;  %v226_v34 = vld [vmem:[%s906_s18 + $0x8] sm:$0xff] }
  0x23   : > { %760 = vmatprep.subr.bf16.mxu1 %v814_v14  ;;  %v692_v35 = vcombine.low %v225_v33, %v225_v33  ;;  %v693_v36 = vcombine.high %v225_v33, %v225_v33  ;;  %v694_v37 = vcombine.low %v226_v34, %v226_v34  ;;  %v695_v38 = vcombine.high %v226_v34, %v226_v34  ;;  %v224_v45 = vld [vmem:[#allocation2] sm:$0xff] }
  0x25   : > { %739 = vmatpush3.bf16.msra.mxu0 %v815_v15  ;;  %529 = vmatprep.mubr.bf16.mxu0 %v693_v36 }
  0x26   : > { %761 = vmatpush3.bf16.msra.mxu1 %v816_v16  ;;  %740 = vmatprep.subr.bf16.mxu0 %v817_v17 }
  0x27   : > { %762 = vmatprep.subr.bf16.mxu1 %v818_v18  ;;  %569 = vmatprep.mubr.bf16.mxu1 %v695_v38 }
  0x29   : > { %741 = vmatpush3.bf16.msra.mxu0 %v819_v19 }
  0x2a   : > { %763 = vmatpush3.bf16.msra.mxu1 %v820_v20  ;;  %742 = vmatprep.subr.bf16.mxu0 %v821_v21 }
  0x2b   : > { %764 = vmatprep.subr.bf16.mxu1 %v822_v22 }
  0x2d   : > { %743 = vmatpush3.bf16.msra.mxu0 %v823_v23 }
  0x2e   : > { %765 = vmatpush3.bf16.msra.mxu1 %v824_v24  ;;  %744 = vmatprep.subr.bf16.mxu0 %v825_v25 }
  0x2f   : > { %766 = vmatprep.subr.bf16.mxu1 %v826_v26 }
  0x31   : > { %745 = vmatpush3.bf16.msra.mxu0 %v827_v27 }
  0x32   : > { %767 = vmatpush3.bf16.msra.mxu1 %v828_v28  ;;  %746 = vmatprep.subr.bf16.mxu0 %v829_v29 }
  0x33   : > { %768 = vmatprep.subr.bf16.mxu1 %v830_v30 }
  0x35   : > { %747 = vmatpush3.bf16.msra.mxu0 %v831_v31 }
  0x36   : > { %769 = vmatpush3.bf16.msra.mxu1 %v832_v32 }
  0x38   : > { %530 = vmatmul.mubr.bf16.vlgmr.msra.gmra.mxu0 %v692_v35 }
  0x39   : > { %570 = vmatmul.mubr.bf16.vlgmr.msra.gmra.mxu1 %v694_v37 }
  0xf8   : > { %v748_v39 = vpop.f32.mrf.mxu0 }
  0xf9   : > { %v770_v40 = vpop.f32.mrf.mxu1 }
  0xfa   : > { %v749_v41 = vpop.f32.mrf.mxu0 }
  0xfb   : > { %v771_v42 = vpop.f32.mrf.mxu1  ;;  %v750_v43 = vadd.f32 %v749_v41, %v748_v39 }
  0xfc   : > { %v772_v44 = vadd.f32 %v771_v42, %v770_v40  ;;  %v751_v46 = vpop.f32.mrf.mxu0 }
  0xfd   : > { %v773_v47 = vpop.f32.mrf.mxu1 }
  0xfe   : > { %v572_v48 = vadd.f32 %v772_v44, %v750_v43  ;;  %v752_v49 = vpop.f32.mrf.mxu0  ;;  %582 = sbr.rel (%p728_p7) target bundleno = 301 (0x12d), region = 36 }
  0xff   : > { %v774_v50 = vpop.f32.mrf.mxu1 }
 0x100   : > { %v577_v51 = vadd.f32 %v572_v48, %v224_v45 }
 0x102   : > { %578 = vst [vmem:[#allocation2] sm:$0xff] %v577_v51 }
 0x109   : > { %v583_v52 = vld [vmem:[#allocation2] sm:$0xff] }
 0x10a   : > { %v584_v53 = vsub.f32 0.0, %v583_v52 }
 0x10c   : > { %v585_v54 = vmul.f32 1.442695, %v584_v53 }
 0x10e   : > { %837 = vpow2.f32 %v585_v54 }
 0x11b   : > { %v838_v55 = vpop.eup %837 }
 0x11c   : > { %v587_v56 = vadd.f32 1.0, %v838_v55 }
 0x11e   : > { %839 = vrcp.f32 %v587_v56 }
 0x12b   : > { %v840_v57 = vpop.eup %839 }
 0x12c   : > { %589 = vst [vmem:[%s963_s2] sm:$0xff] %v840_v57 }
 0x12d PF: > { %s12_s11 = sadd.s32 1, %s863_s11   ;;  %s964_s9 = smov %s859_s10 }
 0x12e   : > { %p9_p8 = scmp.ge.s32.totalorder %s12_s11, 4   ;;  %s965_s10 = smov %s967_s12 }
 0x130   :  { %11 = sbr.rel (!%p9_p8) target bundleno = 2 (0x2), region = 69 }

</bundles_post_ra>
